<compile_context>
chip_gen: v7x
topology: tpu7x:2x2x1
jax: 0.10.0
libtpu: 0.0.40
codegen_flags: <defaults>
</compile_context>

<pallas_src>
import functools

import jax
import jax.numpy as jnp
from jax import lax
from jax.experimental import pallas as pl
from jax.experimental.pallas import tpu as pltpu


def _l0loss_kernel(w_ik_ref, w_ki_ref, y_k_ref, y_i_ref, grads_ref,
                   acc_ref, deg_ref, *, beta, tile):
    i = pl.program_id(0)          # output row-tile (parallel)
    k = pl.program_id(1)          # contraction tile (arbitrary / reduction)
    nk = pl.num_programs(1)

    @pl.when(k == 0)
    def _init():
        acc_ref[...] = jnp.zeros_like(acc_ref)
        deg_ref[...] = jnp.zeros_like(deg_ref)

    rows = lax.broadcasted_iota(jnp.int32, (tile, tile), 0)
    cols = lax.broadcasted_iota(jnp.int32, (tile, tile), 1)
    # Row tile and reduction tile are the same size, so the global diagonal of
    # W can only fall inside blocks with i == k (and then at rows == cols) for
    # both the (i,k) and the (k,i) block.
    on_diag = jnp.logical_and(i == k, rows == cols)

    # W with its global diagonal zeroed (csgraph.laplacian ignores the diag).
    w_ik = jnp.where(on_diag, 0.0, w_ik_ref[...].astype(jnp.float32))  # W_off[i_blk, k_blk]
    w_ki = jnp.where(on_diag, 0.0, w_ki_ref[...].astype(jnp.float32))  # W_off[k_blk, i_blk]

    y_k = y_k_ref[...].astype(jnp.float32)

    # Accumulate  -(W_off + W_off^T)[i_blk, k_blk] @ Y[k_blk]   on the MXU.
    acc_ref[...] -= (
        jnp.dot(w_ik, y_k, preferred_element_type=jnp.float32)
        + lax.dot_general(w_ki, y_k, (((0,), (0,)), ((), ())),   # w_ki^T @ y_k
                          preferred_element_type=jnp.float32))

    # Degree accumulation: deg[i_blk] += column sums of W_off[k_blk, i_blk]
    # (scipy's default in-degree, i.e. sum over axis 0 of the full W_off).
    deg_ref[...] += jnp.sum(w_ki, axis=0, keepdims=True)         # (1, tile)

    @pl.when(k == nk - 1)
    def _finalize():
        y_i = y_i_ref[...].astype(jnp.float32)
        # ||Y_i||_0 per row (count of nonzeros), as a column vector.
        nnz = jnp.sum((y_i != 0.0).astype(jnp.float32), axis=1, keepdims=True)
        # Turn the accumulated (1, tile) degree row into a (tile, 1) column
        # using only broadcast + iota-mask + lane reduction (no transpose).
        deg_b = jnp.broadcast_to(deg_ref[...], (tile, tile))
        deg_col = jnp.sum(jnp.where(rows == cols, deg_b, 0.0),
                          axis=1, keepdims=True)                 # (tile, 1)
        grads = acc_ref[...] + (2.0 * deg_col + beta * nnz) * y_i
        grads_ref[...] = grads.astype(grads_ref.dtype)


def l0_loss(Y, W, *, beta=1.0, tile=256):
    """Y: (N, K) features; W: (N, N) adjacency. Returns (loss, grads)."""
    N, K = Y.shape
    assert W.shape == (N, N), "W must be (N, N) with N = Y.shape[0]"
    assert tile >= 128 and tile % 128 == 0, "tile must be a multiple of 128"

    # Clamp the tile so tiny problems don't over-pad; keep it 128-aligned.
    tile = min(tile, pl.cdiv(N, 128) * 128)
    n_pad = pl.cdiv(N, tile) * tile
    k_pad = pl.cdiv(K, 128) * 128
    n_blocks = n_pad // tile

    # Zero padding keeps semantics exact: padded rows/cols of W and Y are zero,
    # so they contribute nothing to degrees, matmuls, nnz counts or the sum.
    Wp = jnp.pad(W, ((0, n_pad - N), (0, n_pad - N)))
    Yp = jnp.pad(Y, ((0, n_pad - N), (0, k_pad - K)))

    kernel = functools.partial(_l0loss_kernel, beta=float(beta), tile=tile)

    grads_pad = pl.pallas_call(
        kernel,
        out_shape=jax.ShapeDtypeStruct((n_pad, k_pad), jnp.float32),
        grid_spec=pltpu.PrefetchScalarGridSpec(
            num_scalar_prefetch=0,
            grid=(n_blocks, n_blocks),
            in_specs=[
                pl.BlockSpec((tile, tile), lambda i, k: (i, k)),   # W[i_blk, k_blk]
                pl.BlockSpec((tile, tile), lambda i, k: (k, i)),   # W[k_blk, i_blk]
                pl.BlockSpec((tile, k_pad), lambda i, k: (k, 0)),  # Y[k_blk]
                pl.BlockSpec((tile, k_pad), lambda i, k: (i, 0)),  # Y[i_blk]
            ],
            out_specs=pl.BlockSpec((tile, k_pad), lambda i, k: (i, 0)),
            scratch_shapes=[
                pltpu.VMEM((tile, k_pad), jnp.float32),  # grads accumulator
                pltpu.VMEM((1, tile), jnp.float32),      # degree accumulator
            ],
        ),
        compiler_params=pltpu.CompilerParams(
            dimension_semantics=("parallel", "arbitrary")),
    )(Wp, Wp, Yp, Yp)

    grads = grads_pad[:N, :K]
    loss = jnp.abs(jnp.sum(grads_pad)) / N      # padded entries are exactly 0
    return loss, grads


def _reference(Y, W, beta):
    """Pure-JAX replica of the PyTorch module (scipy laplacian semantics)."""
    N = W.shape[0]
    W_off = W * (1.0 - jnp.eye(N, dtype=W.dtype))
    deg = jnp.sum(W_off, axis=0)                      # column-sum (in-)degrees
    L = jnp.diag(deg) - W_off
    YLY = L @ Y + L.T @ Y
    nnz = jnp.sum(Y != 0, axis=1).astype(jnp.float32)  # torch.norm(p=0, dim=1)
    DY = beta * nnz[:, None] * Y
    grads = YLY + DY
    loss = jnp.abs(jnp.sum(grads)) / N
    return loss, grads


if __name__ == "__main__":
    key = jax.random.PRNGKey(0)
    kw, ky = jax.random.split(key)

    # Small deterministic example: N=320 graph nodes (exercises padding to 512
    # and a 2x2 grid with a real k-reduction), K=32 features, beta=1.0.
    N, K = 320, 32
    beta = 1.0

    # Asymmetric 0/1 adjacency with zero diagonal (exercises the W^T stream and
    # the column-sum degrees); small-integer sparse features. Integer-valued
    # data keeps the MXU matmuls exact, so the comparison with the pure-JAX
    # reference is numerically tight.
    W = (jax.random.uniform(kw, (N, N)) < 0.1).astype(jnp.float32)
    W = W * (1.0 - jnp.eye(N, dtype=jnp.float32))
    Yr = jax.random.uniform(ky, (N, K))
    Y = jnp.where(Yr > 0.5, jnp.floor(8.0 * (Yr - 0.5)) + 1.0, 0.0)
    Y = Y.astype(jnp.float32)

    fn = jax.jit(functools.partial(l0_loss, beta=beta))
    loss, grads = fn(Y, W)
    loss, grads = jax.block_until_ready((loss, grads))

    ref_loss, ref_grads = _reference(Y, W, beta)
    assert grads.shape == (N, K)
    assert jnp.allclose(grads, ref_grads, rtol=1e-4, atol=1e-3), "grads mismatch"
    assert jnp.allclose(loss, ref_loss, rtol=1e-4, atol=1e-3), (loss, ref_loss)
    print("KERNEL_OK")
</pallas_src>

<mosaic_0001>
module attributes {stable_mosaic.version = 11 : i64} {
  func.func @_l0loss_kernel(%arg0: i32, %arg1: i32, %arg2: memref<256x256xf32, #tpu.memory_space<vmem>>, %arg3: memref<256x256xf32, #tpu.memory_space<vmem>>, %arg4: memref<256x128xf32, #tpu.memory_space<vmem>>, %arg5: memref<256x128xf32, #tpu.memory_space<vmem>>, %arg6: memref<256x128xf32, #tpu.memory_space<vmem>>, %arg7: memref<256x128xf32, #tpu.memory_space<vmem>>, %arg8: memref<1x256xf32, #tpu.memory_space<vmem>>) attributes {dimension_semantics = [#tpu.dimension_semantics<parallel>, #tpu.dimension_semantics<arbitrary>], iteration_bounds = array<i64: 2, 2>, scalar_prefetch = 0 : i64, scratch_operands = 2 : i64, tpu.core_type = #tpu.core_type<tc>, window_params = [{transform_indices = @transform_0, window_bounds = array<i64: 256, 256>}, {transform_indices = @transform_1, window_bounds = array<i64: 256, 256>}, {transform_indices = @transform_2, window_bounds = array<i64: 256, 128>}, {transform_indices = @transform_3, window_bounds = array<i64: 256, 128>}, {transform_indices = @transform_4, window_bounds = array<i64: 256, 128>}]} {
    %c0_i32 = arith.constant 0 : i32
    %0 = arith.cmpi eq, %arg1, %c0_i32 : i32
    %1 = arith.extui %0 : i1 to i32
    %c0_i32_0 = arith.constant 0 : i32
    %2 = arith.cmpi ne, %1, %c0_i32_0 : i32
    scf.if %2 {
      %cst_19 = arith.constant 0.000000e+00 : f32
      %30 = vector.broadcast %cst_19 : f32 to vector<256x128xf32>
      %c0_20 = arith.constant 0 : index
      %c0_21 = arith.constant 0 : index
      %31 = vector.load %arg7[%c0_20, %c0_21] : memref<256x128xf32, #tpu.memory_space<vmem>>, vector<256x128xf32>
      tpu.vector_store %arg7[%c0_20, %c0_21], %30 {strides = array<i32>} : memref<256x128xf32, #tpu.memory_space<vmem>>, vector<256x128xf32>,
      %cst_22 = arith.constant 0.000000e+00 : f32
      %32 = vector.broadcast %cst_22 : f32 to vector<1x256xf32>
      %c0_23 = arith.constant 0 : index
      %c0_24 = arith.constant 0 : index
      %33 = vector.load %arg8[%c0_23, %c0_24] : memref<1x256xf32, #tpu.memory_space<vmem>>, vector<1x256xf32>
      tpu.vector_store %arg8[%c0_23, %c0_24], %32 {strides = array<i32>} : memref<1x256xf32, #tpu.memory_space<vmem>>, vector<1x256xf32>,
    } else {
    }
    %3 = tpu.iota {dimensions = array<i32: 0>} : vector<256x256xi32>
    %4 = tpu.iota {dimensions = array<i32: 1>} : vector<256x256xi32>
    %5 = arith.cmpi eq, %arg0, %arg1 : i32
    %6 = arith.cmpi eq, %3, %4 : vector<256x256xi32>
    %7 = vector.broadcast %5 : i1 to vector<256x256xi1>
    %8 = arith.andi %7, %6 : vector<256x256xi1>
    %c0 = arith.constant 0 : index
    %c0_1 = arith.constant 0 : index
    %9 = vector.load %arg2[%c0, %c0_1] : memref<256x256xf32, #tpu.memory_space<vmem>>, vector<256x256xf32>
    %cst = arith.constant 0.000000e+00 : f32
    %10 = vector.broadcast %cst : f32 to vector<256x256xf32>
    %11 = arith.select %8, %10, %9 : vector<256x256xi1>, vector<256x256xf32>
    %c0_2 = arith.constant 0 : index
    %c0_3 = arith.constant 0 : index
    %12 = vector.load %arg3[%c0_2, %c0_3] : memref<256x256xf32, #tpu.memory_space<vmem>>, vector<256x256xf32>
    %cst_4 = arith.constant 0.000000e+00 : f32
    %13 = vector.broadcast %cst_4 : f32 to vector<256x256xf32>
    %14 = arith.select %8, %13, %12 : vector<256x256xi1>, vector<256x256xf32>
    %c0_5 = arith.constant 0 : index
    %c0_6 = arith.constant 0 : index
    %15 = vector.load %arg4[%c0_5, %c0_6] : memref<256x128xf32, #tpu.memory_space<vmem>>, vector<256x128xf32>
    %c0_7 = arith.constant 0 : index
    %c0_8 = arith.constant 0 : index
    %16 = vector.load %arg7[%c0_7, %c0_8] : memref<256x128xf32, #tpu.memory_space<vmem>>, vector<256x128xf32>
    %cst_9 = arith.constant dense<0.000000e+00> : vector<256x128xf32>
    %17 = tpu.matmul %11, %15, %cst_9 {dimension_numbers = #tpu.dot_dimension_numbers<[1], [0], [0], [1], [0, 0, 1, 1], [], []>} : vector<256x256xf32>, vector<256x128xf32>, vector<256x128xf32> -> vector<256x128xf32>
    %cst_10 = arith.constant dense<0.000000e+00> : vector<256x128xf32>
    %18 = tpu.matmul %14, %15, %cst_10 {dimension_numbers = #tpu.dot_dimension_numbers<[0], [0], [1], [1], [0, 1, 1, 1], [], []>} : vector<256x256xf32>, vector<256x128xf32>, vector<256x128xf32> -> vector<256x128xf32>
    %19 = arith.addf %17, %18 : vector<256x128xf32>
    %20 = arith.subf %16, %19 : vector<256x128xf32>
    %c0_11 = arith.constant 0 : index
    %c0_12 = arith.constant 0 : index
    %21 = vector.load %arg7[%c0_11, %c0_12] : memref<256x128xf32, #tpu.memory_space<vmem>>, vector<256x128xf32>
    tpu.vector_store %arg7[%c0_11, %c0_12], %20 {strides = array<i32>} : memref<256x128xf32, #tpu.memory_space<vmem>>, vector<256x128xf32>,
    %c0_13 = arith.constant 0 : index
    %c0_14 = arith.constant 0 : index
    %22 = vector.load %arg8[%c0_13, %c0_14] : memref<1x256xf32, #tpu.memory_space<vmem>>, vector<1x256xf32>
    %cst_15 = arith.constant dense<0.000000e+00> : vector<256xf32>
    %23 = vector.multi_reduction <add>, %14, %cst_15 [0] : vector<256x256xf32> to vector<256xf32>
    %24 = vector.shape_cast %23 : vector<256xf32> to vector<1x256xf32>
    %25 = arith.addf %22, %24 : vector<1x256xf32>
    %c0_16 = arith.constant 0 : index
    %c0_17 = arith.constant 0 : index
    %26 = vector.load %arg8[%c0_16, %c0_17] : memref<1x256xf32, #tpu.memory_space<vmem>>, vector<1x256xf32>
    tpu.vector_store %arg8[%c0_16, %c0_17], %25 {strides = array<i32>} : memref<1x256xf32, #tpu.memory_space<vmem>>, vector<1x256xf32>,
    %c1_i32 = arith.constant 1 : i32
    %27 = arith.cmpi eq, %arg1, %c1_i32 : i32
    %28 = arith.extui %27 : i1 to i32
    %c0_i32_18 = arith.constant 0 : i32
    %29 = arith.cmpi ne, %28, %c0_i32_18 : i32
    scf.if %29 {
      %c0_19 = arith.constant 0 : index
      %c0_20 = arith.constant 0 : index
      %30 = vector.load %arg5[%c0_19, %c0_20] : memref<256x128xf32, #tpu.memory_space<vmem>>, vector<256x128xf32>
      %cst_21 = arith.constant 0.000000e+00 : f32
      %31 = vector.broadcast %cst_21 : f32 to vector<256x128xf32>
      %32 = arith.cmpf one, %30, %31 : vector<256x128xf32>
      %33 = arith.extui %32 : vector<256x128xi1> to vector<256x128xi32>
      %34 = arith.sitofp %33 : vector<256x128xi32> to vector<256x128xf32>
      %cst_22 = arith.constant dense<0.000000e+00> : vector<256xf32>
      %35 = vector.multi_reduction <add>, %34, %cst_22 [1] : vector<256x128xf32> to vector<256xf32>
      %36 = vector.shape_cast %35 : vector<256xf32> to vector<256x1xf32>
      %c0_23 = arith.constant 0 : index
      %c0_24 = arith.constant 0 : index
      %37 = vector.load %arg8[%c0_23, %c0_24] : memref<1x256xf32, #tpu.memory_space<vmem>>, vector<1x256xf32>
      %38 = vector.shape_cast %37 : vector<1x256xf32> to vector<1x256xf32>
      %39 = vector.broadcast %38 : vector<1x256xf32> to vector<256x256xf32>
      %40 = arith.cmpi eq, %3, %4 : vector<256x256xi32>
      %cst_25 = arith.constant 0.000000e+00 : f32
      %41 = vector.broadcast %cst_25 : f32 to vector<256x256xf32>
      %42 = arith.select %40, %39, %41 : vector<256x256xi1>, vector<256x256xf32>
      %cst_26 = arith.constant dense<0.000000e+00> : vector<256xf32>
      %43 = vector.multi_reduction <add>, %42, %cst_26 [1] : vector<256x256xf32> to vector<256xf32>
      %44 = vector.shape_cast %43 : vector<256xf32> to vector<256x1xf32>
      %c0_27 = arith.constant 0 : index
      %c0_28 = arith.constant 0 : index
      %45 = vector.load %arg7[%c0_27, %c0_28] : memref<256x128xf32, #tpu.memory_space<vmem>>, vector<256x128xf32>
      %cst_29 = arith.constant 2.000000e+00 : f32
      %46 = vector.broadcast %cst_29 : f32 to vector<256x1xf32>
      %47 = arith.mulf %46, %44 : vector<256x1xf32>
      %cst_30 = arith.constant 1.000000e+00 : f32
      %48 = vector.broadcast %cst_30 : f32 to vector<256x1xf32>
      %49 = arith.mulf %48, %36 : vector<256x1xf32>
      %50 = arith.addf %47, %49 : vector<256x1xf32>
      %51 = vector.broadcast %50 : vector<256x1xf32> to vector<256x128xf32>
      %52 = arith.mulf %51, %30 : vector<256x128xf32>
      %53 = arith.addf %45, %52 : vector<256x128xf32>
      %c0_31 = arith.constant 0 : index
      %c0_32 = arith.constant 0 : index
      %54 = vector.load %arg6[%c0_31, %c0_32] : memref<256x128xf32, #tpu.memory_space<vmem>>, vector<256x128xf32>
      tpu.vector_store %arg6[%c0_31, %c0_32], %53 {strides = array<i32>} : memref<256x128xf32, #tpu.memory_space<vmem>>, vector<256x128xf32>,
    } else {
    }
    return
  }
  func.func @transform_0(%arg0: i32, %arg1: i32) -> (i32, i32) {
    %c0_i32 = arith.constant 0 : i32
    return %arg0, %arg1 : i32, i32
  }
  func.func @transform_1(%arg0: i32, %arg1: i32) -> (i32, i32) {
    %c0_i32 = arith.constant 0 : i32
    return %arg1, %arg0 : i32, i32
  }
  func.func @transform_2(%arg0: i32, %arg1: i32) -> (i32, i32) {
    %c0_i32 = arith.constant 0 : i32
    %c0_i32_0 = arith.constant 0 : i32
    return %arg1, %c0_i32 : i32, i32
  }
  func.func @transform_3(%arg0: i32, %arg1: i32) -> (i32, i32) {
    %c0_i32 = arith.constant 0 : i32
    %c0_i32_0 = arith.constant 0 : i32
    return %arg0, %c0_i32 : i32, i32
  }
  func.func @transform_4(%arg0: i32, %arg1: i32) -> (i32, i32) {
    %c0_i32 = arith.constant 0 : i32
    %c0_i32_0 = arith.constant 0 : i32
    return %arg0, %c0_i32 : i32, i32
  }
}

</mosaic_0001>

<bundles_post_ra>
// kernel: l0_loss.1
= control target key start
LH: loop header
LB: loop body
LE: loop exit
PB: predicated region body
PF: predicated region fallthrough
CT: control target
= control target key end

     0   :  { %s3155_s15 = smov 0   ;;  %s3157_s16 = smov 0   ;;  %s5014_s0 = inlined_call_operand.vmem [shape: f32[512,512], index: 0, kind: input, shape index: {}, may-alias: {0,1}]   ;;  %s5015_s1 = inlined_call_operand.vmem [shape: f32[512,512], index: 1, kind: input, shape index: {}, may-alias: {0,1}]   ;;  %s5016_s2 = inlined_call_operand.vmem [shape: f32[512,128], index: 2, kind: input, shape index: {}, may-alias: {2,3}]   ;;  %s5017_s3 = inlined_call_operand.vmem [shape: f32[512,128], index: 3, kind: input, shape index: {}, may-alias: {2,3}]   ;;  %s5018_s4 = inlined_call_operand.vmem [shape: f32[512,128], index: 4, kind: output, shape index: {}]  }
   0x1   :  { %s3159_s17 = smov 0   ;;  %s3161_s18 = smov 0  }
   0x2   :  { %s3163_s19 = smov 0   ;;  %s3165_s20 = smov 0  }
   0x3   :  { %s3167_s21 = smov 0  }
   0x4 LB: > { %s23_s22 = sadd.s32 1, %s3116_s19  ;;  %s26_s23 = sadd.s32 1, %s3120_s20  ;;  %s3124_s21 = sphi %s3167_s21, %s14_s21   ;;  %s3120_s20 = sphi %s3165_s20, %s5341_s20   ;;  %s3116_s19 = sphi %s3163_s19, %s5340_s19   ;;  %s3112_s18 = sphi %s3161_s18, %s5339_s18   ;;  %s3108_s17 = sphi %s3159_s17, %s5338_s17   ;;  %s3104_s16 = sphi %s3157_s16, %s5337_s16   ;;  %s3100_s15 = sphi %s3155_s15, %s5336_s15  }
   0x5   : > { %p24_p0 = scmp.ge.s32.totalorder %s23_s22, 2  ;;  %p42_p1 = scmp.ne.s32.totalorder %s3104_s16, %s3100_s15 }
   0x6   : > { %p43_p2 = scmp.eq.s32.totalorder %s3124_s21, 0  ;;  %s35_s28 = sadd.s32 1, %s3104_s16 }
   0x7   : > { %s5343_s22 = smov (%p24_p0, %s23_s22), 0  ;;  %s5345_s23 = smov (!%p24_p0, %s26_s23), %s3120_s20 }
   0x8   : > { %p3198_p3 = por %p43_p2, %p42_p1  ;;  %p28_p4 = scmp.ge.s32.totalorder %s5345_s23, 2 }
   0x9   : > { %s31_s25 = ssub.s32 %s3116_s19, %s5343_s22  ;;  %p2536_p6 = scmp.ge.s32.totalorder %s3124_s21, 4 }
   0xa   : > { %s5347_s23 = smov (%p28_p4, %s5345_s23), 0 }
   0xb   : > { %s30_s26 = ssub.s32 %s3120_s20, %s5347_s23  ;;  %174 = sbr.rel (%p2536_p6) target bundleno = 96 (0x60), region = 16 }
   0xc   : > { %s32_s27 = sor.u32 %s31_s25, %s30_s26 }
   0xd   : > { %p33_p5 = scmp.eq.s32.totalorder %s32_s27, 0 }
   0xf   : > { %s3210_s29 = scalar_select %p33_p5, %s3104_s16, %s35_s28  }
  0x12   : > { %177 = sbr.rel (!%p3198_p3) target bundleno = 57 (0x39), region = 20  ;;  %s179_s30 = sand.u32 (%p3198_p3), 1, %s3104_s16  }
  0x13   : > { %s2539_s5 = sshll.u32 (%p3198_p3), %s3116_s19, 1  ;;  %s2537_s6 = sshll.u32 (%p3198_p3), %s179_s30, 9 }
  0x14   : > { %s2656_s7 = sshll.u32 (%p3198_p3), %s3120_s20, 7  ;;  %s3226_s13 = scalar_lea.vmem (%p3198_p3), [#allocation4], %s2537_s6 }
  0x15   : > { %s185_s8 = sadd.s32 (%p3198_p3), %s2656_s7, %s2539_s5 }
  0x16   : > { %s2541_s9 = sshll.u32 (%p3198_p3), %s185_s8, 3 }
  0x17   : > { %s3221_s12 = scalar_lea.vmem (%p3198_p3), %s5014_s0, %s2541_s9 }
  0x18   : > { %v200_v0 = vld [vmem:[%s3221_s12] sm:$0xff] (%p3198_p3)  ;;  %v202_v1 = vld [vmem:[%s3221_s12 + $0x8] sm:$0xff] (%p3198_p3) }
  0x19   : > { %v204_v2 = vld [vmem:[%s3221_s12 + $0x20] sm:$0xff]  ;;  %201 = vst [vmem:[%s3226_s13] sm:$0xff] %v200_v0  ;;  %203 = vst [vmem:[%s3226_s13 + $0x8] sm:$0xff] %v202_v1  ;;  %v206_v3 = vld [vmem:[%s3221_s12 + $0x28] sm:$0xff] }
  0x1a   : > { %205 = vst [vmem:[%s3226_s13 + $0x10] sm:$0xff] %v204_v2  ;;  %v208_v4 = vld [vmem:[%s3221_s12 + $0x40] sm:$0xff]  ;;  %v210_v5 = vld [vmem:[%s3221_s12 + $0x48] sm:$0xff]  ;;  %207 = vst [vmem:[%s3226_s13 + $0x18] sm:$0xff] %v206_v3 }
  0x1b   : > { %209 = vst [vmem:[%s3226_s13 + $0x20] sm:$0xff] %v208_v4  ;;  %211 = vst [vmem:[%s3226_s13 + $0x28] sm:$0xff] %v210_v5  ;;  %v212_v6 = vld [vmem:[%s3221_s12 + $0x60] sm:$0xff]  ;;  %v214_v7 = vld [vmem:[%s3221_s12 + $0x68] sm:$0xff] }
  0x1c   : > { %v216_v8 = vld [vmem:[%s3221_s12 + $0x80] sm:$0xff]  ;;  %213 = vst [vmem:[%s3226_s13 + $0x30] sm:$0xff] %v212_v6  ;;  %215 = vst [vmem:[%s3226_s13 + $0x38] sm:$0xff] %v214_v7  ;;  %v218_v9 = vld [vmem:[%s3221_s12 + $0x88] sm:$0xff] }
  0x1d   : > { %217 = vst [vmem:[%s3226_s13 + $0x40] sm:$0xff] %v216_v8  ;;  %v220_v10 = vld [vmem:[%s3221_s12 + $0xa0] sm:$0xff]  ;;  %v222_v11 = vld [vmem:[%s3221_s12 + $0xa8] sm:$0xff]  ;;  %219 = vst [vmem:[%s3226_s13 + $0x48] sm:$0xff] %v218_v9 }
  0x1e   : > { %221 = vst [vmem:[%s3226_s13 + $0x50] sm:$0xff] %v220_v10  ;;  %223 = vst [vmem:[%s3226_s13 + $0x58] sm:$0xff] %v222_v11  ;;  %v224_v12 = vld [vmem:[%s3221_s12 + $0xc0] sm:$0xff]  ;;  %v226_v13 = vld [vmem:[%s3221_s12 + $0xc8] sm:$0xff] }
  0x1f   : > { %v228_v14 = vld [vmem:[%s3221_s12 + $0xe0] sm:$0xff]  ;;  %225 = vst [vmem:[%s3226_s13 + $0x60] sm:$0xff] %v224_v12  ;;  %227 = vst [vmem:[%s3226_s13 + $0x68] sm:$0xff] %v226_v13  ;;  %v230_v15 = vld [vmem:[%s3221_s12 + $0xe8] sm:$0xff] }
  0x20   : > { %229 = vst [vmem:[%s3226_s13 + $0x70] sm:$0xff] %v228_v14  ;;  %v232_v16 = vld [vmem:[%s3221_s12 + $0x100] sm:$0xff]  ;;  %v234_v17 = vld [vmem:[%s3221_s12 + $0x108] sm:$0xff]  ;;  %231 = vst [vmem:[%s3226_s13 + $0x78] sm:$0xff] %v230_v15 }
  0x21   : > { %233 = vst [vmem:[%s3226_s13 + $0x80] sm:$0xff] %v232_v16  ;;  %235 = vst [vmem:[%s3226_s13 + $0x88] sm:$0xff] %v234_v17  ;;  %v236_v18 = vld [vmem:[%s3221_s12 + $0x120] sm:$0xff]  ;;  %v238_v19 = vld [vmem:[%s3221_s12 + $0x128] sm:$0xff] }
  0x22   : > { %v240_v20 = vld [vmem:[%s3221_s12 + $0x140] sm:$0xff]  ;;  %237 = vst [vmem:[%s3226_s13 + $0x90] sm:$0xff] %v236_v18  ;;  %239 = vst [vmem:[%s3226_s13 + $0x98] sm:$0xff] %v238_v19  ;;  %v242_v21 = vld [vmem:[%s3221_s12 + $0x148] sm:$0xff] }
  0x23   : > { %241 = vst [vmem:[%s3226_s13 + $0xa0] sm:$0xff] %v240_v20  ;;  %v244_v22 = vld [vmem:[%s3221_s12 + $0x160] sm:$0xff]  ;;  %v246_v23 = vld [vmem:[%s3221_s12 + $0x168] sm:$0xff]  ;;  %243 = vst [vmem:[%s3226_s13 + $0xa8] sm:$0xff] %v242_v21 }
  0x24   : > { %245 = vst [vmem:[%s3226_s13 + $0xb0] sm:$0xff] %v244_v22  ;;  %247 = vst [vmem:[%s3226_s13 + $0xb8] sm:$0xff] %v246_v23  ;;  %v248_v24 = vld [vmem:[%s3221_s12 + $0x180] sm:$0xff]  ;;  %v250_v25 = vld [vmem:[%s3221_s12 + $0x188] sm:$0xff] }
  0x25   : > { %v252_v26 = vld [vmem:[%s3221_s12 + $0x1a0] sm:$0xff]  ;;  %249 = vst [vmem:[%s3226_s13 + $0xc0] sm:$0xff] %v248_v24  ;;  %251 = vst [vmem:[%s3226_s13 + $0xc8] sm:$0xff] %v250_v25  ;;  %v254_v27 = vld [vmem:[%s3221_s12 + $0x1a8] sm:$0xff] }
  0x26   : > { %253 = vst [vmem:[%s3226_s13 + $0xd0] sm:$0xff] %v252_v26  ;;  %v256_v28 = vld [vmem:[%s3221_s12 + $0x1c0] sm:$0xff]  ;;  %v258_v29 = vld [vmem:[%s3221_s12 + $0x1c8] sm:$0xff]  ;;  %255 = vst [vmem:[%s3226_s13 + $0xd8] sm:$0xff] %v254_v27 }
  0x27   : > { %257 = vst [vmem:[%s3226_s13 + $0xe0] sm:$0xff] %v256_v28  ;;  %259 = vst [vmem:[%s3226_s13 + $0xe8] sm:$0xff] %v258_v29  ;;  %v260_v30 = vld [vmem:[%s3221_s12 + $0x1e0] sm:$0xff]  ;;  %v262_v31 = vld [vmem:[%s3221_s12 + $0x1e8] sm:$0xff] }
  0x28   : > { %v264_v32 = vld [vmem:[%s3221_s12 + $0x200] sm:$0xff]  ;;  %261 = vst [vmem:[%s3226_s13 + $0xf0] sm:$0xff] %v260_v30  ;;  %263 = vst [vmem:[%s3226_s13 + $0xf8] sm:$0xff] %v262_v31  ;;  %v266_v33 = vld [vmem:[%s3221_s12 + $0x208] sm:$0xff] }
  0x29   : > { %265 = vst [vmem:[%s3226_s13 + $0x100] sm:$0xff] %v264_v32  ;;  %v268_v34 = vld [vmem:[%s3221_s12 + $0x220] sm:$0xff]  ;;  %v270_v35 = vld [vmem:[%s3221_s12 + $0x228] sm:$0xff]  ;;  %267 = vst [vmem:[%s3226_s13 + $0x108] sm:$0xff] %v266_v33 }
  0x2a   : > { %269 = vst [vmem:[%s3226_s13 + $0x110] sm:$0xff] %v268_v34  ;;  %271 = vst [vmem:[%s3226_s13 + $0x118] sm:$0xff] %v270_v35  ;;  %v272_v36 = vld [vmem:[%s3221_s12 + $0x240] sm:$0xff]  ;;  %v274_v37 = vld [vmem:[%s3221_s12 + $0x248] sm:$0xff] }
  0x2b   : > { %v276_v38 = vld [vmem:[%s3221_s12 + $0x260] sm:$0xff]  ;;  %273 = vst [vmem:[%s3226_s13 + $0x120] sm:$0xff] %v272_v36  ;;  %275 = vst [vmem:[%s3226_s13 + $0x128] sm:$0xff] %v274_v37  ;;  %v278_v39 = vld [vmem:[%s3221_s12 + $0x268] sm:$0xff] }
  0x2c   : > { %277 = vst [vmem:[%s3226_s13 + $0x130] sm:$0xff] %v276_v38  ;;  %v280_v40 = vld [vmem:[%s3221_s12 + $0x280] sm:$0xff]  ;;  %v282_v41 = vld [vmem:[%s3221_s12 + $0x288] sm:$0xff]  ;;  %279 = vst [vmem:[%s3226_s13 + $0x138] sm:$0xff] %v278_v39 }
  0x2d   : > { %281 = vst [vmem:[%s3226_s13 + $0x140] sm:$0xff] %v280_v40  ;;  %283 = vst [vmem:[%s3226_s13 + $0x148] sm:$0xff] %v282_v41  ;;  %v284_v42 = vld [vmem:[%s3221_s12 + $0x2a0] sm:$0xff]  ;;  %v286_v43 = vld [vmem:[%s3221_s12 + $0x2a8] sm:$0xff] }
  0x2e   : > { %v288_v44 = vld [vmem:[%s3221_s12 + $0x2c0] sm:$0xff]  ;;  %285 = vst [vmem:[%s3226_s13 + $0x150] sm:$0xff] %v284_v42  ;;  %287 = vst [vmem:[%s3226_s13 + $0x158] sm:$0xff] %v286_v43  ;;  %v290_v45 = vld [vmem:[%s3221_s12 + $0x2c8] sm:$0xff] }
  0x2f   : > { %289 = vst [vmem:[%s3226_s13 + $0x160] sm:$0xff] %v288_v44  ;;  %v292_v46 = vld [vmem:[%s3221_s12 + $0x2e0] sm:$0xff]  ;;  %v294_v47 = vld [vmem:[%s3221_s12 + $0x2e8] sm:$0xff]  ;;  %291 = vst [vmem:[%s3226_s13 + $0x168] sm:$0xff] %v290_v45 }
  0x30   : > { %293 = vst [vmem:[%s3226_s13 + $0x170] sm:$0xff] %v292_v46  ;;  %295 = vst [vmem:[%s3226_s13 + $0x178] sm:$0xff] %v294_v47  ;;  %v296_v48 = vld [vmem:[%s3221_s12 + $0x300] sm:$0xff]  ;;  %v298_v49 = vld [vmem:[%s3221_s12 + $0x308] sm:$0xff] }
  0x31   : > { %v300_v50 = vld [vmem:[%s3221_s12 + $0x320] sm:$0xff]  ;;  %297 = vst [vmem:[%s3226_s13 + $0x180] sm:$0xff] %v296_v48  ;;  %299 = vst [vmem:[%s3226_s13 + $0x188] sm:$0xff] %v298_v49  ;;  %v302_v51 = vld [vmem:[%s3221_s12 + $0x328] sm:$0xff] }
  0x32   : > { %301 = vst [vmem:[%s3226_s13 + $0x190] sm:$0xff] %v300_v50  ;;  %v304_v52 = vld [vmem:[%s3221_s12 + $0x340] sm:$0xff]  ;;  %v306_v53 = vld [vmem:[%s3221_s12 + $0x348] sm:$0xff]  ;;  %303 = vst [vmem:[%s3226_s13 + $0x198] sm:$0xff] %v302_v51 }
  0x33   : > { %305 = vst [vmem:[%s3226_s13 + $0x1a0] sm:$0xff] %v304_v52  ;;  %307 = vst [vmem:[%s3226_s13 + $0x1a8] sm:$0xff] %v306_v53  ;;  %v308_v54 = vld [vmem:[%s3221_s12 + $0x360] sm:$0xff]  ;;  %v310_v55 = vld [vmem:[%s3221_s12 + $0x368] sm:$0xff] }
  0x34   : > { %v312_v56 = vld [vmem:[%s3221_s12 + $0x380] sm:$0xff]  ;;  %309 = vst [vmem:[%s3226_s13 + $0x1b0] sm:$0xff] %v308_v54  ;;  %311 = vst [vmem:[%s3226_s13 + $0x1b8] sm:$0xff] %v310_v55  ;;  %v314_v57 = vld [vmem:[%s3221_s12 + $0x388] sm:$0xff] }
  0x35   : > { %313 = vst [vmem:[%s3226_s13 + $0x1c0] sm:$0xff] %v312_v56  ;;  %v316_v58 = vld [vmem:[%s3221_s12 + $0x3a0] sm:$0xff]  ;;  %v318_v59 = vld [vmem:[%s3221_s12 + $0x3a8] sm:$0xff]  ;;  %315 = vst [vmem:[%s3226_s13 + $0x1c8] sm:$0xff] %v314_v57 }
  0x36   : > { %317 = vst [vmem:[%s3226_s13 + $0x1d0] sm:$0xff] %v316_v58  ;;  %319 = vst [vmem:[%s3226_s13 + $0x1d8] sm:$0xff] %v318_v59  ;;  %v320_v60 = vld [vmem:[%s3221_s12 + $0x3c0] sm:$0xff]  ;;  %v322_v61 = vld [vmem:[%s3221_s12 + $0x3c8] sm:$0xff] }
  0x37   : > { %v324_v62 = vld [vmem:[%s3221_s12 + $0x3e0] sm:$0xff]  ;;  %321 = vst [vmem:[%s3226_s13 + $0x1e0] sm:$0xff] %v320_v60  ;;  %323 = vst [vmem:[%s3226_s13 + $0x1e8] sm:$0xff] %v322_v61  ;;  %v326_v63 = vld [vmem:[%s3221_s12 + $0x3e8] sm:$0xff] }
  0x38   : > { %325 = vst [vmem:[%s3226_s13 + $0x1f0] sm:$0xff] %v324_v62  ;;  %327 = vst [vmem:[%s3226_s13 + $0x1f8] sm:$0xff] %v326_v63 }
  0x39 PF: > { %333 = sbr.rel (!%p3198_p3) target bundleno = 96 (0x60), region = 43  ;;  %s335_s14 = sand.u32 (%p3198_p3), 1, %s3104_s16  }
  0x3a   : > { %s2544_s25 = sshll.u32 (%p3198_p3), %s3120_s20, 1  ;;  %s2542_s26 = sshll.u32 (%p3198_p3), %s335_s14, 9 }
  0x3b   : > { %s2657_s27 = sshll.u32 (%p3198_p3), %s3116_s19, 7  ;;  %s3366_s24 = scalar_lea.vmem (%p3198_p3), [#allocation5], %s2542_s26 }
  0x3c   : > { %s341_s28 = sadd.s32 (%p3198_p3), %s2657_s27, %s2544_s25 }
  0x3d   : > { %s2546_s30 = sshll.u32 (%p3198_p3), %s341_s28, 3 }
  0x3e   : > { %s3361_s7 = scalar_lea.vmem (%p3198_p3), %s5015_s1, %s2546_s30 }
  0x3f   : > { %v356_v0 = vld [vmem:[%s3361_s7] sm:$0xff] (%p3198_p3)  ;;  %v358_v1 = vld [vmem:[%s3361_s7 + $0x8] sm:$0xff] (%p3198_p3) }
  0x40   : > { %v360_v2 = vld [vmem:[%s3361_s7 + $0x20] sm:$0xff]  ;;  %357 = vst [vmem:[%s3366_s24] sm:$0xff] %v356_v0  ;;  %359 = vst [vmem:[%s3366_s24 + $0x8] sm:$0xff] %v358_v1  ;;  %v362_v3 = vld [vmem:[%s3361_s7 + $0x28] sm:$0xff] }
  0x41   : > { %361 = vst [vmem:[%s3366_s24 + $0x10] sm:$0xff] %v360_v2  ;;  %v364_v4 = vld [vmem:[%s3361_s7 + $0x40] sm:$0xff]  ;;  %v366_v5 = vld [vmem:[%s3361_s7 + $0x48] sm:$0xff]  ;;  %363 = vst [vmem:[%s3366_s24 + $0x18] sm:$0xff] %v362_v3 }
  0x42   : > { %365 = vst [vmem:[%s3366_s24 + $0x20] sm:$0xff] %v364_v4  ;;  %367 = vst [vmem:[%s3366_s24 + $0x28] sm:$0xff] %v366_v5  ;;  %v368_v6 = vld [vmem:[%s3361_s7 + $0x60] sm:$0xff]  ;;  %v370_v7 = vld [vmem:[%s3361_s7 + $0x68] sm:$0xff] }
  0x43   : > { %v372_v8 = vld [vmem:[%s3361_s7 + $0x80] sm:$0xff]  ;;  %369 = vst [vmem:[%s3366_s24 + $0x30] sm:$0xff] %v368_v6  ;;  %371 = vst [vmem:[%s3366_s24 + $0x38] sm:$0xff] %v370_v7  ;;  %v374_v9 = vld [vmem:[%s3361_s7 + $0x88] sm:$0xff] }
  0x44   : > { %373 = vst [vmem:[%s3366_s24 + $0x40] sm:$0xff] %v372_v8  ;;  %v376_v10 = vld [vmem:[%s3361_s7 + $0xa0] sm:$0xff]  ;;  %v378_v11 = vld [vmem:[%s3361_s7 + $0xa8] sm:$0xff]  ;;  %375 = vst [vmem:[%s3366_s24 + $0x48] sm:$0xff] %v374_v9 }
  0x45   : > { %377 = vst [vmem:[%s3366_s24 + $0x50] sm:$0xff] %v376_v10  ;;  %379 = vst [vmem:[%s3366_s24 + $0x58] sm:$0xff] %v378_v11  ;;  %v380_v12 = vld [vmem:[%s3361_s7 + $0xc0] sm:$0xff]  ;;  %v382_v13 = vld [vmem:[%s3361_s7 + $0xc8] sm:$0xff] }
  0x46   : > { %v384_v14 = vld [vmem:[%s3361_s7 + $0xe0] sm:$0xff]  ;;  %381 = vst [vmem:[%s3366_s24 + $0x60] sm:$0xff] %v380_v12  ;;  %383 = vst [vmem:[%s3366_s24 + $0x68] sm:$0xff] %v382_v13  ;;  %v386_v15 = vld [vmem:[%s3361_s7 + $0xe8] sm:$0xff] }
  0x47   : > { %385 = vst [vmem:[%s3366_s24 + $0x70] sm:$0xff] %v384_v14  ;;  %v388_v16 = vld [vmem:[%s3361_s7 + $0x100] sm:$0xff]  ;;  %v390_v17 = vld [vmem:[%s3361_s7 + $0x108] sm:$0xff]  ;;  %387 = vst [vmem:[%s3366_s24 + $0x78] sm:$0xff] %v386_v15 }
  0x48   : > { %389 = vst [vmem:[%s3366_s24 + $0x80] sm:$0xff] %v388_v16  ;;  %391 = vst [vmem:[%s3366_s24 + $0x88] sm:$0xff] %v390_v17  ;;  %v392_v18 = vld [vmem:[%s3361_s7 + $0x120] sm:$0xff]  ;;  %v394_v19 = vld [vmem:[%s3361_s7 + $0x128] sm:$0xff] }
  0x49   : > { %v396_v20 = vld [vmem:[%s3361_s7 + $0x140] sm:$0xff]  ;;  %393 = vst [vmem:[%s3366_s24 + $0x90] sm:$0xff] %v392_v18  ;;  %395 = vst [vmem:[%s3366_s24 + $0x98] sm:$0xff] %v394_v19  ;;  %v398_v21 = vld [vmem:[%s3361_s7 + $0x148] sm:$0xff] }
  0x4a   : > { %397 = vst [vmem:[%s3366_s24 + $0xa0] sm:$0xff] %v396_v20  ;;  %v400_v22 = vld [vmem:[%s3361_s7 + $0x160] sm:$0xff]  ;;  %v402_v23 = vld [vmem:[%s3361_s7 + $0x168] sm:$0xff]  ;;  %399 = vst [vmem:[%s3366_s24 + $0xa8] sm:$0xff] %v398_v21 }
  0x4b   : > { %401 = vst [vmem:[%s3366_s24 + $0xb0] sm:$0xff] %v400_v22  ;;  %403 = vst [vmem:[%s3366_s24 + $0xb8] sm:$0xff] %v402_v23  ;;  %v404_v24 = vld [vmem:[%s3361_s7 + $0x180] sm:$0xff]  ;;  %v406_v25 = vld [vmem:[%s3361_s7 + $0x188] sm:$0xff] }
  0x4c   : > { %v408_v26 = vld [vmem:[%s3361_s7 + $0x1a0] sm:$0xff]  ;;  %405 = vst [vmem:[%s3366_s24 + $0xc0] sm:$0xff] %v404_v24  ;;  %407 = vst [vmem:[%s3366_s24 + $0xc8] sm:$0xff] %v406_v25  ;;  %v410_v27 = vld [vmem:[%s3361_s7 + $0x1a8] sm:$0xff] }
  0x4d   : > { %409 = vst [vmem:[%s3366_s24 + $0xd0] sm:$0xff] %v408_v26  ;;  %v412_v28 = vld [vmem:[%s3361_s7 + $0x1c0] sm:$0xff]  ;;  %v414_v29 = vld [vmem:[%s3361_s7 + $0x1c8] sm:$0xff]  ;;  %411 = vst [vmem:[%s3366_s24 + $0xd8] sm:$0xff] %v410_v27 }
  0x4e   : > { %413 = vst [vmem:[%s3366_s24 + $0xe0] sm:$0xff] %v412_v28  ;;  %415 = vst [vmem:[%s3366_s24 + $0xe8] sm:$0xff] %v414_v29  ;;  %v416_v30 = vld [vmem:[%s3361_s7 + $0x1e0] sm:$0xff]  ;;  %v418_v31 = vld [vmem:[%s3361_s7 + $0x1e8] sm:$0xff] }
  0x4f   : > { %v420_v32 = vld [vmem:[%s3361_s7 + $0x200] sm:$0xff]  ;;  %417 = vst [vmem:[%s3366_s24 + $0xf0] sm:$0xff] %v416_v30  ;;  %419 = vst [vmem:[%s3366_s24 + $0xf8] sm:$0xff] %v418_v31  ;;  %v422_v33 = vld [vmem:[%s3361_s7 + $0x208] sm:$0xff] }
  0x50   : > { %421 = vst [vmem:[%s3366_s24 + $0x100] sm:$0xff] %v420_v32  ;;  %v424_v34 = vld [vmem:[%s3361_s7 + $0x220] sm:$0xff]  ;;  %v426_v35 = vld [vmem:[%s3361_s7 + $0x228] sm:$0xff]  ;;  %423 = vst [vmem:[%s3366_s24 + $0x108] sm:$0xff] %v422_v33 }
  0x51   : > { %425 = vst [vmem:[%s3366_s24 + $0x110] sm:$0xff] %v424_v34  ;;  %427 = vst [vmem:[%s3366_s24 + $0x118] sm:$0xff] %v426_v35  ;;  %v428_v36 = vld [vmem:[%s3361_s7 + $0x240] sm:$0xff]  ;;  %v430_v37 = vld [vmem:[%s3361_s7 + $0x248] sm:$0xff] }
  0x52   : > { %v432_v38 = vld [vmem:[%s3361_s7 + $0x260] sm:$0xff]  ;;  %429 = vst [vmem:[%s3366_s24 + $0x120] sm:$0xff] %v428_v36  ;;  %431 = vst [vmem:[%s3366_s24 + $0x128] sm:$0xff] %v430_v37  ;;  %v434_v39 = vld [vmem:[%s3361_s7 + $0x268] sm:$0xff] }
  0x53   : > { %433 = vst [vmem:[%s3366_s24 + $0x130] sm:$0xff] %v432_v38  ;;  %v436_v40 = vld [vmem:[%s3361_s7 + $0x280] sm:$0xff]  ;;  %v438_v41 = vld [vmem:[%s3361_s7 + $0x288] sm:$0xff]  ;;  %435 = vst [vmem:[%s3366_s24 + $0x138] sm:$0xff] %v434_v39 }
  0x54   : > { %437 = vst [vmem:[%s3366_s24 + $0x140] sm:$0xff] %v436_v40  ;;  %439 = vst [vmem:[%s3366_s24 + $0x148] sm:$0xff] %v438_v41  ;;  %v440_v42 = vld [vmem:[%s3361_s7 + $0x2a0] sm:$0xff]  ;;  %v442_v43 = vld [vmem:[%s3361_s7 + $0x2a8] sm:$0xff] }
  0x55   : > { %v444_v44 = vld [vmem:[%s3361_s7 + $0x2c0] sm:$0xff]  ;;  %441 = vst [vmem:[%s3366_s24 + $0x150] sm:$0xff] %v440_v42  ;;  %443 = vst [vmem:[%s3366_s24 + $0x158] sm:$0xff] %v442_v43  ;;  %v446_v45 = vld [vmem:[%s3361_s7 + $0x2c8] sm:$0xff] }
  0x56   : > { %445 = vst [vmem:[%s3366_s24 + $0x160] sm:$0xff] %v444_v44  ;;  %v448_v46 = vld [vmem:[%s3361_s7 + $0x2e0] sm:$0xff]  ;;  %v450_v47 = vld [vmem:[%s3361_s7 + $0x2e8] sm:$0xff]  ;;  %447 = vst [vmem:[%s3366_s24 + $0x168] sm:$0xff] %v446_v45 }
  0x57   : > { %449 = vst [vmem:[%s3366_s24 + $0x170] sm:$0xff] %v448_v46  ;;  %451 = vst [vmem:[%s3366_s24 + $0x178] sm:$0xff] %v450_v47  ;;  %v452_v48 = vld [vmem:[%s3361_s7 + $0x300] sm:$0xff]  ;;  %v454_v49 = vld [vmem:[%s3361_s7 + $0x308] sm:$0xff] }
  0x58   : > { %v456_v50 = vld [vmem:[%s3361_s7 + $0x320] sm:$0xff]  ;;  %453 = vst [vmem:[%s3366_s24 + $0x180] sm:$0xff] %v452_v48  ;;  %455 = vst [vmem:[%s3366_s24 + $0x188] sm:$0xff] %v454_v49  ;;  %v458_v51 = vld [vmem:[%s3361_s7 + $0x328] sm:$0xff] }
  0x59   : > { %457 = vst [vmem:[%s3366_s24 + $0x190] sm:$0xff] %v456_v50  ;;  %v460_v52 = vld [vmem:[%s3361_s7 + $0x340] sm:$0xff]  ;;  %v462_v53 = vld [vmem:[%s3361_s7 + $0x348] sm:$0xff]  ;;  %459 = vst [vmem:[%s3366_s24 + $0x198] sm:$0xff] %v458_v51 }
  0x5a   : > { %461 = vst [vmem:[%s3366_s24 + $0x1a0] sm:$0xff] %v460_v52  ;;  %463 = vst [vmem:[%s3366_s24 + $0x1a8] sm:$0xff] %v462_v53  ;;  %v464_v54 = vld [vmem:[%s3361_s7 + $0x360] sm:$0xff]  ;;  %v466_v55 = vld [vmem:[%s3361_s7 + $0x368] sm:$0xff] }
  0x5b   : > { %v468_v56 = vld [vmem:[%s3361_s7 + $0x380] sm:$0xff]  ;;  %465 = vst [vmem:[%s3366_s24 + $0x1b0] sm:$0xff] %v464_v54  ;;  %467 = vst [vmem:[%s3366_s24 + $0x1b8] sm:$0xff] %v466_v55  ;;  %v470_v57 = vld [vmem:[%s3361_s7 + $0x388] sm:$0xff] }
  0x5c   : > { %469 = vst [vmem:[%s3366_s24 + $0x1c0] sm:$0xff] %v468_v56  ;;  %v472_v58 = vld [vmem:[%s3361_s7 + $0x3a0] sm:$0xff]  ;;  %v474_v59 = vld [vmem:[%s3361_s7 + $0x3a8] sm:$0xff]  ;;  %471 = vst [vmem:[%s3366_s24 + $0x1c8] sm:$0xff] %v470_v57 }
  0x5d   : > { %473 = vst [vmem:[%s3366_s24 + $0x1d0] sm:$0xff] %v472_v58  ;;  %475 = vst [vmem:[%s3366_s24 + $0x1d8] sm:$0xff] %v474_v59  ;;  %v476_v60 = vld [vmem:[%s3361_s7 + $0x3c0] sm:$0xff]  ;;  %v478_v61 = vld [vmem:[%s3361_s7 + $0x3c8] sm:$0xff] }
  0x5e   : > { %v480_v62 = vld [vmem:[%s3361_s7 + $0x3e0] sm:$0xff]  ;;  %477 = vst [vmem:[%s3366_s24 + $0x1e0] sm:$0xff] %v476_v60  ;;  %479 = vst [vmem:[%s3366_s24 + $0x1e8] sm:$0xff] %v478_v61  ;;  %v482_v63 = vld [vmem:[%s3361_s7 + $0x3e8] sm:$0xff] }
  0x5f   : > { %481 = vst [vmem:[%s3366_s24 + $0x1f0] sm:$0xff] %v480_v62  ;;  %483 = vst [vmem:[%s3366_s24 + $0x1f8] sm:$0xff] %v482_v63 }
  0x60 PF: > { %p2547_p7 = scmp.ge.s32.totalorder %s3124_s21, 1  ;;  %p506_p8 = scmp.lt.s32.totalorder %s3124_s21, 5 }
  0x62   : > { %p507_p9 = pnand %p2547_p7, %p506_p8 }
  0x64   : > { %510 = sbr.rel (%p507_p9) target bundleno = 892 (0x37c), region = 74 }
  0x6b   : > { %s513_s8 = sand.u32 1, %s3100_s15   ;;  %s2550_s9 = sshll.u32 %s3108_s17, 5 }
  0x6c   : > { %s2548_s10 = sshll.u32 %s513_s8, 9  ;;  %p564_p10 = scmp.lt.s32.totalorder %s2550_s9, 63 }
  0x6d   : > { %s2552_s11 = sshll.u32 %s3112_s18, 5  ;;  %s3513_s7 = scalar_lea.vmem [#allocation4], %s2548_s10 }
  0x6e   : > { %s5349_s9 = smov (!%p564_p10, %s2550_s9), 63  ;;  %p570_p11 = scmp.lt.s32.totalorder %s2552_s11, 63 }
  0x6f   : > { %s2551_s12 = sshll.u32 %s5349_s9, 3  ;;  %s3515_s24 = scalar_lea.vmem [#allocation5], %s2548_s10 }
  0x70   : > { %s3501_s25 = scalar_lea.vmem %s5016_s2, %s2551_s12  ;;  %s5351_s11 = smov (!%p570_p11, %s2552_s11), 63 }
  0x71   : > { %s2553_s26 = sshll.u32 %s5351_s11, 3  ;;  %p2556_p12 = scmp.ne.s32.totalorder %s3108_s17, 0 }
  0x72   : > { %s3506_s30 = scalar_lea.vmem %s5017_s3, %s2553_s26  ;;  %s3511_s6 = scalar_lea.vmem %s5018_s4, %s2553_s26  ;;  %v617_v0 = vlaneseq (!%p2556_p12)  ;;  %v3126_v1 = vmov (!%p2556_p12), 0.0  }
  0x73   : > { %584 = sbr.rel (%p2556_p12) target bundleno = 132 (0x84), region = 86  ;;  %585 = vst [vmem:[#allocation2] sm:$0xff] (!%p2556_p12), %v3126_v1  ;;  %586 = vst [vmem:[#allocation2 + $0x8] sm:$0xff] (!%p2556_p12), %v3126_v1 }
  0x74   : > { %587 = vst [vmem:[#allocation2 + $0x10] sm:$0xff] (!%p2556_p12), %v3126_v1  ;;  %588 = vst [vmem:[#allocation2 + $0x18] sm:$0xff] (!%p2556_p12), %v3126_v1  ;;  %vm619_vm0 = vcmp.lt.s32.totalorder (!%p2556_p12), %v617_v0, 256 }
  0x75   : > { %589 = vst [vmem:[#allocation2 + $0x20] sm:$0xff] (!%p2556_p12), %v3126_v1  ;;  %590 = vst [vmem:[#allocation2 + $0x28] sm:$0xff] (!%p2556_p12), %v3126_v1 }
  0x76   : > { %591 = vst [vmem:[#allocation2 + $0x30] sm:$0xff] (!%p2556_p12), %v3126_v1  ;;  %592 = vst [vmem:[#allocation2 + $0x38] sm:$0xff] (!%p2556_p12), %v3126_v1 }
  0x77   : > { %593 = vst [vmem:[#allocation2 + $0x40] sm:$0xff] (!%p2556_p12), %v3126_v1  ;;  %594 = vst [vmem:[#allocation2 + $0x48] sm:$0xff] (!%p2556_p12), %v3126_v1 }
  0x78   : > { %595 = vst [vmem:[#allocation2 + $0x50] sm:$0xff] (!%p2556_p12), %v3126_v1  ;;  %596 = vst [vmem:[#allocation2 + $0x58] sm:$0xff] (!%p2556_p12), %v3126_v1 }
  0x79   : > { %597 = vst [vmem:[#allocation2 + $0x60] sm:$0xff] (!%p2556_p12), %v3126_v1  ;;  %598 = vst [vmem:[#allocation2 + $0x68] sm:$0xff] (!%p2556_p12), %v3126_v1 }
  0x7a   : > { %599 = vst [vmem:[#allocation2 + $0x70] sm:$0xff] %v3126_v1  ;;  %600 = vst [vmem:[#allocation2 + $0x78] sm:$0xff] %v3126_v1 }
  0x7b   : > { %601 = vst [vmem:[#allocation2 + $0x80] sm:$0xff] %v3126_v1  ;;  %602 = vst [vmem:[#allocation2 + $0x88] sm:$0xff] %v3126_v1 }
  0x7c   : > { %603 = vst [vmem:[#allocation2 + $0x90] sm:$0xff] %v3126_v1  ;;  %604 = vst [vmem:[#allocation2 + $0x98] sm:$0xff] %v3126_v1 }
  0x7d   : > { %605 = vst [vmem:[#allocation2 + $0xa0] sm:$0xff] %v3126_v1  ;;  %606 = vst [vmem:[#allocation2 + $0xa8] sm:$0xff] %v3126_v1 }
  0x7e   : > { %607 = vst [vmem:[#allocation2 + $0xb0] sm:$0xff] %v3126_v1  ;;  %608 = vst [vmem:[#allocation2 + $0xb8] sm:$0xff] %v3126_v1 }
  0x7f   : > { %609 = vst [vmem:[#allocation2 + $0xc0] sm:$0xff] %v3126_v1  ;;  %610 = vst [vmem:[#allocation2 + $0xc8] sm:$0xff] %v3126_v1 }
  0x80   : > { %611 = vst [vmem:[#allocation2 + $0xd0] sm:$0xff] %v3126_v1  ;;  %612 = vst [vmem:[#allocation2 + $0xd8] sm:$0xff] %v3126_v1 }
  0x81   : > { %613 = vst [vmem:[#allocation2 + $0xe0] sm:$0xff] %v3126_v1  ;;  %614 = vst [vmem:[#allocation2 + $0xe8] sm:$0xff] %v3126_v1 }
  0x82   : > { %615 = vst [vmem:[#allocation2 + $0xf0] sm:$0xff] %v3126_v1  ;;  %616 = vst [vmem:[#allocation2 + $0xf8] sm:$0xff] %v3126_v1 }
  0x83   : > { %621 = vst.msk [vmem:[#allocation3] sm:$0x3] %vm619_vm0, %v3126_v1 }
  0x84 PF: > { %v5030_v2 = vlaneseq  ;;  %p658_p13 = scmp.eq.s32.totalorder %s3112_s18, %s3108_s17  ;;  %v5034_v3 = vmov 0.0|0.0   ;;  %v918_v7 = vld [vmem:[%s3515_s24] sm:$0xff]  ;;  %v920_v17 = vld [vmem:[%s3515_s24 + $0x10] sm:$0xff]  ;;  %v3626_v33 = vld [vmem:[%s3515_s24 + $0x8] sm:$0xff]  ;;  %p2621_p0 = scmp.ne.s32.totalorder %s3108_s17, 1 }
  0x85   : > { %2706 = vmatprep.subr.bf16.mxu0 %v5034_v3  ;;  %2658 = vmatprep.subr.bf16.mxu1 %v5034_v3  ;;  %v3536_v9 = vld [vmem:[%s3515_s24 + $0x100] sm:$0xff]  ;;  %v3592_v22 = vld [vmem:[%s3515_s24 + $0x110] sm:$0xff]  ;;  %v3629_v34 = vld [vmem:[%s3515_s24 + $0x18] sm:$0xff] }
  0x86   : > { %v3523_v4 = vshrl.u32 %v5030_v2, 7  ;;  %v3526_v5 = vand.u32 127, %v5030_v2  ;;  %s723_s8 = scalar_select %p658_p13, 1, 0  ;;  %v922_v18 = vld [vmem:[%s3515_s24 + $0x20] sm:$0xff]  ;;  %v924_v27 = vld [vmem:[%s3515_s24 + $0x30] sm:$0xff]  ;;  %v1790_v39 = vadd.f32 %v3629_v34, %v3626_v33 }
  0x87   : > { %v3604_v26 = vld [vmem:[%s3515_s24 + $0x120] sm:$0xff]  ;;  %v3655_v43 = vld [vmem:[%s3515_s24 + $0x130] sm:$0xff]  ;;  %v3658_v44 = vld [vmem:[%s3515_s24 + $0x28] sm:$0xff] }
  0x88   : > { %5111 = vst [vmem:[#allocation6_spill] sm:$0xff] %v3526_v5  ;;  %vm5026_vm1 = vcmp.eq.s32.totalorder %v3523_v4, %v3526_v5  ;;  %v724_v6 = vstv %s723_s8  ;;  %v3539_v10 = vadd.s32 8, %v3523_v4  ;;  %v3542_v11 = vadd.s32 16, %v3523_v4  ;;  %v926_v35 = vld [vmem:[%s3515_s24 + $0x40] sm:$0xff]  ;;  %v928_v45 = vld [vmem:[%s3515_s24 + $0x50] sm:$0xff]  ;;  %v3690_v54 = vld [vmem:[%s3515_s24 + $0x38] sm:$0xff] }
  0x89   : > { %vm3531_vm2 = vcmp.eq.s32.totalorder %v724_v6, 1  ;;  %v3556_v14 = vadd.s32 24, %v3523_v4  ;;  %v3560_v16 = vadd.s32 32, %v3523_v4  ;;  %v3578_v20 = vadd.s32 40, %v3523_v4  ;;  %v930_v51 = vld [vmem:[%s3515_s24 + $0x60] sm:$0xff]  ;;  %v932_v55 = vld [vmem:[%s3515_s24 + $0x70] sm:$0xff] }
  0x8a   : > { %5114 = vst [vmem:[#allocation7_spill] sm:$0xff] %v3539_v10  ;;  %5115 = vst [vmem:[#allocation8_spill] sm:$0xff] %v3542_v11  ;;  %vm5028_vm4 = vcmp.eq.s32.totalorder %v3539_v10, %v3526_v5  ;;  %vm5022_vm5 = vcmp.eq.s32.totalorder %v3542_v11, %v3526_v5  ;;  %v3595_v23 = vadd.s32 48, %v3523_v4  ;;  %v3618_v31 = vadd.s32 56, %v3523_v4  ;;  %v3705_v59 = vld [vmem:[%s3515_s24 + $0x140] sm:$0xff]  ;;  %v3721_v0 = vld [vmem:[%s3515_s24 + $0x48] sm:$0xff] }
  0x8b   : > { %vm3549_vm3 = vmand %vm3531_vm2, %vm5026_vm1  ;;  %5118 = vst [vmem:[#allocation9_spill] sm:$0xff] %v3556_v14  ;;  %vm5023_vm7 = vcmp.eq.s32.totalorder %v3556_v14, %v3526_v5  ;;  %vm5019_vm9 = vcmp.eq.s32.totalorder %v3560_v16, %v3526_v5  ;;  %v3621_v32 = vadd.s32 64, %v3523_v4  ;;  %vm5021_vm11 = vcmp.eq.s32.totalorder %v3578_v20, %v3526_v5  ;;  %v1046_v1 = vld [vmem:[%s3501_s25] sm:$0xff]  ;;  %v1047_v6 = vld [vmem:[%s3501_s25 + $0x8] sm:$0xff] }
  0x8c   : > { %v982_v13 = vsel %vm3549_vm3, 0.0, %v918_v7  ;;  %5119 = vst [vmem:[#allocation10_spill] sm:$0xff] %v3560_v16  ;;  %vm3573_vm6 = vmand %vm3531_vm2, %vm5028_vm4  ;;  %v3645_v40 = vadd.s32 72, %v3523_v4  ;;  %v3648_v41 = vadd.s32 80, %v3523_v4  ;;  %vm5020_vm13 = vcmp.eq.s32.totalorder %v3595_v23, %v3526_v5  ;;  %v1051_v2 = vld [vmem:[%s3501_s25 + $0x28] sm:$0xff]  ;;  %v1072_v8 = vld [vmem:[%s3501_s25 + $0xd0] sm:$0xff] }
  0x8d   : > { %v2846_v15 = vpack.i.bf16 %v982_v13, %v3536_v9  ;;  %5122 = vst [vmem:[#allocation11_spill] sm:$0xff] %v3578_v20  ;;  %vm3587_vm8 = vmand %vm3531_vm2, %vm5022_vm5  ;;  %v984_v24 = vsel %vm3573_vm6, 0.0, %v920_v17  ;;  %v3671_v48 = vadd.s32 128, %v3523_v4  ;;  %v3674_v49 = vadd.s32 128, %v3526_v5  ;;  %v957_v20 = vld [vmem:[%s3515_s24 + $0x138] sm:$0xff]  ;;  %v792_v12 = vld [vmem:[%s3513_s7 + $0x10] sm:$0xff] }
  0x8e   : > { %5125 = vst [vmem:[#allocation12_spill] sm:$0xff] %v3595_v23  ;;  %v986_v25 = vsel %vm3587_vm8, 0.0, %v922_v18  ;;  %vm3612_vm10 = vmand %vm3531_vm2, %vm5023_vm7  ;;  %v1753_v29 = vadd.f32 %v984_v24, %v982_v13  ;;  %v2848_v30 = vpack.i.bf16 %v984_v24, %v3592_v22  ;;  %v1791_v50 = vadd.f32 %v1790_v39, %v3658_v44  ;;  %v934_v13 = vld [vmem:[%s3515_s24 + $0x80] sm:$0xff]  ;;  %v3745_v24 = vld [vmem:[%s3515_s24 + $0x58] sm:$0xff] }
  0x8f   : > { %2847 = vxpose.xlu0.b32.start [1/16] %v2846_v15, 128  ;;  %5128 = vst [vmem:[#allocation13_spill] sm:$0xff] %v3618_v31  ;;  %5129 = vst [vmem:[#allocation14_spill] sm:$0xff] %v3621_v32  ;;  %v2850_v38 = vpack.i.bf16 %v986_v25, %v3604_v26  ;;  %v988_v42 = vsel %vm3612_vm10, 0.0, %v924_v27  ;;  %v3679_v52 = vadd.s32 88, %v3523_v4  ;;  %vm5024_vm15 = vcmp.eq.s32.totalorder %v3618_v31, %v3526_v5  ;;  %v1048_v27 = vld [vmem:[%s3501_s25 + $0x10] sm:$0xff]  ;;  %v798_v21 = vld [vmem:[%s3513_s7 + $0x40] sm:$0xff] }
  0x90   : > { %vm3637_vm12 = vmand %vm3531_vm2, %vm5019_vm9  ;;  %v1754_v37 = vadd.f32 %v1753_v29, %v986_v25  ;;  %5132 = vst [vmem:[#allocation15_spill] sm:$0xff] %v3645_v40  ;;  %vm5025_vm0 = vcmp.eq.s32.totalorder %v3621_v32, %v3526_v5  ;;  %v2852_v58 = vpack.i.bf16 %v988_v42, %v3655_v43  ;;  %v1792_v60 = vadd.f32 %v1791_v50, %v3690_v54  ;;  %v3857_v32 = vld [vmem:[%s3515_s24 + $0x160] sm:$0xff]  ;;  %v803_v28 = vld [vmem:[%s3513_s7 + $0x68] sm:$0xff] }
  0x91   : > { %5133 = vst [vmem:[#allocation16_spill] sm:$0xff] %v3648_v41  ;;  %vm3666_vm14 = vmand %vm3531_vm2, %vm5021_vm11  ;;  %v3687_v53 = vsel %vm3637_vm12, 0.0, %v926_v35  ;;  %v3709_v61 = vadd.s32 136, %v3523_v4  ;;  %v3712_v62 = vadd.s32 96, %v3523_v4  ;;  %v3726_v7 = vadd.s32 144, %v3523_v4  ;;  %v951_v35 = vld [vmem:[%s3515_s24 + $0x108] sm:$0xff] }
  0x92   : > { %v1755_v47 = vadd.f32 %v1754_v37, %v988_v42  ;;  %5136 = vst [vmem:[#allocation17_spill] sm:$0xff] %v3671_v48  ;;  %5137 = vst [vmem:[#allocation18_spill] sm:$0xff] %v3679_v52  ;;  %v3718_v63 = vsel %vm3666_vm14, 0.0, %v928_v45  ;;  %v3730_v15 = vadd.s32 104, %v3523_v4  ;;  %vm5029_vm5 = vcmp.eq.s32.totalorder %v3671_v48, %v3674_v49  ;;  %v936_v42 = vld [vmem:[%s3515_s24 + $0x90] sm:$0xff]  ;;  %v805_v36 = vld [vmem:[%s3513_s7 + $0x78] sm:$0xff] }
  0x93   : > { %2849 = vxpose.xlu0.b32.cont [2/16] %v2848_v30, 128  ;;  %vm3698_vm9 = vmand %vm3531_vm2, %vm5020_vm13  ;;  %5140 = vst [vmem:[#allocation19_spill] sm:$0xff] %v3709_v61  ;;  %vm5027_vm13 = vcmp.eq.s32.totalorder %v3645_v40, %v3526_v5  ;;  %v1793_v25 = vadd.f32 %v1792_v60, %v3721_v0  ;;  %vm5033_vm7 = vcmp.eq.s32.totalorder %v3648_v41, %v3526_v5  ;;  %v5146_v29 = vmov 0  ;;  %v3838_v41 = vld [vmem:[%s3515_s24 + $0x78] sm:$0xff]  ;;  %v807_v46 = vld [vmem:[%s3513_s7 + $0x88] sm:$0xff] }
  0x94   : > { %v1756_v57 = vadd.f32 %v1755_v47, %v3687_v53  ;;  %5141 = vst [vmem:[#allocation20_spill] sm:$0xff] %v3712_v62  ;;  %5142 = vst [vmem:[#allocation21_spill] sm:$0xff] %v3726_v7  ;;  %v3762_v30 = vsel %vm3698_vm9, 0.0, %v930_v51  ;;  %v2659_v37 = vpack.c.bf16 %v1047_v6, %v1046_v1  ;;  %v3767_v39 = vadd.s32 152, %v3523_v4  ;;  %v3783_v51 = vld [vmem:[%s3515_s24 + $0x150] sm:$0xff]  ;;  %v953_v6 = vld [vmem:[%s3515_s24 + $0x118] sm:$0xff] }
  0x95   : > { %5143 = vst [vmem:[#allocation22_spill] sm:$0xff] %v3730_v15  ;;  %vm3737_vm11 = vmand %vm3531_vm2, %vm5024_vm15  ;;  %v5150_v45 = vmov 0  ;;  %v2854_v50 = vpack.i.bf16 %v3687_v53, %v3705_v59  ;;  %v3789_v60 = vadd.s32 112, %v3523_v4  ;;  %v5154_v53 = vmov 0  ;;  %v809_v56 = vld [vmem:[%s3513_s7 + $0x98] sm:$0xff]  ;;  %v811_v17 = vld [vmem:[%s3513_s7 + $0xa8] sm:$0xff] }
  0x96   : > { %v1757_v18 = vadd.f32 %v1756_v57, %v3718_v63  ;;  %vm3756_vm15 = vmand %vm3531_vm2, %vm5025_vm0  ;;  %5149 = vst [vmem:[#allocation24_spill] sm:$0xff] %v3767_v39  ;;  %v1794_v57 = vadd.f32 %v1793_v25, %v3745_v24  ;;  %v3793_v1 = vsel %vm3737_vm11, 0.0, %v932_v55  ;;  %2708 = vmatpush1.bf16.msra.mxu0 %v2659_v37  ;;  %2660 = vmatpush1.bf16.msra.mxu1 %v2659_v37  ;;  %v5157_v55 = vmov 0 }
  0x97   : > { %2851 = vxpose.xlu0.b32.cont [3/16] %v2850_v38, 128  ;;  %v5147_v29 = vsel %vm3756_vm15, 4294967295, %v5146_v29  ;;  %v1049_v38 = vld [vmem:[%s3501_s25 + $0x18] sm:$0xff]  ;;  %vm3775_vm0 = vmand %vm3531_vm2, %vm5027_vm13  ;;  %5153 = vst [vmem:[#allocation26_spill] sm:$0xff] %v3789_v60  ;;  %2709 = vmatprep.subr.bf16.mxu0 %v5034_v3  ;;  %v3833_v48 = vsel %vm3756_vm15, 0.0, %v934_v13  ;;  %v955_v13 = vld [vmem:[%s3515_s24 + $0x128] sm:$0xff]  ;;  %v5165_v40 = vmov 0 }
  0x98   : > { %5148 = vst [vmem:[#allocation23_spill] sm:$0xff] %v5147_v29  ;;  %v5151_v45 = vsel %vm3775_vm0, 4294967295, %v5150_v45  ;;  %v1758_v47 = vadd.f32 %v1757_v18, %v3762_v30  ;;  %vm3800_vm13 = vmand %vm3531_vm2, %vm5029_vm5  ;;  %v2662_v18 = vpack.c.bf16 %v1049_v38, %v1048_v27  ;;  %2661 = vmatprep.subr.bf16.mxu1 %v5034_v3  ;;  %v1050_v38 = vld [vmem:[%s3501_s25 + $0x20] sm:$0xff]  ;;  %v5170_v31 = vmov 0 }
  0x99   : > { %5152 = vst [vmem:[#allocation25_spill] sm:$0xff] %v5151_v45  ;;  %v5155_v53 = vsel %vm3800_vm13, 4294967295, %v5154_v53  ;;  %vm3817_vm5 = vmand %vm3531_vm2, %vm5033_vm7  ;;  %v3824_v27 = vsel %vm3800_vm13, 0.0, %v951_v35  ;;  %vm5160_vm7 = vcmp.eq.s32.totalorder %v3709_v61, %v3674_v49  ;;  %v2665_v23 = vpack.c.bf16 %v1051_v2, %v1050_v38  ;;  %v1052_v38 = vld [vmem:[%s3501_s25 + $0x30] sm:$0xff]  ;;  %v1059_v45 = vld [vmem:[%s3501_s25 + $0x68] sm:$0xff] }
  0x9a   : > { %5156 = vst [vmem:[#allocation27_spill] sm:$0xff] %v5155_v53  ;;  %v5158_v55 = vsel %vm3817_vm5, 4294967295, %v5157_v55  ;;  %v1759_v25 = vadd.f32 %v1758_v47, %v3793_v1  ;;  %v2856_v47 = vpack.i.bf16 %v3718_v63, %v3783_v51  ;;  %v2958_v35 = vpack.i.bf16 %v3626_v33, %v3824_v27  ;;  %vm3847_vm1 = vmand %vm3531_vm2, %vm5160_vm7  ;;  %v938_v63 = vld [vmem:[%s3515_s24 + $0xa0] sm:$0xff]  ;;  %2711 = vmatpush1.bf16.msra.mxu0 %v2662_v18  ;;  %v4101_v29 = vld [vmem:[%s3515_s24 + $0xf8] sm:$0xff] }
  0x9b   : > { %2853 = vxpose.xlu0.b32.cont [4/16] %v2852_v58, 128  ;;  %v3805_v58 = vld [vmem:[%s3515_s24 + $0x68] sm:$0xff]  ;;  %5159 = vst [vmem:[#allocation28_spill] sm:$0xff] %v5158_v55  ;;  %v3862_v61 = vsel %vm3847_vm1, 0.0, %v953_v6  ;;  %vm5164_vm7 = vcmp.eq.s32.totalorder %v3726_v7, %v3674_v49  ;;  %v3881_v6 = vsel %vm3775_vm0, 0.0, %v936_v42  ;;  %2663 = vmatpush1.bf16.msra.mxu1 %v2662_v18  ;;  %v5173_v2 = vmov 0.0|0.0   ;;  %v3918_v18 = vld [vmem:[%s3515_s24 + $0x98] sm:$0xff] }
  0x9c   : > { %v1795_v37 = vadd.f32 %v1794_v57, %v3805_v58  ;;  %v5161_v57 = vmov 0  ;;  %v1760_v3 = vadd.f32 %v1759_v25, %v3833_v48  ;;  %vm3869_vm13 = vmand %vm3531_vm2, %vm5164_vm7  ;;  %v940_v25 = vld [vmem:[%s3515_s24 + $0xb0] sm:$0xff]  ;;  %2959 = vxpose.xlu1.b32.start [1/16] %v2958_v35, 128  ;;  %v2960_v7 = vpack.i.bf16 %v3629_v34, %v3862_v61  ;;  %2712 = vmatprep.subr.bf16.mxu0 %v5173_v2 }
  0x9d   : > { %v5162_v57 = vsel %vm3847_vm1, 4294967295, %v5161_v57  ;;  %v5166_v40 = vsel %vm3869_vm13, 4294967295, %v5165_v40  ;;  %vm5169_vm7 = vcmp.eq.s32.totalorder %v3679_v52, %v3526_v5  ;;  %v3901_v34 = vsel %vm3869_vm13, 0.0, %v955_v13  ;;  %v1053_v52 = vld [vmem:[%s3501_s25 + $0x38] sm:$0xff]  ;;  %2664 = vmatprep.subr.bf16.mxu1 %v5173_v2 }
  0x9e   : > { %5163 = vst [vmem:[#allocation29_spill] sm:$0xff] %v5162_v57  ;;  %v1796_v33 = vadd.f32 %v1795_v37, %v3838_v41  ;;  %5167 = vst [vmem:[#allocation30_spill] sm:$0xff] %v5166_v40  ;;  %v3884_v37 = vld [vmem:[%s3515_s24 + $0x88] sm:$0xff]  ;;  %v1761_v42 = vadd.f32 %v1760_v3, %v3881_v6  ;;  %v3907_v16 = vadd.s32 120, %v3523_v4  ;;  %v3913_v3 = vsel %vm3817_vm5, 0.0, %v938_v63  ;;  %v942_v63 = vld [vmem:[%s3515_s24 + $0xc0] sm:$0xff]  ;;  %2714 = vmatpush1.bf16.msra.mxu0 %v2665_v23 }
  0x9f   : > { %2855 = vxpose.xlu0.b32.cont [5/16] %v2854_v50, 128  ;;  %v3874_v50 = vadd.s32 160, %v3523_v4  ;;  %vm3893_vm4 = vmand %vm3531_vm2, %vm5169_vm7  ;;  %v2858_v13 = vpack.i.bf16 %v3762_v30, %v3857_v32  ;;  %vm5175_vm13 = vcmp.eq.s32.totalorder %v3767_v39, %v3674_v49  ;;  %vm5179_vm7 = vcmp.eq.s32.totalorder %v3712_v62, %v3526_v5  ;;  %v3943_v39 = vld [vmem:[%s3515_s24 + $0x170] sm:$0xff]  ;;  %2666 = vmatpush1.bf16.msra.mxu1 %v2665_v23  ;;  %v959_v23 = vld [vmem:[%s3515_s24 + $0x148] sm:$0xff] }
  0xa0   : > { %v5171_v31 = vsel %vm3893_vm4, 4294967295, %v5170_v31  ;;  %v1797_v35 = vadd.f32 %v1796_v33, %v3884_v37  ;;  %5174 = vst [vmem:[#allocation33_spill] sm:$0xff] %v3907_v16  ;;  %vm3926_vm1 = vmand %vm3531_vm2, %vm5175_vm13  ;;  %v5176_v33 = vmov 0  ;;  %v5180_v30 = vmov 0  ;;  %v944_v62 = vld [vmem:[%s3515_s24 + $0xd0] sm:$0xff]  ;;  %2961 = vxpose.xlu1.b32.cont [2/16] %v2960_v7, 128  ;;  %2715 = vmatprep.subr.bf16.mxu0 %v5173_v2 }
  0xa1   : > { %5168 = vst [vmem:[#allocation31_spill] sm:$0xff] %v3874_v50  ;;  %5172 = vst [vmem:[#allocation32_spill] sm:$0xff] %v5171_v31  ;;  %v5177_v33 = vsel %vm3926_vm1, 4294967295, %v5176_v33  ;;  %v1762_v11 = vadd.f32 %v1761_v42, %v3913_v3  ;;  %v3949_v10 = vadd.s32 168, %v3523_v4  ;;  %v3956_v42 = vsel %vm3893_vm4, 0.0, %v940_v25  ;;  %2667 = vmatprep.subr.bf16.mxu1 %v5173_v2  ;;  %v4026_v31 = vld [vmem:[%s3515_s24 + $0x180] sm:$0xff] }
  0xa2   : > { %5178 = vst [vmem:[#allocation34_spill] sm:$0xff] %v5177_v33  ;;  %vm3937_vm5 = vmand %vm3531_vm2, %vm5179_vm7  ;;  %v1798_v14 = vadd.f32 %v1797_v35, %v3918_v18  ;;  %v2962_v35 = vpack.i.bf16 %v3658_v44, %v3901_v34  ;;  %v2668_v40 = vpack.c.bf16 %v1053_v52, %v1052_v38  ;;  %vm5184_vm13 = vcmp.eq.s32.totalorder %v3730_v15, %v3526_v5  ;;  %v1054_v52 = vld [vmem:[%s3501_s25 + $0x40] sm:$0xff]  ;;  %v1055_v38 = vld [vmem:[%s3501_s25 + $0x48] sm:$0xff] }
  0xa3   : > { %v5181_v30 = vsel %vm3937_vm5, 4294967295, %v5180_v30  ;;  %2857 = vxpose.xlu0.b32.cont [6/16] %v2856_v47, 128  ;;  %5183 = vst [vmem:[#allocation36_spill] sm:$0xff] %v3949_v10  ;;  %v3959_v47 = vld [vmem:[%s3515_s24 + $0xa8] sm:$0xff]  ;;  %vm3968_vm7 = vmand %vm3531_vm2, %vm5184_vm13  ;;  %v5185_v57 = vmov 0  ;;  %v1763_v25 = vadd.f32 %v1762_v11, %v3956_v42  ;;  %v3976_v44 = vsel %vm3926_vm1, 0.0, %v957_v20 }
  0xa4   : > { %5182 = vst [vmem:[#allocation35_spill] sm:$0xff] %v5181_v30  ;;  %v5186_v57 = vsel %vm3968_vm7, 4294967295, %v5185_v57  ;;  %v1799_v7 = vadd.f32 %v1798_v14, %v3959_v47  ;;  %v3985_v15 = vsel %vm3937_vm5, 0.0, %v942_v63  ;;  %v2860_v11 = vpack.i.bf16 %v3793_v1, %v3943_v39  ;;  %v3990_v14 = vld [vmem:[%s3515_s24 + $0xb8] sm:$0xff]  ;;  %v946_v63 = vld [vmem:[%s3515_s24 + $0xe0] sm:$0xff]  ;;  %2963 = vxpose.xlu1.b32.cont [3/16] %v2962_v35, 128  ;;  %2717 = vmatpush1.bf16.msra.mxu0 %v2668_v40 }
  0xa5   : > { %5187 = vst [vmem:[#allocation37_spill] sm:$0xff] %v5186_v57  ;;  %vm5188_vm1 = vcmp.eq.s32.totalorder %v3874_v50, %v3674_v49  ;;  %v5189_v20 = vmov 0  ;;  %vm5192_vm13 = vcmp.eq.s32.totalorder %v3789_v60, %v3526_v5  ;;  %v5193_v1 = vmov 0  ;;  %v948_v60 = vld [vmem:[%s3515_s24 + $0xf0] sm:$0xff]  ;;  %2669 = vmatpush1.bf16.msra.mxu1 %v2668_v40  ;;  %2718 = vmatprep.subr.bf16.mxu0 %v5173_v2 }
  0xa6   : > { %vm3998_vm4 = vmand %vm3531_vm2, %vm5188_vm1  ;;  %v1764_v33 = vadd.f32 %v1763_v25, %v3985_v15  ;;  %v1800_v50 = vadd.f32 %v1799_v7, %v3990_v14  ;;  %v4018_v53 = vadd.s32 176, %v3523_v4  ;;  %v4023_v30 = vsel %vm3968_vm7, 0.0, %v944_v62  ;;  %v4029_v25 = vld [vmem:[%s3515_s24 + $0xc8] sm:$0xff]  ;;  %2670 = vmatprep.subr.bf16.mxu1 %v5173_v2 }
  0xa7   : > { %v5190_v20 = vsel %vm3998_vm4, 4294967295, %v5189_v20  ;;  %vm4009_vm5 = vmand %vm3531_vm2, %vm5192_vm13  ;;  %2859 = vxpose.xlu0.b32.cont [7/16] %v2858_v13, 128  ;;  %v2964_v13 = vpack.i.bf16 %v3690_v54, %v3976_v44  ;;  %v2671_v7 = vpack.c.bf16 %v1055_v38, %v1054_v52  ;;  %vm5197_vm13 = vcmp.eq.s32.totalorder %v3907_v16, %v3526_v5  ;;  %v1056_v54 = vld [vmem:[%s3501_s25 + $0x50] sm:$0xff]  ;;  %v1057_v52 = vld [vmem:[%s3501_s25 + $0x58] sm:$0xff] }
  0xa8   : > { %5191 = vst [vmem:[#allocation38_spill] sm:$0xff] %v5190_v20  ;;  %v5194_v1 = vsel %vm4009_vm5, 4294967295, %v5193_v1  ;;  %5196 = vst [vmem:[#allocation40_spill] sm:$0xff] %v4018_v53  ;;  %v5198_v62 = vmov 0  ;;  %v1765_v57 = vadd.f32 %v1764_v33, %v4023_v30  ;;  %v1801_v55 = vadd.f32 %v1800_v50, %v4029_v25  ;;  %v4056_v16 = vld [vmem:[%s3515_s24 + $0xd8] sm:$0xff]  ;;  %v4083_v20 = vld [vmem:[%s3515_s24 + $0x190] sm:$0xff] }
  0xa9   : > { %5195 = vst [vmem:[#allocation39_spill] sm:$0xff] %v5194_v1  ;;  %vm4038_vm1 = vmand %vm3531_vm2, %vm5197_vm13  ;;  %v4046_v35 = vsel %vm3998_vm4, 0.0, %v959_v23  ;;  %v4053_v38 = vsel %vm4009_vm5, 0.0, %v946_v63  ;;  %vm5201_vm13 = vcmp.eq.s32.totalorder %v3949_v10, %v3674_v49  ;;  %v5202_v40 = vmov 0  ;;  %v961_v50 = vld [vmem:[%s3515_s24 + $0x158] sm:$0xff]  ;;  %2965 = vxpose.xlu1.b32.cont [4/16] %v2964_v13, 128  ;;  %2720 = vmatpush1.bf16.msra.mxu0 %v2671_v7  ;;  %v791_v13 = vld [vmem:[%s3513_s7 + $0x8] sm:$0xff] }
  0xaa   : > { %v5199_v62 = vsel %vm4038_vm1, 4294967295, %v5198_v62  ;;  %vm4064_vm4 = vmand %vm3531_vm2, %vm5201_vm13  ;;  %v4070_v33 = vadd.s32 184, %v3523_v4  ;;  %v1766_v23 = vadd.f32 %v1765_v57, %v4053_v38  ;;  %v2862_v63 = vpack.i.bf16 %v3833_v48, %v4026_v31  ;;  %v4086_v57 = vld [vmem:[%s3515_s24 + $0xe8] sm:$0xff]  ;;  %2672 = vmatpush1.bf16.msra.mxu1 %v2671_v7  ;;  %2721 = vmatprep.subr.bf16.mxu0 %v5173_v2 }
  0xab   : > { %5200 = vst [vmem:[#allocation41_spill] sm:$0xff] %v5199_v62  ;;  %v5203_v40 = vsel %vm4064_vm4, 4294967295, %v5202_v40  ;;  %2861 = vxpose.xlu0.b32.cont [8/16] %v2860_v11, 128  ;;  %v1802_v10 = vadd.f32 %v1801_v55, %v4056_v16  ;;  %vm5081_vm13 = vcmp.eq.s32.totalorder %v4018_v53, %v3674_v49  ;;  %v4080_v5 = vsel %vm4038_vm1, 0.0, %v948_v60  ;;  %v1058_v60 = vld [vmem:[%s3501_s25 + $0x60] sm:$0xff]  ;;  %2673 = vmatprep.subr.bf16.mxu1 %v5173_v2 }
  0xac   : > { %v2966_v48 = vpack.i.bf16 %v3721_v0, %v4046_v35  ;;  %v2674_v55 = vpack.c.bf16 %v1057_v52, %v1056_v54  ;;  %v1767_v11 = vadd.f32 %v1766_v23, %v4080_v5  ;;  %v4094_v62 = vsel %vm4064_vm4, 0.0, %v961_v50  ;;  %vm4109_vm1 = vmand %vm3531_vm2, %vm5081_vm13  ;;  %v963_v0 = vld [vmem:[%s3515_s24 + $0x168] sm:$0xff]  ;;  %1527 = vmatprep.mubr.f32.mxu0 %v791_v13  ;;  %v4123_v50 = vld [vmem:[%s3515_s24 + $0x1a0] sm:$0xff] }
  0xad   : > { %v1803_v1 = vadd.f32 %v1802_v10, %v4086_v57  ;;  %v5204_v10 = vmov 0  ;;  %vm5084_vm4 = vcmp.eq.s32.totalorder %v4070_v33, %v3674_v49  ;;  %v4117_v7 = vadd.s32 240, %v3523_v4 }
  0xae   : > { %v5205_v10 = vsel %vm4109_vm1, 4294967295, %v5204_v10  ;;  %v1768_v54 = vadd.f32 %v1767_v11, %v3536_v9  ;;  %v2864_v52 = vpack.i.bf16 %v3881_v6, %v4083_v20  ;;  %v4127_v53 = vadd.s32 192, %v3523_v4  ;;  %2967 = vxpose.xlu1.b32.cont [5/16] %v2966_v48, 128  ;;  %2723 = vmatpush1.bf16.msra.mxu0 %v2674_v55  ;;  %vm4148_vm13 = vmand %vm3531_vm2, %vm5084_vm4  ;;  %v965_v11 = vld [vmem:[%s3515_s24 + $0x178] sm:$0xff] }
  0xaf   : > { %5206 = vst [vmem:[#allocation42_spill] sm:$0xff] %v4117_v7  ;;  %2863 = vxpose.xlu0.b32.cont [9/16] %v2862_v63, 128  ;;  %v1804_v23 = vadd.f32 %v1803_v1, %v4101_v29  ;;  %v2968_v13 = vpack.i.bf16 %v3745_v24, %v4094_v62  ;;  %v2677_v9 = vpack.c.bf16 %v1059_v45, %v1058_v60  ;;  %v4134_v6 = vadd.s32 248, %v3523_v4  ;;  %v1060_v45 = vld [vmem:[%s3501_s25 + $0x70] sm:$0xff] }
  0xb0   : > { %v1769_v63 = vadd.f32 %v1768_v54, %v3592_v22  ;;  %v4140_v48 = vsel %vm4109_vm1, 0.0, %v963_v0  ;;  %2675 = vmatpush1.bf16.msra.mxu1 %v2674_v55  ;;  %2724 = vmatprep.subr.bf16.mxu0 %v5173_v2  ;;  %v5208_v24 = vmov 0  ;;  %v1061_v22 = vld [vmem:[%s3501_s25 + $0x78] sm:$0xff]  ;;  %vm5210_vm1 = vcmp.eq.s32.totalorder %v4117_v7, %v3674_v49  ;;  %v1062_v7 = vld [vmem:[%s3501_s25 + $0x80] sm:$0xff] }
  0xb1   : > { %5207 = vst [vmem:[#allocation43_spill] sm:$0xff] %v4134_v6  ;;  %v1805_v1 = vadd.f32 %v1804_v23, %v3824_v27  ;;  %v5209_v24 = vsel %vm4148_vm13, 4294967295, %v5208_v24  ;;  %v2866_v27 = vpack.i.bf16 %v3913_v3, %v4123_v50  ;;  %2676 = vmatprep.subr.bf16.mxu1 %v5173_v2  ;;  %vm4163_vm5 = vmand %vm3531_vm2, %vm5210_vm1  ;;  %vm5088_vm4 = vcmp.eq.s32.totalorder %v4134_v6, %v3674_v49  ;;  %v4171_v3 = vld [vmem:[%s3515_s24 + $0x1b0] sm:$0xff]  ;;  %v1063_v6 = vld [vmem:[%s3501_s25 + $0x88] sm:$0xff] }
  0xb2   : > { %v1770_v60 = vadd.f32 %v1769_v63, %v3604_v26  ;;  %vm5090_vm7 = vcmp.eq.s32.totalorder %v4127_v53, %v3674_v49  ;;  %v4177_v54 = vadd.s32 200, %v3523_v4  ;;  %vm4184_vm1 = vmand %vm3531_vm2, %vm5088_vm4  ;;  %2969 = vxpose.xlu1.b32.cont [6/16] %v2968_v13, 128  ;;  %2726 = vmatpush1.bf16.msra.mxu0 %v2677_v9  ;;  %v2868_v13 = vpack.i.bf16 %v3956_v42, %v4171_v3 }
  0xb3   : > { %2865 = vxpose.xlu0.b32.cont [10/16] %v2864_v52, 128  ;;  %v1806_v0 = vadd.f32 %v1805_v1, %v3862_v61  ;;  %v2970_v61 = vpack.i.bf16 %v3805_v58, %v4140_v48  ;;  %v2680_v52 = vpack.c.bf16 %v1061_v22, %v1060_v45  ;;  %v1029_v1 = vsel %vm4148_vm13, 0.0, %v965_v11  ;;  %2727 = vmatprep.subr.bf16.mxu0 %v5173_v2  ;;  %vm4205_vm4 = vmand %vm3531_vm2, %vm5090_vm7  ;;  %v967_v58 = vld [vmem:[%s3515_s24 + $0x188] sm:$0xff] }
  0xb4   : > { %v1771_v23 = vadd.f32 %v1770_v60, %v3655_v43  ;;  %2678 = vmatpush1.bf16.msra.mxu1 %v2677_v9  ;;  %v5215_v43 = vmov 0  ;;  %v4212_v9 = vld [vmem:[%s3515_s24 + $0x1c0] sm:$0xff]  ;;  %vm5092_vm13 = vcmp.eq.s32.totalorder %v4177_v54, %v3674_v49  ;;  %v4218_v45 = vadd.s32 208, %v3523_v4  ;;  %v1064_v60 = vld [vmem:[%s3501_s25 + $0x90] sm:$0xff] }
  0xb5   : > { %v1807_v63 = vadd.f32 %v1806_v0, %v3901_v34  ;;  %2679 = vmatprep.subr.bf16.mxu1 %v5173_v2  ;;  %v5216_v43 = vsel %vm4205_vm4, 4294967295, %v5215_v43  ;;  %v2972_v22 = vpack.i.bf16 %v3838_v41, %v1029_v1  ;;  %v2683_v11 = vpack.c.bf16 %v1063_v6, %v1062_v7  ;;  %v1065_v0 = vld [vmem:[%s3501_s25 + $0x98] sm:$0xff]  ;;  %vm4236_vm7 = vmand %vm3531_vm2, %vm5092_vm13 }
  0xb6   : > { %v1772_v34 = vadd.f32 %v1771_v23, %v3705_v59  ;;  %2971 = vxpose.xlu1.b32.cont [7/16] %v2970_v61, 128  ;;  %2729 = vmatpush1.bf16.msra.mxu0 %v2680_v52  ;;  %v2870_v61 = vpack.i.bf16 %v3985_v15, %v4212_v9  ;;  %v5217_v41 = vmov 0  ;;  %v4246_v15 = vadd.s32 216, %v3523_v4  ;;  %v4249_v6 = vld [vmem:[%s3515_s24 + $0x1d0] sm:$0xff] }
  0xb7   : > { %2867 = vxpose.xlu0.b32.cont [11/16] %v2866_v27, 128  ;;  %v1808_v42 = vadd.f32 %v1807_v63, %v3976_v44  ;;  %v1031_v44 = vsel %vm4205_vm4, 0.0, %v967_v58  ;;  %2730 = vmatprep.subr.bf16.mxu0 %v5173_v2  ;;  %v5218_v41 = vsel %vm4236_vm7, 4294967295, %v5217_v41  ;;  %vm5094_vm4 = vcmp.eq.s32.totalorder %v4218_v45, %v3674_v49  ;;  %v1067_v58 = vld [vmem:[%s3501_s25 + $0xa8] sm:$0xff] }
  0xb8   : > { %v1773_v59 = vadd.f32 %v1772_v34, %v3783_v51  ;;  %2681 = vmatpush1.bf16.msra.mxu1 %v2680_v52  ;;  %v969_v51 = vld [vmem:[%s3515_s24 + $0x198] sm:$0xff]  ;;  %v2974_v52 = vpack.i.bf16 %v3884_v37, %v1031_v44  ;;  %v2686_v23 = vpack.c.bf16 %v1065_v0, %v1064_v60  ;;  %vm4265_vm13 = vmand %vm3531_vm2, %vm5094_vm4  ;;  %v971_v37 = vld [vmem:[%s3515_s24 + $0x1a8] sm:$0xff]  ;;  %v4281_v60 = vadd.s32 232, %v3523_v4 }
  0xb9   : > { %v1809_v27 = vadd.f32 %v1808_v42, %v4046_v35  ;;  %2682 = vmatprep.subr.bf16.mxu1 %v5173_v2  ;;  %v2872_v42 = vpack.i.bf16 %v4023_v30, %v4249_v6  ;;  %v1035_v30 = vsel %vm4265_vm13, 0.0, %v971_v37 }
  0xba   : > { %v1774_v35 = vadd.f32 %v1773_v59, %v3857_v32  ;;  %2973 = vxpose.xlu1.b32.cont [8/16] %v2972_v22, 128  ;;  %2732 = vmatpush1.bf16.msra.mxu0 %v2683_v11 }
  0xbb   : > { %2869 = vxpose.xlu0.b32.cont [12/16] %v2868_v13, 128  ;;  %v1810_v7 = vadd.f32 %v1809_v27, %v4094_v62  ;;  %v1033_v62 = vsel %vm4236_vm7, 0.0, %v969_v51  ;;  %2733 = vmatprep.subr.bf16.mxu0 %v5173_v2  ;;  %v1066_v13 = vld [vmem:[%s3501_s25 + $0xa0] sm:$0xff]  ;;  %vm5096_vm7 = vcmp.eq.s32.totalorder %v4246_v15, %v3674_v49 }
  0xbc   : > { %v1775_v32 = vadd.f32 %v1774_v35, %v3943_v39  ;;  %2684 = vmatpush1.bf16.msra.mxu1 %v2683_v11  ;;  %v5219_v39 = vmov 0  ;;  %v978_v11 = vld [vmem:[%s3515_s24 + $0x1e0] sm:$0xff]  ;;  %v2976_v59 = vpack.i.bf16 %v3918_v18, %v1033_v62  ;;  %v2689_v27 = vpack.c.bf16 %v1067_v58, %v1066_v13  ;;  %vm4295_vm4 = vmand %vm3531_vm2, %vm5096_vm7 }
  0xbd   : > { %v1811_v63 = vadd.f32 %v1810_v7, %v4140_v48  ;;  %2685 = vmatprep.subr.bf16.mxu1 %v5173_v2  ;;  %v5220_v39 = vsel %vm4265_vm13, 4294967295, %v5219_v39  ;;  %v4271_v48 = vadd.s32 224, %v3523_v4  ;;  %v2874_v51 = vpack.i.bf16 %v4053_v38, %v978_v11  ;;  %v980_v7 = vld [vmem:[%s3515_s24 + $0x1f0] sm:$0xff]  ;;  %v1070_v38 = vld [vmem:[%s3501_s25 + $0xc0] sm:$0xff] }
  0xbe   : > { %v1776_v34 = vadd.f32 %v1775_v32, %v4026_v31  ;;  %2975 = vxpose.xlu1.b32.cont [9/16] %v2974_v52, 128  ;;  %2735 = vmatpush1.bf16.msra.mxu0 %v2686_v23  ;;  %v2978_v52 = vpack.i.bf16 %v3959_v47, %v1035_v30  ;;  %v975_v32 = vld [vmem:[%s3515_s24 + $0x1c8] sm:$0xff]  ;;  %vm5099_vm7 = vcmp.eq.s32.totalorder %v4281_v60, %v3674_v49 }
  0xbf   : > { %2871 = vxpose.xlu0.b32.cont [13/16] %v2870_v61, 128  ;;  %v1812_v22 = vadd.f32 %v1811_v63, %v1029_v1  ;;  %2736 = vmatprep.subr.bf16.mxu0 %v5173_v2  ;;  %v1068_v1 = vld [vmem:[%s3501_s25 + $0xb0] sm:$0xff]  ;;  %v1069_v61 = vld [vmem:[%s3501_s25 + $0xb8] sm:$0xff]  ;;  %vm5098_vm13 = vcmp.eq.s32.totalorder %v4271_v48, %v3674_v49  ;;  %v2876_v58 = vpack.i.bf16 %v4080_v5, %v980_v7 }
  0xc0   : > { %v1777_v31 = vadd.f32 %v1776_v34, %v4083_v20  ;;  %2687 = vmatpush1.bf16.msra.mxu1 %v2686_v23  ;;  %v973_v20 = vld [vmem:[%s3515_s24 + $0x1b8] sm:$0xff]  ;;  %v2692_v23 = vpack.c.bf16 %v1069_v61, %v1068_v1  ;;  %vm4318_vm0 = vmand %vm3531_vm2, %vm5098_vm13 }
  0xc1   : > { %v1813_v0 = vadd.f32 %v1812_v22, %v1031_v44  ;;  %2688 = vmatprep.subr.bf16.mxu1 %v5173_v2  ;;  %v1037_v13 = vsel %vm4295_vm4, 0.0, %v973_v20  ;;  %vm4332_vm13 = vmand %vm3531_vm2, %vm5099_vm7  ;;  %v981_v61 = vld [vmem:[%s3515_s24 + $0x1f8] sm:$0xff] }
  0xc2   : > { %v1778_v44 = vadd.f32 %v1777_v31, %v4123_v50  ;;  %2977 = vxpose.xlu1.b32.cont [10/16] %v2976_v59, 128  ;;  %2738 = vmatpush1.bf16.msra.mxu0 %v2689_v27  ;;  %v2980_v22 = vpack.i.bf16 %v3990_v14, %v1037_v13  ;;  %v1073_v31 = vld [vmem:[%s3501_s25 + $0xd8] sm:$0xff]  ;;  %vm2557_vm2 = vmneg %vm3549_vm3 }
  0xc3   : > { %2873 = vxpose.xlu0.b32.cont [14/16] %v2872_v42, 128  ;;  %v1814_v35 = vadd.f32 %v1813_v0, %v1033_v62  ;;  %2739 = vmatprep.subr.bf16.mxu0 %v5173_v2  ;;  %v1071_v62 = vld [vmem:[%s3501_s25 + $0xc8] sm:$0xff]  ;;  %v977_v42 = vld [vmem:[%s3515_s24 + $0x1d8] sm:$0xff]  ;;  %v2698_v20 = vpack.c.bf16 %v1073_v31, %v1072_v8  ;;  %vm2559_vm3 = vmneg %vm3573_vm6 }
  0xc4   : > { %v1779_v63 = vadd.f32 %v1778_v44, %v4171_v3  ;;  %2690 = vmatpush1.bf16.msra.mxu1 %v2689_v27  ;;  %v2695_v5 = vpack.c.bf16 %v1071_v62, %v1070_v38  ;;  %v979_v0 = vld [vmem:[%s3515_s24 + $0x1e8] sm:$0xff]  ;;  %v1041_v14 = vsel %vm4332_vm13, 0.0, %v977_v42  ;;  %v1077_v62 = vld [vmem:[%s3501_s25 + $0xf8] sm:$0xff]  ;;  %v790_v31 = vld [vmem:[%s3513_s7] sm:$0xff] }
  0xc5   : > { %v1815_v50 = vadd.f32 %v1814_v35, %v1035_v30  ;;  %2691 = vmatprep.subr.bf16.mxu1 %v5173_v2  ;;  %v1043_v44 = vsel %vm4163_vm5, 0.0, %v979_v0  ;;  %v1076_v38 = vld [vmem:[%s3501_s25 + $0xf0] sm:$0xff]  ;;  %vm2563_vm6 = vmneg %vm3612_vm10 }
  0xc6   : > { %v1780_v3 = vadd.f32 %v1779_v63, %v4212_v9  ;;  %2979 = vxpose.xlu1.b32.cont [11/16] %v2978_v52, 128  ;;  %2741 = vmatpush1.bf16.msra.mxu0 %v2692_v23  ;;  %v1039_v9 = vsel %vm4318_vm0, 0.0, %v975_v32  ;;  %v1074_v52 = vld [vmem:[%s3501_s25 + $0xe0] sm:$0xff]  ;;  %v2984_v63 = vpack.i.bf16 %v4056_v16, %v1041_v14  ;;  %v2704_v16 = vpack.c.bf16 %v1077_v62, %v1076_v38  ;;  %vm2569_vm10 = vmneg %vm3698_vm9  ;;  %v808_v38 = vld [vmem:[%s3513_s7 + $0x90] sm:$0xff] }
  0xc7   : > { %2875 = vxpose.xlu0.b32.cont [15/16] %v2874_v51, 128  ;;  %v1816_v37 = vadd.f32 %v1815_v50, %v1037_v13  ;;  %2742 = vmatprep.subr.bf16.mxu0 %v5173_v2  ;;  %v5229_v62 = vld [vmem:[#allocation25_spill] sm:$0xff] }
  0xc8   : > { %v1781_v59 = vadd.f32 %v1780_v3, %v4249_v6  ;;  %2693 = vmatpush1.bf16.msra.mxu1 %v2692_v23  ;;  %v2982_v6 = vpack.i.bf16 %v4029_v25, %v1039_v9  ;;  %v1045_v23 = vsel %vm4184_vm1, 0.0, %v981_v61  ;;  %v795_v61 = vld [vmem:[%s3513_s7 + $0x28] sm:$0xff]  ;;  %vm5230_vm9 = vnez %v5229_v62  ;;  %v829_v62 = vld [vmem:[%s3513_s7 + $0x138] sm:$0xff] }
  0xc9   : > { %v1817_v27 = vadd.f32 %v1816_v37, %v1039_v9  ;;  %2694 = vmatprep.subr.bf16.mxu1 %v5173_v2 }
  0xca   : > { %v1782_v30 = vadd.f32 %v1781_v59, %v978_v11  ;;  %2981 = vxpose.xlu1.b32.cont [12/16] %v2980_v22, 128  ;;  %2744 = vmatpush1.bf16.msra.mxu0 %v2695_v5  ;;  %v1075_v11 = vld [vmem:[%s3501_s25 + $0xe8] sm:$0xff]  ;;  %v2986_v22 = vpack.i.bf16 %v4086_v57, %v1043_v44  ;;  %v2988_v57 = vpack.i.bf16 %v4101_v29, %v1045_v23 }
  0xcb   : > { %2877 = vxpose.xlu0.b32.end [16/16] %v2876_v58, 128  ;;  %v1818_v1 = vadd.f32 %v1817_v27, %v1041_v14  ;;  %2745 = vmatprep.subr.bf16.mxu0 %v5173_v2  ;;  %v3128_v58 = vmov 1966171168  }
  0xcc   : > { %v1783_v51 = vadd.f32 %v1782_v30, %v980_v7  ;;  %2696 = vmatpush1.bf16.msra.mxu1 %v2695_v5  ;;  %v2701_v7 = vpack.c.bf16 %v1075_v11, %v1074_v52  ;;  %v1831_v37 = vunpack.c.l.s4 %v3128_v58  ;;  %v793_v30 = vld [vmem:[%s3513_s7 + $0x18] sm:$0xff]  ;;  %v5227_v52 = vlaneseq  ;;  %v796_v11 = vld [vmem:[%s3513_s7 + $0x30] sm:$0xff] }
  0xcd   : > { %v1819_v35 = vadd.f32 %v1818_v1, %v1043_v44  ;;  %2697 = vmatprep.subr.bf16.mxu1 %v5173_v2  ;;  %v794_v44 = vld [vmem:[%s3513_s7 + $0x20] sm:$0xff]  ;;  %v5231_v58 = vld [vmem:[#allocation28_spill] sm:$0xff] }
  0xce   : > { %v1784_v25 = vrot.slane %v1783_v51, 4  ;;  %2983 = vxpose.xlu1.b32.cont [13/16] %v2982_v6, 128  ;;  %2747 = vmatpush1.bf16.msra.mxu0 %v2698_v20  ;;  %v1832_v27 = vunpack.c.0.s8 %v1831_v37  ;;  %vm1848_vm7 = vcmp.lt.s32.totalorder %v5227_v52, 256  ;;  %v813_v37 = vld [vmem:[%s3513_s7 + $0xb8] sm:$0xff] }
  0xcf   : > { %v1820_v32 = vadd.f32 %v1819_v35, %v1045_v23  ;;  %2748 = vmatprep.subr.bf16.mxu0 %v5173_v2  ;;  %v797_v35 = vld [vmem:[%s3513_s7 + $0x38] sm:$0xff]  ;;  %v799_v23 = vld [vmem:[%s3513_s7 + $0x48] sm:$0xff] }
  0xd0   : > { %v1785_v50 = vadd.f32 %v1784_v25, %v1783_v51  ;;  %2699 = vmatpush1.bf16.msra.mxu1 %v2698_v20  ;;  %v1752_v20 = vld [vmem:[#allocation3] sm:$0x3] }
  0xd1   : > { %v1821_v13 = vrot.slane %v1820_v32, 4  ;;  %2700 = vmatprep.subr.bf16.mxu1 %v5173_v2  ;;  %v801_v25 = vld [vmem:[%s3513_s7 + $0x58] sm:$0xff] }
  0xd2   : > { %v1786_v3 = vrot.slane %v1785_v50, 2  ;;  %2985 = vxpose.xlu1.b32.cont [14/16] %v2984_v63, 128  ;;  %2750 = vmatpush1.bf16.msra.mxu0 %v2701_v7  ;;  %v802_v63 = vld [vmem:[%s3513_s7 + $0x60] sm:$0xff] }
  0xd3   : > { %v1822_v42 = vadd.f32 %v1821_v13, %v1820_v32  ;;  %2751 = vmatprep.subr.bf16.mxu0 %v5173_v2  ;;  %v800_v32 = vld [vmem:[%s3513_s7 + $0x50] sm:$0xff] }
  0xd4   : > { %v1787_v9 = vadd.f32 %v1786_v3, %v1785_v50  ;;  %2702 = vmatpush1.bf16.msra.mxu1 %v2701_v7  ;;  %v804_v7 = vld [vmem:[%s3513_s7 + $0x70] sm:$0xff]  ;;  %v806_v50 = vld [vmem:[%s3513_s7 + $0x80] sm:$0xff] }
  0xd5   : > { %v1823_v5 = vrot.slane %v1822_v42, 2  ;;  %2703 = vmatprep.subr.bf16.mxu1 %v5173_v2  ;;  %v1835_v2 = vsub.s32 %v1832_v27, %v3523_v4  ;;  %v810_v3 = vld [vmem:[%s3513_s7 + $0xa0] sm:$0xff]  ;;  %v816_v27 = vld [vmem:[%s3513_s7 + $0xd0] sm:$0xff] }
  0xd6   : > { %v1788_v59 = vrot.slane %v1787_v9, 1  ;;  %2987 = vxpose.xlu1.b32.cont [15/16] %v2986_v22, 128  ;;  %2753 = vmatpush1.bf16.msra.mxu0 %v2704_v16  ;;  %v5233_v22 = vld [vmem:[#allocation32_spill] sm:$0xff] }
  0xd7   : > { %v1824_v8 = vadd.f32 %v1823_v5, %v1822_v42  ;;  %v812_v42 = vld [vmem:[%s3513_s7 + $0xb0] sm:$0xff]  ;;  %v5235_v5 = vld [vmem:[#allocation35_spill] sm:$0xff] }
  0xd8   : > { %v1789_v0 = vadd.f32 %v1788_v59, %v1787_v9  ;;  %2705 = vmatpush1.bf16.msra.mxu1 %v2704_v16  ;;  %v815_v16 = vld [vmem:[%s3513_s7 + $0xc8] sm:$0xff]  ;;  %v814_v9 = vld [vmem:[%s3513_s7 + $0xc0] sm:$0xff]  ;;  %v817_v59 = vld [vmem:[%s3513_s7 + $0xd8] sm:$0xff] }
  0xd9   : > { %v1825_v14 = vrot.slane %v1824_v8, 1  ;;  %2558 = vmatmul.mubr.msk.f32.vlgmr.msra.gmra.mrb[0].mxu0 %vm2557_vm2, %v790_v31  ;;  %vm2561_vm2 = vmneg %vm3587_vm8 }
  0xda   : > { %2989 = vxpose.xlu1.b32.end [16/16] %v2988_v57, 128  ;;  %1532 = vmatprep.mubr.f32.mxu0 %v793_v30  ;;  %vm2565_vm8 = vmneg %vm3637_vm12  ;;  %v819_v57 = vld [vmem:[%s3513_s7 + $0xe8] sm:$0xff]  ;;  %v818_v30 = vld [vmem:[%s3513_s7 + $0xe0] sm:$0xff] }
  0xdb   : > { %v1826_v1 = vadd.f32 %v1825_v14, %v1824_v8  ;;  %vm2571_vm12 = vmneg %vm3737_vm11  ;;  %vm5232_vm11 = vnez %v5231_v58  ;;  %v5237_v8 = vld [vmem:[#allocation37_spill] sm:$0xff] }
  0xdd   : > { %v1829_v29 = vcombine.low %v1789_v0, %v1826_v1  ;;  %2560 = vmatmul.mubr.msk.f32.gmra.mrb[2].mxu0 %vm2559_vm3, %v792_v12  ;;  %vm2567_vm3 = vmneg %vm3666_vm14  ;;  %v821_v1 = vld [vmem:[%s3513_s7 + $0xf8] sm:$0xff] }
  0xde   : > { %1537 = vmatprep.mubr.f32.mxu0 %v795_v61  ;;  %vm2573_vm14 = vmneg %vm3756_vm15  ;;  %vm5234_vm15 = vnez %v5233_v22  ;;  %v828_v22 = vld [vmem:[%s3513_s7 + $0x130] sm:$0xff] }
  0xdf   : > { %v1836_v6 = vrot.slane %v1829_v29, %v1835_v2 }
  0xe1   : > { %v1843_v51 = vrot.slane %v1836_v6, %v1835_v2  ;;  %2562 = vmatmul.mubr.msk.f32.gmra.mrb[4].mxu0 %vm2561_vm2, %v794_v44  ;;  %vm2577_vm2 = vmneg %vm5232_vm11  ;;  %v5239_v2 = vld [vmem:[#allocation39_spill] sm:$0xff]  ;;  %v820_v6 = vld [vmem:[%s3513_s7 + $0xf0] sm:$0xff] }
  0xe2   : > { %1542 = vmatprep.mubr.f32.mxu0 %v797_v35  ;;  %v5243_v44 = vld [vmem:[#allocation27_spill] sm:$0xff] }
  0xe3   : > { %v1845_v19 = vadd.f32 %v1843_v51, %v1752_v20  ;;  %v5241_v20 = vld [vmem:[#allocation41_spill] sm:$0xff]  ;;  %v823_v51 = vld [vmem:[%s3513_s7 + $0x108] sm:$0xff] }
  0xe5   : > { %1850 = vst.msk [vmem:[#allocation3] sm:$0x3] %vm1848_vm7, %v1845_v19  ;;  %2564 = vmatmul.mubr.msk.f32.gmra.mrb[6].mxu0 %vm2563_vm6, %v796_v11  ;;  %vm2575_vm7 = vmneg %vm5230_vm9  ;;  %v822_v11 = vld [vmem:[%s3513_s7 + $0x100] sm:$0xff] }
  0xe6   : > { %1547 = vmatprep.mubr.f32.mxu0 %v799_v23  ;;  %vm2579_vm6 = vmneg %vm5234_vm15  ;;  %v825_v23 = vld [vmem:[%s3513_s7 + $0x118] sm:$0xff] }
  0xe9   : > { %2566 = vmatmul.mubr.msk.f32.gmra.mrb[8].mxu0 %vm2565_vm8, %v798_v21  ;;  %vm5236_vm8 = vnez %v5235_v5  ;;  %v5245_v21 = vld [vmem:[#allocation29_spill] sm:$0xff] }
  0xea   : > { %1552 = vmatprep.mubr.f32.mxu0 %v801_v25 }
  0xed   : > { %2568 = vmatmul.mubr.msk.f32.gmra.mrb[10].mxu0 %vm2567_vm3, %v800_v32  ;;  %vm2581_vm3 = vmneg %vm5236_vm8 }
  0xee   : > { %1557 = vmatprep.mubr.f32.mxu0 %v803_v28 }
  0xf1   : > { %2570 = vmatmul.mubr.msk.f32.gmra.mrb[12].mxu0 %vm2569_vm10, %v802_v63  ;;  %vm5238_vm10 = vnez %v5237_v8  ;;  %v824_v63 = vld [vmem:[%s3513_s7 + $0x110] sm:$0xff] }
  0xf2   : > { %1562 = vmatprep.mubr.f32.mxu0 %v805_v36  ;;  %v827_v36 = vld [vmem:[%s3513_s7 + $0x128] sm:$0xff] }
  0xf5   : > { %2572 = vmatmul.mubr.msk.f32.gmra.mrb[14].mxu0 %vm2571_vm12, %v804_v7  ;;  %vm2583_vm12 = vmneg %vm5238_vm10  ;;  %v5247_v7 = vld [vmem:[#allocation30_spill] sm:$0xff] }
  0xf6   : > { %1567 = vmatprep.mubr.f32.mxu0 %v807_v46 }
  0xf9   : > { %2574 = vmatmul.mubr.msk.f32.gmra.mrb[16].mxu0 %vm2573_vm14, %v806_v50  ;;  %vm5240_vm14 = vnez %v5239_v2 }
  0xfa   : > { %1572 = vmatprep.mubr.f32.mxu0 %v809_v56  ;;  %vm2585_vm9 = vmneg %vm5240_vm14 }
  0xfd   : > { %2576 = vmatmul.mubr.msk.f32.gmra.mrb[18].mxu0 %vm2575_vm7, %v808_v38  ;;  %vm5242_vm7 = vnez %v5241_v20  ;;  %v826_v38 = vld [vmem:[%s3513_s7 + $0x120] sm:$0xff] }
  0xfe   : > { %1577 = vmatprep.mubr.f32.mxu0 %v811_v17  ;;  %vm2587_vm11 = vmneg %vm5242_vm7  ;;  %v5249_v17 = vld [vmem:[#allocation34_spill] sm:$0xff] }
  0xff   : > { %v834_v20 = vld [vmem:[%s3513_s7 + $0x160] sm:$0xff] }
 0x101   : > { %2578 = vmatmul.mubr.msk.f32.gmra.mrb[20].mxu0 %vm2577_vm2, %v810_v3  ;;  %vm5244_vm2 = vnez %v5243_v44  ;;  %v837_v44 = vld [vmem:[%s3513_s7 + $0x178] sm:$0xff] }
 0x102   : > { %1582 = vmatprep.mubr.f32.mxu0 %v813_v37  ;;  %vm2589_vm15 = vmneg %vm5244_vm2 }
 0x105   : > { %2580 = vmatmul.mubr.msk.f32.gmra.mrb[22].mxu0 %vm2579_vm6, %v812_v42  ;;  %vm5246_vm6 = vnez %v5245_v21 }
 0x106   : > { %1587 = vmatprep.mubr.f32.mxu0 %v815_v16  ;;  %vm2591_vm8 = vmneg %vm5246_vm6  ;;  %v831_v16 = vld [vmem:[%s3513_s7 + $0x148] sm:$0xff] }
 0x109   : > { %2582 = vmatmul.mubr.msk.f32.gmra.mrb[24].mxu0 %vm2581_vm3, %v814_v9  ;;  %vm5248_vm3 = vnez %v5247_v7  ;;  %v5251_v9 = vld [vmem:[#allocation38_spill] sm:$0xff] }
 0x10a   : > { %1592 = vmatprep.mubr.f32.mxu0 %v817_v59  ;;  %vm2593_vm10 = vmneg %vm5248_vm3 }
 0x10d   : > { %2584 = vmatmul.mubr.msk.f32.gmra.mrb[26].mxu0 %vm2583_vm12, %v816_v27  ;;  %vm5250_vm12 = vnez %v5249_v17  ;;  %v842_v17 = vld [vmem:[%s3513_s7 + $0x1a0] sm:$0xff] }
 0x10e   : > { %1597 = vmatprep.mubr.f32.mxu0 %v819_v57  ;;  %vm2595_vm14 = vmneg %vm5250_vm12  ;;  %v830_v57 = vld [vmem:[%s3513_s7 + $0x140] sm:$0xff] }
 0x10f   : > { %v2878_v31 = vpop.trf.xlu0 }
 0x110   : > { %v2879_v0 = vunpack.i.l.bf16 %v2878_v31  ;;  %v2882_v14 = vunpack.i.h.bf16 %v2878_v31  ;;  %v833_v31 = vld [vmem:[%s3513_s7 + $0x158] sm:$0xff] }
 0x111   : > { %2586 = vmatmul.mubr.msk.f32.gmra.mrb[28].mxu0 %vm2585_vm9, %v818_v30  ;;  %vm5252_vm9 = vnez %v5251_v9  ;;  %v847_v9 = vld [vmem:[%s3513_s7 + $0x1c8] sm:$0xff] }
 0x112   : > { %1302 = vmatprep.mubr.f32.mxu1 %v2879_v0  ;;  %1602 = vmatprep.mubr.f32.mxu0 %v821_v1  ;;  %vm2597_vm7 = vmneg %vm5252_vm9  ;;  %v832_v1 = vld [vmem:[%s3513_s7 + $0x150] sm:$0xff] }
 0x113   : > { %v2883_v12 = vpop.trf.xlu0  ;;  %1303 = vmatmul.mubr.f32.vlgmr.msra.gmra.mrb[0].mxu1 %v2882_v14 }
 0x114   : > { %v2884_v29 = vunpack.i.l.bf16 %v2883_v12  ;;  %v2887_v61 = vunpack.i.h.bf16 %v2883_v12  ;;  %v835_v12 = vld [vmem:[%s3513_s7 + $0x168] sm:$0xff] }
 0x115   : > { %2588 = vmatmul.mubr.msk.f32.gmra.mrb[30].mxu0 %vm2587_vm11, %v820_v6  ;;  %vm5253_vm11 = vnez %v5203_v40 }
 0x116   : > { %1307 = vmatprep.mubr.f32.mxu1 %v2884_v29  ;;  %2590 = vmatprep.mubr.msk.f32.mxu0 %vm2589_vm15, %v823_v51  ;;  %vm2599_vm2 = vmneg %vm5253_vm11  ;;  %vm5254_vm15 = vnez %v5205_v10 }
 0x117   : > { %v2888_v35 = vpop.trf.xlu0  ;;  %1308 = vmatmul.mubr.f32.gmra.mrb[2].mxu1 %v2887_v61  ;;  %vm2601_vm6 = vmneg %vm5254_vm15 }
 0x118   : > { %v2889_v52 = vunpack.i.l.bf16 %v2888_v35  ;;  %v2892_v19 = vunpack.i.h.bf16 %v2888_v35  ;;  %vm2613_vm15 = vmneg %vm4318_vm0 }
 0x119   : > { %1608 = vmatmul.mubr.f32.gmra.mrb[32].mxu0 %v822_v11  ;;  %v839_v11 = vld [vmem:[%s3513_s7 + $0x188] sm:$0xff]  ;;  %vm2617_vm0 = vmneg %vm4163_vm5 }
 0x11a   : > { %1312 = vmatprep.mubr.f32.mxu1 %v2889_v52  ;;  %2592 = vmatprep.mubr.msk.f32.mxu0 %vm2591_vm8, %v825_v23  ;;  %vm5255_vm8 = vnez %v5209_v24 }
 0x11b   : > { %v2893_v25 = vpop.trf.xlu0  ;;  %1313 = vmatmul.mubr.f32.gmra.mrb[4].mxu1 %v2892_v19  ;;  %vm2603_vm3 = vmneg %vm5255_vm8  ;;  %v836_v19 = vld [vmem:[%s3513_s7 + $0x170] sm:$0xff] }
 0x11c   : > { %v2894_v32 = vunpack.i.l.bf16 %v2893_v25  ;;  %v2897_v28 = vunpack.i.h.bf16 %v2893_v25 }
 0x11d   : > { %1613 = vmatmul.mubr.f32.gmra.mrb[34].mxu0 %v824_v63 }
 0x11e   : > { %1317 = vmatprep.mubr.f32.mxu1 %v2894_v32  ;;  %v4443_v56 = vpop.trf.xlu1  ;;  %2594 = vmatprep.mubr.msk.f32.mxu0 %vm2593_vm10, %v827_v36  ;;  %vm5256_vm10 = vnez %v5216_v43  ;;  %v838_v32 = vld [vmem:[%s3513_s7 + $0x180] sm:$0xff] }
 0x11f   : > { %v2898_v46 = vpop.trf.xlu0  ;;  %1318 = vmatmul.mubr.f32.gmra.mrb[6].mxu1 %v2897_v28  ;;  %vm2605_vm12 = vmneg %vm5256_vm10  ;;  %v841_v28 = vld [vmem:[%s3513_s7 + $0x198] sm:$0xff]  ;;  %v2991_v47 = vunpack.i.l.bf16 %v4443_v56  ;;  %v2994_v34 = vunpack.i.h.bf16 %v4443_v56 }
 0x120   : > { %v2899_v50 = vunpack.i.l.bf16 %v2898_v46  ;;  %v2902_v13 = vunpack.i.h.bf16 %v2898_v46  ;;  %v840_v46 = vld [vmem:[%s3513_s7 + $0x190] sm:$0xff] }
 0x121   : > { %1618 = vmatmul.mubr.f32.gmra.mrb[36].mxu0 %v826_v38 }
 0x122   : > { %1322 = vmatprep.mubr.f32.mxu1 %v2899_v50  ;;  %v4449_v42 = vpop.trf.xlu1  ;;  %2596 = vmatprep.mubr.msk.f32.mxu0 %vm2595_vm14, %v829_v62  ;;  %vm5257_vm14 = vnez %v5218_v41  ;;  %v843_v50 = vld [vmem:[%s3513_s7 + $0x1a8] sm:$0xff] }
 0x123   : > { %v2903_v3 = vpop.trf.xlu0  ;;  %1323 = vmatmul.mubr.f32.gmra.mrb[8].mxu1 %v2902_v13  ;;  %vm2607_vm9 = vmneg %vm5257_vm14  ;;  %v2999_v55 = vunpack.i.h.bf16 %v4449_v42 }
 0x124   : > { %v2904_v58 = vunpack.i.l.bf16 %v2903_v3  ;;  %v2907_v37 = vunpack.i.h.bf16 %v2903_v3  ;;  %v845_v3 = vld [vmem:[%s3513_s7 + $0x1b8] sm:$0xff] }
 0x125   : > { %1623 = vmatmul.mubr.f32.gmra.mrb[38].mxu0 %v828_v22 }
 0x126   : > { %1327 = vmatprep.mubr.f32.mxu1 %v2904_v58  ;;  %v4455_v8 = vpop.trf.xlu1  ;;  %2598 = vmatprep.mubr.msk.f32.mxu0 %vm2597_vm7, %v831_v16  ;;  %vm5258_vm7 = vnez %v5220_v39  ;;  %v844_v16 = vld [vmem:[%s3513_s7 + $0x1b0] sm:$0xff] }
 0x127   : > { %v2908_v5 = vpop.trf.xlu0  ;;  %1328 = vmatmul.mubr.f32.gmra.mrb[10].mxu1 %v2907_v37  ;;  %vm2609_vm11 = vmneg %vm5258_vm7 }
 0x128   : > { %v2909_v59 = vunpack.i.l.bf16 %v2908_v5  ;;  %v2912_v27 = vunpack.i.h.bf16 %v2908_v5 }
 0x129   : > { %1628 = vmatmul.mubr.f32.gmra.mrb[40].mxu0 %v830_v57  ;;  %v846_v57 = vld [vmem:[%s3513_s7 + $0x1c0] sm:$0xff] }
 0x12a   : > { %1332 = vmatprep.mubr.f32.mxu1 %v2909_v59  ;;  %v4461_v2 = vpop.trf.xlu1  ;;  %2600 = vmatprep.mubr.msk.f32.mxu0 %vm2599_vm2, %v833_v31  ;;  %vm2611_vm2 = vmneg %vm4295_vm4  ;;  %v849_v31 = vld [vmem:[%s3513_s7 + $0x1d8] sm:$0xff] }
 0x12b   : > { %v2913_v0 = vpop.trf.xlu0  ;;  %1333 = vmatmul.mubr.f32.gmra.mrb[12].mxu1 %v2912_v27  ;;  %vm2615_vm4 = vmneg %vm4332_vm13  ;;  %v3009_v26 = vunpack.i.h.bf16 %v4461_v2 }
 0x12c   : > { %v2914_v14 = vunpack.i.l.bf16 %v2913_v0  ;;  %v2917_v30 = vunpack.i.h.bf16 %v2913_v0  ;;  %vm2619_vm13 = vmneg %vm4184_vm1 }
 0x12d   : > { %1633 = vmatmul.mubr.f32.gmra.mrb[42].mxu0 %v832_v1 }
 0x12e   : > { %1337 = vmatprep.mubr.f32.mxu1 %v2914_v14  ;;  %v4467_v6 = vpop.trf.xlu1  ;;  %2602 = vmatprep.mubr.msk.f32.mxu0 %vm2601_vm6, %v835_v12  ;;  %v848_v12 = vld [vmem:[%s3513_s7 + $0x1d0] sm:$0xff] }
 0x12f   : > { %v2918_v29 = vpop.trf.xlu0  ;;  %1338 = vmatmul.mubr.f32.gmra.mrb[14].mxu1 %v2917_v30 }
 0x130   : > { %v2919_v40 = vunpack.i.l.bf16 %v2918_v29  ;;  %v2922_v61 = vunpack.i.h.bf16 %v2918_v29  ;;  %v851_v29 = vld [vmem:[%s3513_s7 + $0x1e8] sm:$0xff] }
 0x131   : > { %1638 = vmatmul.mubr.f32.gmra.mrb[44].mxu0 %v834_v20  ;;  %v850_v20 = vld [vmem:[%s3513_s7 + $0x1e0] sm:$0xff] }
 0x132   : > { %1342 = vmatprep.mubr.f32.mxu1 %v2919_v40  ;;  %v4473_v52 = vpop.trf.xlu1  ;;  %2604 = vmatprep.mubr.msk.f32.mxu0 %vm2603_vm3, %v837_v44  ;;  %v2996_v40 = vunpack.i.l.bf16 %v4449_v42  ;;  %v853_v44 = vld [vmem:[%s3513_s7 + $0x1f8] sm:$0xff]  ;;  %v3011_v42 = vunpack.i.l.bf16 %v4467_v6 }
 0x133   : > { %v2923_v51 = vpop.trf.xlu0  ;;  %1343 = vmatmul.mubr.f32.gmra.mrb[16].mxu1 %v2922_v61 }
 0x134   : > { %v2924_v10 = vunpack.i.l.bf16 %v2923_v51  ;;  %v2927_v35 = vunpack.i.h.bf16 %v2923_v51  ;;  %v3001_v51 = vunpack.i.l.bf16 %v4455_v8 }
 0x135   : > { %1643 = vmatmul.mubr.f32.gmra.mrb[46].mxu0 %v836_v19  ;;  %v3006_v19 = vunpack.i.l.bf16 %v4461_v2 }
 0x136   : > { %1347 = vmatprep.mubr.f32.mxu1 %v2924_v10  ;;  %v4479_v25 = vpop.trf.xlu1  ;;  %2606 = vmatprep.mubr.msk.f32.mxu0 %vm2605_vm12, %v839_v11  ;;  %v852_v10 = vld [vmem:[%s3513_s7 + $0x1f0] sm:$0xff] }
 0x137   : > { %v2928_v23 = vpop.trf.xlu0  ;;  %1348 = vmatmul.mubr.f32.gmra.mrb[18].mxu1 %v2927_v35  ;;  %v3004_v35 = vunpack.i.h.bf16 %v4455_v8  ;;  %v3019_v8 = vunpack.i.h.bf16 %v4473_v52 }
 0x138   : > { %v2929_v24 = vunpack.i.l.bf16 %v2928_v23  ;;  %v2932_v21 = vunpack.i.h.bf16 %v2928_v23 }
 0x139   : > { %1648 = vmatmul.mubr.f32.gmra.mrb[48].mxu0 %v838_v32  ;;  %v3021_v32 = vunpack.i.l.bf16 %v4479_v25 }
 0x13a   : > { %1352 = vmatprep.mubr.f32.mxu1 %v2929_v24  ;;  %v4485_v7 = vpop.trf.xlu1  ;;  %2608 = vmatprep.mubr.msk.f32.mxu0 %vm2607_vm9, %v841_v28  ;;  %v3014_v24 = vunpack.i.h.bf16 %v4467_v6  ;;  %v3024_v28 = vunpack.i.h.bf16 %v4479_v25 }
 0x13b   : > { %v2933_v63 = vpop.trf.xlu0  ;;  %1353 = vmatmul.mubr.f32.gmra.mrb[20].mxu1 %v2932_v21  ;;  %v3016_v21 = vunpack.i.l.bf16 %v4473_v52  ;;  %v3026_v2 = vunpack.i.l.bf16 %v4485_v7 }
 0x13c   : > { %v2934_v43 = vunpack.i.l.bf16 %v2933_v63  ;;  %v2937_v36 = vunpack.i.h.bf16 %v2933_v63  ;;  %v3029_v63 = vunpack.i.h.bf16 %v4485_v7 }
 0x13d   : > { %1653 = vmatmul.mubr.f32.gmra.mrb[50].mxu0 %v840_v46 }
 0x13e   : > { %1357 = vmatprep.mubr.f32.mxu1 %v2934_v43  ;;  %v4491_v62 = vpop.trf.xlu1  ;;  %2610 = vmatprep.mubr.msk.f32.mxu0 %vm2609_vm11, %v843_v50 }
 0x13f   : > { %v2938_v13 = vpop.trf.xlu0  ;;  %1358 = vmatmul.mubr.f32.gmra.mrb[22].mxu1 %v2937_v36  ;;  %v3031_v6 = vunpack.i.l.bf16 %v4491_v62  ;;  %v3034_v43 = vunpack.i.h.bf16 %v4491_v62 }
 0x140   : > { %v2939_v41 = vunpack.i.l.bf16 %v2938_v13  ;;  %v2942_v38 = vunpack.i.h.bf16 %v2938_v13 }
 0x141   : > { %1658 = vmatmul.mubr.f32.gmra.mrb[52].mxu0 %v842_v17 }
 0x142   : > { %1362 = vmatprep.mubr.f32.mxu1 %v2939_v41  ;;  %v4497_v22 = vpop.trf.xlu1  ;;  %2612 = vmatprep.mubr.msk.f32.mxu0 %vm2611_vm2, %v845_v3 }
 0x143   : > { %v2943_v58 = vpop.trf.xlu0  ;;  %1363 = vmatmul.mubr.f32.gmra.mrb[24].mxu1 %v2942_v38  ;;  %v3036_v52 = vunpack.i.l.bf16 %v4497_v22  ;;  %v3039_v36 = vunpack.i.h.bf16 %v4497_v22 }
 0x144   : > { %v2944_v39 = vunpack.i.l.bf16 %v2943_v58  ;;  %v2947_v37 = vunpack.i.h.bf16 %v2943_v58 }
 0x145   : > { %1663 = vmatmul.mubr.f32.gmra.mrb[54].mxu0 %v844_v16 }
 0x146   : > { %1367 = vmatprep.mubr.f32.mxu1 %v2944_v39  ;;  %v4503_v27 = vpop.trf.xlu1  ;;  %2614 = vmatprep.mubr.msk.f32.mxu0 %vm2613_vm15, %v847_v9 }
 0x147   : > { %v2948_v5 = vpop.trf.xlu0  ;;  %1368 = vmatmul.mubr.f32.gmra.mrb[26].mxu1 %v2947_v37  ;;  %v3041_v25 = vunpack.i.l.bf16 %v4503_v27  ;;  %v3044_v46 = vunpack.i.h.bf16 %v4503_v27 }
 0x148   : > { %v2949_v18 = vunpack.i.l.bf16 %v2948_v5  ;;  %v2952_v59 = vunpack.i.h.bf16 %v2948_v5 }
 0x149   : > { %1668 = vmatmul.mubr.f32.gmra.mrb[56].mxu0 %v846_v57 }
 0x14a   : > { %1372 = vmatprep.mubr.f32.mxu1 %v2949_v18  ;;  %v4510_v1 = vpop.trf.xlu1  ;;  %2616 = vmatprep.mubr.msk.f32.mxu0 %vm2615_vm4, %v849_v31 }
 0x14b   : > { %v2953_v0 = vpop.trf.xlu0  ;;  %1373 = vmatmul.mubr.f32.gmra.mrb[28].mxu1 %v2952_v59  ;;  %v3046_v7 = vunpack.i.l.bf16 %v4510_v1  ;;  %v3049_v50 = vunpack.i.h.bf16 %v4510_v1 }
 0x14c   : > { %v2957_v14 = vunpack.i.h.bf16 %v2953_v0  ;;  %v2954_v30 = vunpack.i.l.bf16 %v2953_v0 }
 0x14d   : > { %1673 = vmatmul.mubr.f32.gmra.mrb[58].mxu0 %v848_v12 }
 0x14e   : > { %1377 = vmatprep.mubr.f32.mxu1 %v2954_v30  ;;  %v3050_v61 = vpop.trf.xlu1  ;;  %2618 = vmatprep.mubr.msk.f32.mxu0 %vm2617_vm0, %v851_v29 }
 0x14f   : > { %1378 = vmatmul.mubr.f32.gmra.mrb[30].mxu1 %v2957_v14  ;;  %v3051_v13 = vunpack.i.l.bf16 %v3050_v61  ;;  %v3054_v41 = vunpack.i.h.bf16 %v3050_v61 }
 0x150   : > { %1382 = vmatprep.mubr.f32.mxu1 %v2991_v47 }
 0x151   : > { %1678 = vmatmul.mubr.f32.gmra.mrb[60].mxu0 %v850_v20 }
 0x152   : > { %v3055_v56 = vpop.trf.xlu1  ;;  %2620 = vmatprep.mubr.msk.f32.mxu0 %vm2619_vm13, %v853_v44 }
 0x153   : > { %1383 = vmatmul.mubr.f32.gmra.mrb[32].mxu1 %v2994_v34  ;;  %v3056_v38 = vunpack.i.l.bf16 %v3055_v56  ;;  %v3059_v62 = vunpack.i.h.bf16 %v3055_v56 }
 0x154   : > { %1387 = vmatprep.mubr.f32.mxu1 %v2996_v40 }
 0x155   : > { %1683 = vmatmul.mubr.f32.gmra.mrb[62].mxu0 %v852_v10 }
 0x156   : > { %v3060_v11 = vpop.trf.xlu1 }
 0x157   : > { %1388 = vmatmul.mubr.f32.gmra.mrb[34].mxu1 %v2999_v55  ;;  %v3061_v17 = vunpack.i.l.bf16 %v3060_v11  ;;  %v3064_v3 = vunpack.i.h.bf16 %v3060_v11  ;;  %v1078_v11 = vld [vmem:[#allocation2] sm:$0xff] }
 0x158   : > { %1392 = vmatprep.mubr.f32.mxu1 %v3001_v51 }
 0x15a   : > { %v3065_v23 = vpop.trf.xlu1 }
 0x15b   : > { %1393 = vmatmul.mubr.f32.gmra.mrb[36].mxu1 %v3004_v35  ;;  %v3066_v58 = vunpack.i.l.bf16 %v3065_v23  ;;  %v3069_v39 = vunpack.i.h.bf16 %v3065_v23 }
 0x15c   : > { %1397 = vmatprep.mubr.f32.mxu1 %v3006_v19 }
 0x15f   : > { %1398 = vmatmul.mubr.f32.gmra.mrb[38].mxu1 %v3009_v26 }
 0x160   : > { %1402 = vmatprep.mubr.f32.mxu1 %v3011_v42 }
 0x163   : > { %1403 = vmatmul.mubr.f32.gmra.mrb[40].mxu1 %v3014_v24 }
 0x164   : > { %1407 = vmatprep.mubr.f32.mxu1 %v3016_v21 }
 0x167   : > { %1408 = vmatmul.mubr.f32.gmra.mrb[42].mxu1 %v3019_v8 }
 0x168   : > { %1412 = vmatprep.mubr.f32.mxu1 %v3021_v32  ;;  %v1079_v32 = vld [vmem:[#allocation2 + $0x8] sm:$0xff] }
 0x16b   : > { %1413 = vmatmul.mubr.f32.gmra.mrb[44].mxu1 %v3024_v28 }
 0x16c   : > { %1417 = vmatprep.mubr.f32.mxu1 %v3026_v2 }
 0x16f   : > { %1418 = vmatmul.mubr.f32.gmra.mrb[46].mxu1 %v3029_v63 }
 0x170   : > { %1422 = vmatprep.mubr.f32.mxu1 %v3031_v6 }
 0x173   : > { %1423 = vmatmul.mubr.f32.gmra.mrb[48].mxu1 %v3034_v43 }
 0x174   : > { %1427 = vmatprep.mubr.f32.mxu1 %v3036_v52 }
 0x177   : > { %1428 = vmatmul.mubr.f32.gmra.mrb[50].mxu1 %v3039_v36  ;;  %v1080_v36 = vld [vmem:[#allocation2 + $0x10] sm:$0xff] }
 0x178   : > { %1432 = vmatprep.mubr.f32.mxu1 %v3041_v25 }
 0x17b   : > { %1433 = vmatmul.mubr.f32.gmra.mrb[52].mxu1 %v3044_v46 }
 0x17c   : > { %1437 = vmatprep.mubr.f32.mxu1 %v3046_v7 }
 0x17f   : > { %1438 = vmatmul.mubr.f32.gmra.mrb[54].mxu1 %v3049_v50 }
 0x180   : > { %1442 = vmatprep.mubr.f32.mxu1 %v3051_v13 }
 0x183   : > { %1443 = vmatmul.mubr.f32.gmra.mrb[56].mxu1 %v3054_v41 }
 0x184   : > { %1447 = vmatprep.mubr.f32.mxu1 %v3056_v38  ;;  %v1081_v38 = vld [vmem:[#allocation2 + $0x18] sm:$0xff] }
 0x187   : > { %1448 = vmatmul.mubr.f32.gmra.mrb[58].mxu1 %v3059_v62 }
 0x188   : > { %1452 = vmatprep.mubr.f32.mxu1 %v3061_v17 }
 0x18b   : > { %1453 = vmatmul.mubr.f32.gmra.mrb[60].mxu1 %v3064_v3 }
 0x18c   : > { %1457 = vmatprep.mubr.f32.mxu1 %v3066_v58 }
 0x18f   : > { %1458 = vmatmul.mubr.f32.gmra.mrb[62].mxu1 %v3069_v39 }
 0x1ac   : > { %v1529_v37 = vpop.f32.mrb[0].mxu0 }
 0x1ad   : > { %v1531_v22 = vpop.f32.mrb[1].mxu0 }
 0x1ae   : > { %v1082_v22 = vld [vmem:[#allocation2 + $0x20] sm:$0xff] }
 0x1b0   : > { %v1534_v16 = vpop.f32.mrb[2].mxu0 }
 0x1b1   : > { %v1536_v9 = vpop.f32.mrb[3].mxu0 }
 0x1b4   : > { %v1539_v5 = vpop.f32.mrb[4].mxu0 }
 0x1b5   : > { %v1541_v18 = vpop.f32.mrb[5].mxu0 }
 0x1b8   : > { %v1544_v59 = vpop.f32.mrb[6].mxu0 }
 0x1b9   : > { %v1546_v27 = vpop.f32.mrb[7].mxu0 }
 0x1bc   : > { %v1549_v57 = vpop.f32.mrb[8].mxu0 }
 0x1bd   : > { %v1551_v31 = vpop.f32.mrb[9].mxu0 }
 0x1c0   : > { %v1554_v0 = vpop.f32.mrb[10].mxu0 }
 0x1c1   : > { %v1556_v47 = vpop.f32.mrb[11].mxu0 }
 0x1c2   : > { %v1083_v47 = vld [vmem:[#allocation2 + $0x28] sm:$0xff] }
 0x1c4   : > { %v4544_v14 = vpop.f32.mrb[12].mxu0 }
 0x1c5   : > { %v1561_v30 = vpop.f32.mrb[13].mxu0 }
 0x1c8   : > { %v4546_v1 = vpop.f32.mrb[14].mxu0 }
 0x1c9   : > { %v1566_v12 = vpop.f32.mrb[15].mxu0 }
 0x1cc   : > { %v4548_v29 = vpop.f32.mrb[16].mxu0 }
 0x1cd   : > { %v1571_v34 = vpop.f32.mrb[17].mxu0 }
 0x1d0   : > { %v4550_v40 = vpop.f32.mrb[18].mxu0 }
 0x1d1   : > { %v1576_v61 = vpop.f32.mrb[19].mxu0 }
 0x1d4   : > { %v4552_v20 = vpop.f32.mrb[20].mxu0 }
 0x1d5   : > { %v1581_v44 = vpop.f32.mrb[21].mxu0 }
 0x1d8   : > { %v4554_v55 = vpop.f32.mrb[22].mxu0 }
 0x1d9   : > { %v1586_v51 = vpop.f32.mrb[23].mxu0 }
 0x1da   : > { %v1084_v51 = vld [vmem:[#allocation2 + $0x30] sm:$0xff] }
 0x1dc   : > { %v4556_v56 = vpop.f32.mrb[24].mxu0 }
 0x1dd   : > { %v1591_v10 = vpop.f32.mrb[25].mxu0 }
 0x1e0   : > { %v4558_v35 = vpop.f32.mrb[26].mxu0 }
 0x1e1   : > { %v1596_v19 = vpop.f32.mrb[27].mxu0 }
 0x1e4   : > { %v4560_v42 = vpop.f32.mrb[28].mxu0 }
 0x1e5   : > { %v1601_v21 = vpop.f32.mrb[29].mxu0 }
 0x1e6   : > { %v1304_v26 = vpop.f32.mrb[0].mxu1 }
 0x1e7   : > { %v1530_v23 = vadd.f32 %v1529_v37, %v1304_v26  ;;  %v1306_v24 = vpop.f32.mrb[1].mxu1 }
 0x1e8   : > { %v4562_v2 = vpop.f32.mrb[30].mxu0  ;;  %v1085_v24 = vld [vmem:[#allocation2 + $0x38] sm:$0xff] }
 0x1e9   : > { %v1688_v8 = vsub.f32 %v1078_v11, %v1530_v23  ;;  %v1606_v43 = vpop.f32.mrb[31].mxu0 }
 0x1ea   : > { %v1309_v28 = vpop.f32.mrb[2].mxu1 }
 0x1eb   : > { %1720 = vst [vmem:[#allocation2] sm:$0xff] %v1688_v8  ;;  %v1535_v63 = vadd.f32 %v1534_v16, %v1309_v28  ;;  %v1311_v6 = vpop.f32.mrb[3].mxu1 }
 0x1ec   : > { %v4564_v46 = vpop.f32.mrb[32].mxu0  ;;  %v1086_v6 = vld [vmem:[#allocation2 + $0x40] sm:$0xff] }
 0x1ed   : > { %v1689_v52 = vsub.f32 %v1079_v32, %v1535_v63  ;;  %v1611_v13 = vpop.f32.mrb[33].mxu0 }
 0x1ee   : > { %v1314_v25 = vpop.f32.mrb[4].mxu1 }
 0x1ef   : > { %1721 = vst [vmem:[#allocation2 + $0x8] sm:$0xff] %v1689_v52  ;;  %v1540_v7 = vadd.f32 %v1539_v5, %v1314_v25  ;;  %v1316_v50 = vpop.f32.mrb[5].mxu1 }
 0x1f0   : > { %v4566_v17 = vpop.f32.mrb[34].mxu0  ;;  %v1087_v50 = vld [vmem:[#allocation2 + $0x48] sm:$0xff] }
 0x1f1   : > { %v1690_v41 = vsub.f32 %v1080_v36, %v1540_v7  ;;  %v1616_v39 = vpop.f32.mrb[35].mxu0 }
 0x1f2   : > { %v1319_v62 = vpop.f32.mrb[6].mxu1 }
 0x1f3   : > { %1722 = vst [vmem:[#allocation2 + $0x10] sm:$0xff] %v1690_v41  ;;  %v1545_v3 = vadd.f32 %v1544_v59, %v1319_v62  ;;  %v1321_v58 = vpop.f32.mrb[7].mxu1 }
 0x1f4   : > { %v4568_v9 = vpop.f32.mrb[36].mxu0  ;;  %v1088_v58 = vld [vmem:[#allocation2 + $0x50] sm:$0xff] }
 0x1f5   : > { %v1691_v37 = vsub.f32 %v1081_v38, %v1545_v3  ;;  %v1621_v5 = vpop.f32.mrb[37].mxu0 }
 0x1f6   : > { %v1324_v16 = vpop.f32.mrb[8].mxu1 }
 0x1f7   : > { %1723 = vst [vmem:[#allocation2 + $0x18] sm:$0xff] %v1691_v37  ;;  %v1550_v18 = vadd.f32 %v1549_v57, %v1324_v16  ;;  %v1326_v27 = vpop.f32.mrb[9].mxu1 }
 0x1f8   : > { %v4570_v12 = vpop.f32.mrb[38].mxu0  ;;  %v1089_v27 = vld [vmem:[#allocation2 + $0x58] sm:$0xff] }
 0x1f9   : > { %v1692_v31 = vsub.f32 %v1082_v22, %v1550_v18  ;;  %v1626_v59 = vpop.f32.mrb[39].mxu0 }
 0x1fa   : > { %v1329_v30 = vpop.f32.mrb[10].mxu1 }
 0x1fb   : > { %1724 = vst [vmem:[#allocation2 + $0x20] sm:$0xff] %v1692_v31  ;;  %v1555_v34 = vadd.f32 %v1554_v0, %v1329_v30  ;;  %v1331_v61 = vpop.f32.mrb[11].mxu1 }
 0x1fc   : > { %v4572_v19 = vpop.f32.mrb[40].mxu0  ;;  %v1090_v61 = vld [vmem:[#allocation2 + $0x60] sm:$0xff] }
 0x1fd   : > { %v1693_v44 = vsub.f32 %v1083_v47, %v1555_v34  ;;  %v1631_v26 = vpop.f32.mrb[41].mxu0 }
 0x1fe   : > { %v1334_v10 = vpop.f32.mrb[12].mxu1 }
 0x1ff   : > { %1725 = vst [vmem:[#allocation2 + $0x28] sm:$0xff] %v1693_v44  ;;  %v1560_v11 = vadd.f32 %v4544_v14, %v1334_v10  ;;  %v1336_v57 = vpop.f32.mrb[13].mxu1 }
 0x200   : > { %v4575_v8 = vpop.f32.mrb[42].mxu0  ;;  %v1091_v57 = vld [vmem:[#allocation2 + $0x68] sm:$0xff] }
 0x201   : > { %v1694_v23 = vsub.f32 %v1084_v51, %v1560_v11  ;;  %v1636_v28 = vpop.f32.mrb[43].mxu0 }
 0x202   : > { %v1339_v21 = vpop.f32.mrb[14].mxu1 }
 0x203   : > { %1726 = vst [vmem:[#allocation2 + $0x30] sm:$0xff] %v1694_v23  ;;  %v1565_v0 = vadd.f32 %v4546_v1, %v1339_v21  ;;  %v1341_v32 = vpop.f32.mrb[15].mxu1 }
 0x204   : > { %v4578_v52 = vpop.f32.mrb[44].mxu0  ;;  %v1092_v32 = vld [vmem:[#allocation2 + $0x70] sm:$0xff] }
 0x205   : > { %v1695_v63 = vsub.f32 %v1085_v24, %v1565_v0  ;;  %v1641_v25 = vpop.f32.mrb[45].mxu0 }
 0x206   : > { %v1344_v43 = vpop.f32.mrb[16].mxu1 }
 0x207   : > { %1727 = vst [vmem:[#allocation2 + $0x38] sm:$0xff] %v1695_v63  ;;  %v1570_v14 = vadd.f32 %v4548_v29, %v1344_v43  ;;  %v1346_v36 = vpop.f32.mrb[17].mxu1 }
 0x208   : > { %v4581_v41 = vpop.f32.mrb[46].mxu0  ;;  %v1093_v36 = vld [vmem:[#allocation2 + $0x78] sm:$0xff] }
 0x209   : > { %v1696_v7 = vsub.f32 %v1086_v6, %v1570_v14  ;;  %v1646_v62 = vpop.f32.mrb[47].mxu0 }
 0x20a   : > { %v1349_v13 = vpop.f32.mrb[18].mxu1 }
 0x20b   : > { %1728 = vst [vmem:[#allocation2 + $0x40] sm:$0xff] %v1696_v7  ;;  %v1575_v1 = vadd.f32 %v4550_v40, %v1349_v13  ;;  %v1351_v38 = vpop.f32.mrb[19].mxu1 }
 0x20c   : > { %v4584_v37 = vpop.f32.mrb[48].mxu0  ;;  %v1094_v38 = vld [vmem:[#allocation2 + $0x80] sm:$0xff] }
 0x20d   : > { %v1697_v3 = vsub.f32 %v1087_v50, %v1575_v1  ;;  %v1651_v16 = vpop.f32.mrb[49].mxu0 }
 0x20e   : > { %v1354_v39 = vpop.f32.mrb[20].mxu1 }
 0x20f   : > { %1729 = vst [vmem:[#allocation2 + $0x48] sm:$0xff] %v1697_v3  ;;  %v1580_v29 = vadd.f32 %v4552_v20, %v1354_v39  ;;  %v1356_v22 = vpop.f32.mrb[21].mxu1 }
 0x210   : > { %v4587_v31 = vpop.f32.mrb[50].mxu0  ;;  %v1095_v22 = vld [vmem:[#allocation2 + $0x88] sm:$0xff] }
 0x211   : > { %v1698_v18 = vsub.f32 %v1088_v58, %v1580_v29  ;;  %v1656_v30 = vpop.f32.mrb[51].mxu0 }
 0x212   : > { %v1359_v5 = vpop.f32.mrb[22].mxu1 }
 0x213   : > { %1730 = vst [vmem:[#allocation2 + $0x50] sm:$0xff] %v1698_v18  ;;  %v1585_v40 = vadd.f32 %v4554_v55, %v1359_v5  ;;  %v1361_v47 = vpop.f32.mrb[23].mxu1 }
 0x214   : > { %v4590_v44 = vpop.f32.mrb[52].mxu0  ;;  %v1096_v47 = vld [vmem:[#allocation2 + $0x90] sm:$0xff] }
 0x215   : > { %v1699_v34 = vsub.f32 %v1089_v27, %v1585_v40  ;;  %v1661_v10 = vpop.f32.mrb[53].mxu0 }
 0x216   : > { %v1364_v59 = vpop.f32.mrb[24].mxu1 }
 0x217   : > { %1731 = vst [vmem:[#allocation2 + $0x58] sm:$0xff] %v1699_v34  ;;  %v1590_v20 = vadd.f32 %v4556_v56, %v1364_v59  ;;  %v1366_v51 = vpop.f32.mrb[25].mxu1  ;;  %v1097_v59 = vld [vmem:[#allocation2 + $0x98] sm:$0xff] }
 0x218   : > { %v4593_v23 = vpop.f32.mrb[54].mxu0 }
 0x219   : > { %v1700_v11 = vsub.f32 %v1090_v61, %v1590_v20  ;;  %v1666_v21 = vpop.f32.mrb[55].mxu0 }
 0x21a   : > { %v1369_v26 = vpop.f32.mrb[26].mxu1  ;;  %v1099_v21 = vld [vmem:[#allocation2 + $0xa8] sm:$0xff] }
 0x21b   : > { %1732 = vst [vmem:[#allocation2 + $0x60] sm:$0xff] %v1700_v11  ;;  %v1595_v55 = vadd.f32 %v4558_v35, %v1369_v26  ;;  %v1371_v24 = vpop.f32.mrb[27].mxu1 }
 0x21c   : > { %v4596_v63 = vpop.f32.mrb[56].mxu0 }
 0x21d   : > { %v1701_v0 = vsub.f32 %v1091_v57, %v1595_v55  ;;  %v1671_v43 = vpop.f32.mrb[57].mxu0  ;;  %v1098_v57 = vld [vmem:[#allocation2 + $0xa0] sm:$0xff] }
 0x21e   : > { %v1374_v28 = vpop.f32.mrb[28].mxu1 }
 0x21f   : > { %1733 = vst [vmem:[#allocation2 + $0x68] sm:$0xff] %v1701_v0  ;;  %v1600_v56 = vadd.f32 %v4560_v42, %v1374_v28  ;;  %v1376_v6 = vpop.f32.mrb[29].mxu1 }
 0x220   : > { %v4599_v7 = vpop.f32.mrb[58].mxu0 }
 0x221   : > { %v1702_v14 = vsub.f32 %v1092_v32, %v1600_v56  ;;  %v1676_v13 = vpop.f32.mrb[59].mxu0  ;;  %v1100_v56 = vld [vmem:[#allocation2 + $0xb0] sm:$0xff] }
 0x222   : > { %v1379_v25 = vpop.f32.mrb[30].mxu1  ;;  %v1102_v13 = vld [vmem:[#allocation2 + $0xc0] sm:$0xff] }
 0x223   : > { %1734 = vst [vmem:[#allocation2 + $0x70] sm:$0xff] %v1702_v14  ;;  %v1605_v35 = vadd.f32 %v4562_v2, %v1379_v25  ;;  %v1381_v50 = vpop.f32.mrb[31].mxu1 }
 0x224   : > { %v4602_v3 = vpop.f32.mrb[60].mxu0 }
 0x225   : > { %v1703_v1 = vsub.f32 %v1093_v36, %v1605_v35  ;;  %v1681_v39 = vpop.f32.mrb[61].mxu0  ;;  %v1101_v36 = vld [vmem:[#allocation2 + $0xb8] sm:$0xff] }
 0x226   : > { %v1384_v62 = vpop.f32.mrb[32].mxu1 }
 0x227   : > { %1735 = vst [vmem:[#allocation2 + $0x78] sm:$0xff] %v1703_v1  ;;  %v1610_v42 = vadd.f32 %v4564_v46, %v1384_v62  ;;  %v1386_v58 = vpop.f32.mrb[33].mxu1 }
 0x228   : > { %v4605_v18 = vpop.f32.mrb[62].mxu0 }
 0x229   : > { %v1704_v29 = vsub.f32 %v1094_v38, %v1610_v42  ;;  %v1686_v5 = vpop.f32.mrb[63].mxu0  ;;  %v1103_v42 = vld [vmem:[#allocation2 + $0xc8] sm:$0xff] }
 0x22a   : > { %v1389_v16 = vpop.f32.mrb[34].mxu1  ;;  %v1105_v5 = vld [vmem:[#allocation2 + $0xd8] sm:$0xff] }
 0x22b   : > { %1736 = vst [vmem:[#allocation2 + $0x80] sm:$0xff] %v1704_v29  ;;  %v1615_v2 = vadd.f32 %v4566_v17, %v1389_v16  ;;  %v1391_v27 = vpop.f32.mrb[35].mxu1 }
 0x22d   : > { %v1705_v40 = vsub.f32 %v1095_v22, %v1615_v2  ;;  %v1104_v22 = vld [vmem:[#allocation2 + $0xd0] sm:$0xff] }
 0x22e   : > { %v1394_v30 = vpop.f32.mrb[36].mxu1 }
 0x22f   : > { %1737 = vst [vmem:[#allocation2 + $0x88] sm:$0xff] %v1705_v40  ;;  %v1620_v34 = vadd.f32 %v4568_v9, %v1394_v30  ;;  %v1396_v61 = vpop.f32.mrb[37].mxu1 }
 0x231   : > { %v1706_v46 = vsub.f32 %v1096_v47, %v1620_v34  ;;  %v1106_v34 = vld [vmem:[#allocation2 + $0xe0] sm:$0xff] }
 0x232   : > { %v1399_v20 = vpop.f32.mrb[38].mxu1 }
 0x233   : > { %1738 = vst [vmem:[#allocation2 + $0x90] sm:$0xff] %v1706_v46  ;;  %v1625_v51 = vadd.f32 %v4570_v12, %v1399_v20  ;;  %v1401_v10 = vpop.f32.mrb[39].mxu1  ;;  %v1107_v20 = vld [vmem:[#allocation2 + $0xe8] sm:$0xff] }
 0x235   : > { %v1707_v11 = vsub.f32 %v1097_v59, %v1625_v51 }
 0x236   : > { %v1404_v26 = vpop.f32.mrb[40].mxu1 }
 0x237   : > { %1739 = vst [vmem:[#allocation2 + $0x98] sm:$0xff] %v1707_v11  ;;  %v1630_v17 = vadd.f32 %v4572_v19, %v1404_v26  ;;  %v1406_v55 = vpop.f32.mrb[41].mxu1 }
 0x239   : > { %v1708_v24 = vsub.f32 %v1098_v57, %v1630_v17  ;;  %v1108_v57 = vld [vmem:[#allocation2 + $0xf0] sm:$0xff] }
 0x23a   : > { %v1409_v0 = vpop.f32.mrb[42].mxu1 }
 0x23b   : > { %1740 = vst [vmem:[#allocation2 + $0xa0] sm:$0xff] %v1708_v24  ;;  %v1635_v9 = vadd.f32 %v4575_v8, %v1409_v0  ;;  %v1411_v32 = vpop.f32.mrb[43].mxu1  ;;  %v1109_v24 = vld [vmem:[#allocation2 + $0xf8] sm:$0xff] }
 0x23d   : > { %v1709_v28 = vsub.f32 %v1099_v21, %v1635_v9 }
 0x23e   : > { %v1414_v6 = vpop.f32.mrb[44].mxu1 }
 0x23f   : > { %1741 = vst [vmem:[#allocation2 + $0xa8] sm:$0xff] %v1709_v28  ;;  %v1640_v12 = vadd.f32 %v4578_v52, %v1414_v6  ;;  %v1416_v43 = vpop.f32.mrb[45].mxu1 }
 0x241   : > { %v1710_v14 = vsub.f32 %v1100_v56, %v1640_v12 }
 0x242   : > { %v1419_v25 = vpop.f32.mrb[46].mxu1 }
 0x243   : > { %1742 = vst [vmem:[#allocation2 + $0xb0] sm:$0xff] %v1710_v14  ;;  %v1645_v19 = vadd.f32 %v4581_v41, %v1419_v25  ;;  %v1421_v35 = vpop.f32.mrb[47].mxu1 }
 0x245   : > { %v1711_v50 = vsub.f32 %v1101_v36, %v1645_v19 }
 0x246   : > { %v1424_v1 = vpop.f32.mrb[48].mxu1 }
 0x247   : > { %1743 = vst [vmem:[#allocation2 + $0xb8] sm:$0xff] %v1711_v50  ;;  %v1650_v8 = vadd.f32 %v4584_v37, %v1424_v1  ;;  %v1426_v38 = vpop.f32.mrb[49].mxu1 }
 0x249   : > { %v1712_v62 = vsub.f32 %v1102_v13, %v1650_v8 }
 0x24a   : > { %v1429_v58 = vpop.f32.mrb[50].mxu1 }
 0x24b   : > { %1744 = vst [vmem:[#allocation2 + $0xc0] sm:$0xff] %v1712_v62  ;;  %v1655_v52 = vadd.f32 %v4587_v31, %v1429_v58  ;;  %v1431_v39 = vpop.f32.mrb[51].mxu1 }
 0x24d   : > { %v1713_v29 = vsub.f32 %v1103_v42, %v1655_v52 }
 0x24e   : > { %v1434_v16 = vpop.f32.mrb[52].mxu1 }
 0x24f   : > { %1745 = vst [vmem:[#allocation2 + $0xc8] sm:$0xff] %v1713_v29  ;;  %v1660_v41 = vadd.f32 %v4590_v44, %v1434_v16  ;;  %v1436_v2 = vpop.f32.mrb[53].mxu1 }
 0x251   : > { %v1714_v27 = vsub.f32 %v1104_v22, %v1660_v41 }
 0x252   : > { %v1439_v40 = vpop.f32.mrb[54].mxu1 }
 0x253   : > { %1746 = vst [vmem:[#allocation2 + $0xd0] sm:$0xff] %v1714_v27  ;;  %v1665_v37 = vadd.f32 %v4593_v23, %v1439_v40  ;;  %v1441_v47 = vpop.f32.mrb[55].mxu1 }
 0x255   : > { %v1715_v30 = vsub.f32 %v1105_v5, %v1665_v37 }
 0x256   : > { %v1444_v61 = vpop.f32.mrb[56].mxu1 }
 0x257   : > { %1747 = vst [vmem:[#allocation2 + $0xd8] sm:$0xff] %v1715_v30  ;;  %v1670_v31 = vadd.f32 %v4596_v63, %v1444_v61  ;;  %v1446_v46 = vpop.f32.mrb[57].mxu1 }
 0x259   : > { %v1716_v59 = vsub.f32 %v1106_v34, %v1670_v31 }
 0x25a   : > { %v1449_v51 = vpop.f32.mrb[58].mxu1 }
 0x25b   : > { %1748 = vst [vmem:[#allocation2 + $0xe0] sm:$0xff] %v1716_v59  ;;  %v1675_v44 = vadd.f32 %v4599_v7, %v1449_v51  ;;  %v1451_v10 = vpop.f32.mrb[59].mxu1 }
 0x25d   : > { %v1717_v11 = vsub.f32 %v1107_v20, %v1675_v44 }
 0x25e   : > { %v1454_v26 = vpop.f32.mrb[60].mxu1 }
 0x25f   : > { %1749 = vst [vmem:[#allocation2 + $0xe8] sm:$0xff] %v1717_v11  ;;  %v1680_v23 = vadd.f32 %v4602_v3, %v1454_v26  ;;  %v1456_v17 = vpop.f32.mrb[61].mxu1 }
 0x261   : > { %v1718_v55 = vsub.f32 %v1108_v57, %v1680_v23  ;;  %1854 = sbr.rel (%p2621_p0) target bundleno = 892 (0x37c), region = 90 }
 0x262   : > { %v1459_v21 = vpop.f32.mrb[62].mxu1 }
 0x263   : > { %1750 = vst [vmem:[#allocation2 + $0xf0] sm:$0xff] %v1718_v55  ;;  %v1685_v63 = vadd.f32 %v4605_v18, %v1459_v21  ;;  %v1461_v0 = vpop.f32.mrb[63].mxu1 }
 0x265   : > { %v1719_v9 = vsub.f32 %v1109_v24, %v1685_v63 }
 0x267   : > { %1751 = vst [vmem:[#allocation2 + $0xf8] sm:$0xff] %v1719_v9 }
 0x268   : > { %v4624_v7 = vld [vmem:[%s3506_s30 + $0x10] sm:$0xff]  ;;  %v4627_v3 = vld [vmem:[%s3506_s30] sm:$0xff]  ;;  %v4630_v32 = vld [vmem:[%s3506_s30 + $0x18] sm:$0xff]  ;;  %v3129_v28 = vmov 0.0   ;;  %v2051_v23 = vsub.s32 0, %v3523_v4 }
 0x269   : > { %vm1889_vm5 = vcmp.ne.f32.partialorder %v4624_v7, 0.0  ;;  %vm1887_vm1 = vcmp.ne.f32.partialorder %v4627_v3, 0.0  ;;  %vm1890_vm6 = vcmp.ne.f32.partialorder %v4630_v32, 0.0  ;;  %v4636_v18 = vld [vmem:[%s3506_s30 + $0x8] sm:$0xff]  ;;  %v4645_v43 = vld [vmem:[%s3506_s30 + $0x20] sm:$0xff]  ;;  %v4652_v25 = vld [vmem:[%s3506_s30 + $0x38] sm:$0xff] }
 0x26a   : > { %v2624_v56 = vsel %vm1889_vm5, 1.0, %v3129_v28  ;;  %v2622_v6 = vsel %vm1887_vm1, 1.0, %v3129_v28  ;;  %vm1888_vm8 = vcmp.ne.f32.partialorder %v4636_v18, 0.0  ;;  %v4642_v12 = vld [vmem:[%s3506_s30 + $0x28] sm:$0xff]  ;;  %v2625_v14 = vsel %vm1890_vm6, 1.0, %v3129_v28  ;;  %v4655_v19 = vld [vmem:[%s3506_s30 + $0x30] sm:$0xff] }
 0x26b   : > { %1987 = vadd.xlane.f32.xlu1 %v2624_v56  ;;  %1983 = vadd.xlane.f32.xlu0 %v2622_v6  ;;  %v2623_v36 = vsel %vm1888_vm8, 1.0, %v3129_v28  ;;  %vm1892_vm3 = vcmp.ne.f32.partialorder %v4642_v12, 0.0  ;;  %vm1891_vm10 = vcmp.ne.f32.partialorder %v4645_v43, 0.0  ;;  %vm1894_vm12 = vcmp.ne.f32.partialorder %v4652_v25, 0.0  ;;  %v4662_v13 = vld [vmem:[%s3506_s30 + $0x48] sm:$0xff]  ;;  %v4665_v1 = vld [vmem:[%s3506_s30 + $0x40] sm:$0xff] }
 0x26c   : > { %v2627_v35 = vsel %vm1892_vm3, 1.0, %v3129_v28  ;;  %v2626_v50 = vsel %vm1891_vm10, 1.0, %v3129_v28  ;;  %vm1893_vm14 = vcmp.ne.f32.partialorder %v4655_v19, 0.0  ;;  %v2629_v8 = vsel %vm1894_vm12, 1.0, %v3129_v28  ;;  %v4672_v62 = vld [vmem:[%s3506_s30 + $0x58] sm:$0xff]  ;;  %v4675_v42 = vld [vmem:[%s3506_s30 + $0x50] sm:$0xff] }
 0x26d   : > { %v2628_v38 = vsel %vm1893_vm14, 1.0, %v3129_v28  ;;  %vm1896_vm9 = vcmp.ne.f32.partialorder %v4662_v13, 0.0  ;;  %vm1895_vm7 = vcmp.ne.f32.partialorder %v4665_v1, 0.0  ;;  %vm1898_vm11 = vcmp.ne.f32.partialorder %v4672_v62, 0.0  ;;  %v4682_v39 = vld [vmem:[%s3506_s30 + $0x68] sm:$0xff]  ;;  %v4685_v29 = vld [vmem:[%s3506_s30 + $0x60] sm:$0xff] }
 0x26e   : > { %v2631_v58 = vsel %vm1896_vm9, 1.0, %v3129_v28  ;;  %v2630_v52 = vsel %vm1895_vm7, 1.0, %v3129_v28  ;;  %vm1897_vm2 = vcmp.ne.f32.partialorder %v4675_v42, 0.0  ;;  %v2633_v22 = vsel %vm1898_vm11, 1.0, %v3129_v28  ;;  %v4692_v41 = vld [vmem:[%s3506_s30 + $0x78] sm:$0xff]  ;;  %v4695_v2 = vld [vmem:[%s3506_s30 + $0x70] sm:$0xff] }
 0x26f   : > { %1989 = vadd.xlane.f32.xlu1 %v2625_v14  ;;  %1985 = vadd.xlane.f32.xlu0 %v2623_v36  ;;  %v2632_v16 = vsel %vm1897_vm2, 1.0, %v3129_v28  ;;  %vm1900_vm15 = vcmp.ne.f32.partialorder %v4682_v39, 0.0  ;;  %vm1899_vm4 = vcmp.ne.f32.partialorder %v4685_v29, 0.0  ;;  %vm1902_vm0 = vcmp.ne.f32.partialorder %v4692_v41, 0.0  ;;  %v4702_v40 = vld [vmem:[%s3506_s30 + $0x88] sm:$0xff]  ;;  %v4705_v37 = vld [vmem:[%s3506_s30 + $0x80] sm:$0xff] }
 0x270   : > { %v2635_v27 = vsel %vm1900_vm15, 1.0, %v3129_v28  ;;  %v2634_v5 = vsel %vm1899_vm4, 1.0, %v3129_v28  ;;  %vm1901_vm13 = vcmp.ne.f32.partialorder %v4695_v2, 0.0  ;;  %v2637_v47 = vsel %vm1902_vm0, 1.0, %v3129_v28  ;;  %v4712_v34 = vld [vmem:[%s3506_s30 + $0x98] sm:$0xff]  ;;  %v4715_v61 = vld [vmem:[%s3506_s30 + $0x90] sm:$0xff] }
 0x271   : > { %v2636_v30 = vsel %vm1901_vm13, 1.0, %v3129_v28  ;;  %vm1904_vm5 = vcmp.ne.f32.partialorder %v4702_v40, 0.0  ;;  %vm1903_vm1 = vcmp.ne.f32.partialorder %v4705_v37, 0.0  ;;  %vm1906_vm6 = vcmp.ne.f32.partialorder %v4712_v34, 0.0  ;;  %v4722_v59 = vld [vmem:[%s3506_s30 + $0xa8] sm:$0xff]  ;;  %v4725_v20 = vld [vmem:[%s3506_s30 + $0xa0] sm:$0xff] }
 0x272   : > { %v2639_v31 = vsel %vm1904_vm5, 1.0, %v3129_v28  ;;  %v2638_v46 = vsel %vm1903_vm1, 1.0, %v3129_v28  ;;  %vm1905_vm8 = vcmp.ne.f32.partialorder %v4715_v61, 0.0  ;;  %v2641_v51 = vsel %vm1906_vm6, 1.0, %v3129_v28  ;;  %v4732_v10 = vld [vmem:[%s3506_s30 + $0xb8] sm:$0xff]  ;;  %v4735_v11 = vld [vmem:[%s3506_s30 + $0xb0] sm:$0xff] }
 0x273   : > { %1993 = vadd.xlane.f32.xlu1 %v2627_v35  ;;  %1991 = vadd.xlane.f32.xlu0 %v2626_v50  ;;  %v2640_v44 = vsel %vm1905_vm8, 1.0, %v3129_v28  ;;  %vm1908_vm3 = vcmp.ne.f32.partialorder %v4722_v59, 0.0  ;;  %vm1907_vm10 = vcmp.ne.f32.partialorder %v4725_v20, 0.0  ;;  %5259 = vst [vmem:[#allocation44_spill] sm:$0xff] %v4732_v10  ;;  %5260 = vst [vmem:[#allocation45_spill] sm:$0xff] %v4735_v11  ;;  %vm1910_vm12 = vcmp.ne.f32.partialorder %v4732_v10, 0.0 }
 0x274   : > { %v2643_v57 = vsel %vm1908_vm3, 1.0, %v3129_v28  ;;  %v2642_v26 = vsel %vm1907_vm10, 1.0, %v3129_v28  ;;  %vm1909_vm14 = vcmp.ne.f32.partialorder %v4735_v11, 0.0  ;;  %v2047_v17 = vld [vmem:[#allocation3] sm:$0x3]  ;;  %v2645_v55 = vsel %vm1910_vm12, 1.0, %v3129_v28 }
 0x275   : > { %v2644_v24 = vsel %vm1909_vm14, 1.0, %v3129_v28  ;;  %v2052_v21 = vrot.slane %v2047_v17, %v2051_v23  ;;  %v5261_v63 = vld [vmem:[#allocation7_spill] sm:$0xff]  ;;  %v5262_v0 = vld [vmem:[#allocation6_spill] sm:$0xff]  ;;  %v5265_v6 = vld [vmem:[#allocation9_spill] sm:$0xff] }
 0x276   : > { %vm5263_vm9 = vcmp.eq.s32.totalorder %v5261_v63, %v5262_v0  ;;  %vm5264_vm7 = vcmp.eq.s32.totalorder %v3523_v4, %v5262_v0  ;;  %vm5266_vm11 = vcmp.eq.s32.totalorder %v5265_v6, %v5262_v0  ;;  %v5267_v36 = vld [vmem:[#allocation8_spill] sm:$0xff]  ;;  %v5269_v50 = vld [vmem:[#allocation11_spill] sm:$0xff]  ;;  %v2055_v63 = vsub.s32 1, %v3523_v4  ;;  %v5291_v6 = vld [vmem:[#allocation26_spill] sm:$0xff] }
 0x277   : > { %1997 = vadd.xlane.f32.xlu1 %v2629_v8  ;;  %1995 = vadd.xlane.f32.xlu0 %v2628_v38  ;;  %v2061_v9 = vsel %vm5263_vm9, %v2052_v21, 0.0  ;;  %v2059_v56 = vsel %vm5264_vm7, %v2052_v21, 0.0  ;;  %v2065_v14 = vsel %vm5266_vm11, %v2052_v21, 0.0  ;;  %vm5268_vm2 = vcmp.eq.s32.totalorder %v5267_v36, %v5262_v0  ;;  %v5271_v38 = vld [vmem:[#allocation10_spill] sm:$0xff] }
 0x278   : > { %v2063_v35 = vsel %vm5268_vm2, %v2052_v21, 0.0  ;;  %vm5270_vm15 = vcmp.eq.s32.totalorder %v5269_v50, %v5262_v0  ;;  %vm5272_vm4 = vcmp.eq.s32.totalorder %v5271_v38, %v5262_v0  ;;  %vm5292_vm14 = vcmp.eq.s32.totalorder %v5291_v6, %v5262_v0  ;;  %v5297_v38 = vld [vmem:[#allocation24_spill] sm:$0xff] }
 0x279   : > { %v2069_v8 = vsel %vm5270_vm15, %v2052_v21, 0.0  ;;  %v2056_v36 = vrot.slane %v2047_v17, %v2055_v63  ;;  %vm5298_vm11 = vcmp.eq.s32.totalorder %v5297_v38, %v3674_v49  ;;  %v4873_v6 = vld [vmem:[%s3506_s30 + $0xf0] sm:$0xff] }
 0x27a   : > { %5325 = vst [vmem:[#allocation53_spill] sm:$0xff] %v4873_v6 }
 0x27b   : > { %2001 = vadd.xlane.f32.xlu1 %v2631_v58  ;;  %1999 = vadd.xlane.f32.xlu0 %v2630_v52  ;;  %v2067_v58 = vsel %vm5272_vm4, %v2052_v21, 0.0  ;;  %v5273_v52 = vld [vmem:[#allocation13_spill] sm:$0xff] }
 0x27c   : > { %vm5274_vm0 = vcmp.eq.s32.totalorder %v5273_v52, %v5262_v0  ;;  %v5299_v52 = vld [vmem:[#allocation21_spill] sm:$0xff] }
 0x27d   : > { %vm5300_vm2 = vcmp.eq.s32.totalorder %v5299_v52, %v3674_v49 }
 0x27e   : > { %v2096_v17 = vsel %vm5300_vm2, %v2056_v36, 0.0 }
 0x27f   : > { %2005 = vadd.xlane.f32.xlu1 %v2633_v22  ;;  %2003 = vadd.xlane.f32.xlu0 %v2632_v16  ;;  %v2073_v22 = vsel %vm5274_vm0, %v2052_v21, 0.0  ;;  %v5275_v16 = vld [vmem:[#allocation12_spill] sm:$0xff]  ;;  %vm5305_vm0 = vcmp.eq.s32.totalorder %v4070_v33, %v3674_v49 }
 0x280   : > { %vm5276_vm13 = vcmp.eq.s32.totalorder %v5275_v16, %v5262_v0 }
 0x283   : > { %2009 = vadd.xlane.f32.xlu1 %v2635_v27  ;;  %2007 = vadd.xlane.f32.xlu0 %v2634_v5  ;;  %v2071_v27 = vsel %vm5276_vm13, %v2052_v21, 0.0  ;;  %v5277_v5 = vld [vmem:[#allocation15_spill] sm:$0xff] }
 0x284   : > { %vm5278_vm5 = vcmp.eq.s32.totalorder %v5277_v5, %v5262_v0  ;;  %v5306_v5 = vld [vmem:[#allocation40_spill] sm:$0xff] }
 0x285   : > { %vm5307_vm13 = vcmp.eq.s32.totalorder %v5306_v5, %v3674_v49 }
 0x287   : > { %2013 = vadd.xlane.f32.xlu1 %v2637_v47  ;;  %2011 = vadd.xlane.f32.xlu0 %v2636_v30  ;;  %v2077_v47 = vsel %vm5278_vm5, %v2052_v21, 0.0  ;;  %v5279_v30 = vld [vmem:[#allocation14_spill] sm:$0xff]  ;;  %vm5308_vm5 = vcmp.eq.s32.totalorder %v4177_v54, %v3674_v49 }
 0x288   : > { %vm5280_vm1 = vcmp.eq.s32.totalorder %v5279_v30, %v5262_v0  ;;  %v2110_v30 = vsel %vm5308_vm5, %v2056_v36, 0.0 }
 0x28b   : > { %2017 = vadd.xlane.f32.xlu1 %v2639_v31  ;;  %2015 = vadd.xlane.f32.xlu0 %v2638_v46  ;;  %v2075_v31 = vsel %vm5280_vm1, %v2052_v21, 0.0  ;;  %v5281_v46 = vld [vmem:[#allocation18_spill] sm:$0xff]  ;;  %vm5309_vm1 = vcmp.eq.s32.totalorder %v4127_v53, %v3674_v49 }
 0x28c   : > { %vm5282_vm6 = vcmp.eq.s32.totalorder %v5281_v46, %v5262_v0 }
 0x28f   : > { %2021 = vadd.xlane.f32.xlu1 %v2641_v51  ;;  %2019 = vadd.xlane.f32.xlu0 %v2640_v44  ;;  %v2081_v51 = vsel %vm5282_vm6, %v2052_v21, 0.0  ;;  %v5283_v44 = vld [vmem:[#allocation16_spill] sm:$0xff]  ;;  %vm5310_vm6 = vcmp.eq.s32.totalorder %v4246_v15, %v3674_v49  ;;  %v4839_v15 = vld [vmem:[%s3506_s30 + $0xc0] sm:$0xff] }
 0x290   : > { %vm5284_vm8 = vcmp.eq.s32.totalorder %v5283_v44, %v5262_v0  ;;  %v2114_v33 = vsel %vm5310_vm6, %v2056_v36, 0.0  ;;  %5315 = vst [vmem:[#allocation47_spill] sm:$0xff] %v4839_v15 }
 0x293   : > { %2025 = vadd.xlane.f32.xlu1 %v2643_v57  ;;  %2023 = vadd.xlane.f32.xlu0 %v2642_v26  ;;  %v2079_v57 = vsel %vm5284_vm8, %v2052_v21, 0.0  ;;  %v5285_v26 = vld [vmem:[#allocation22_spill] sm:$0xff]  ;;  %vm5311_vm8 = vcmp.eq.s32.totalorder %v4218_v45, %v3674_v49  ;;  %v5316_v45 = vld [vmem:[#allocation43_spill] sm:$0xff] }
 0x294   : > { %vm5286_vm3 = vcmp.eq.s32.totalorder %v5285_v26, %v5262_v0  ;;  %v2112_v46 = vsel %vm5311_vm8, %v2056_v36, 0.0  ;;  %v4853_v26 = vld [vmem:[%s3506_s30 + $0xd0] sm:$0xff] }
 0x295   : > { %v2085_v23 = vsel %vm5286_vm3, %v2052_v21, 0.0  ;;  %vm5312_vm3 = vcmp.eq.s32.totalorder %v4281_v60, %v3674_v49  ;;  %5321 = vst [vmem:[#allocation49_spill] sm:$0xff] %v4853_v26  ;;  %vm1913_vm2 = vcmp.ne.f32.partialorder %v4853_v26, 0.0 }
 0x296   : > { %v2118_v54 = vsel %vm5312_vm3, %v2056_v36, 0.0 }
 0x297   : > { %2029 = vadd.xlane.f32.xlu1 %v2645_v55  ;;  %2027 = vadd.xlane.f32.xlu0 %v2644_v24  ;;  %v5287_v55 = vld [vmem:[#allocation20_spill] sm:$0xff] }
 0x298   : > { %vm5288_vm10 = vcmp.eq.s32.totalorder %v5287_v55, %v5262_v0 }
 0x299   : > { %v2083_v24 = vsel %vm5288_vm10, %v2052_v21, 0.0  ;;  %vm5313_vm10 = vcmp.eq.s32.totalorder %v4271_v48, %v3674_v49  ;;  %v4850_v48 = vld [vmem:[%s3506_s30 + $0xd8] sm:$0xff] }
 0x29a   : > { %v2116_v53 = vsel %vm5313_vm10, %v2056_v36, 0.0  ;;  %5320 = vst [vmem:[#allocation48_spill] sm:$0xff] %v4850_v48 }
 0x29b   : > { %2127 = vadd.xlane.f32.xlu1 %v2061_v9  ;;  %2124 = vadd.xlane.f32.xlu0 %v2059_v56  ;;  %v5289_v9 = vld [vmem:[#allocation33_spill] sm:$0xff] }
 0x29c   : > { %vm5290_vm12 = vcmp.eq.s32.totalorder %v5289_v9, %v5262_v0  ;;  %v2648_v9 = vsel %vm1913_vm2, 1.0, %v3129_v28 }
 0x29d   : > { %v2089_v56 = vsel %vm5290_vm12, %v2052_v21, 0.0  ;;  %vm5317_vm12 = vcmp.eq.s32.totalorder %v5316_v45, %v3674_v49 }
 0x29e   : > { %v2122_v44 = vsel %vm5317_vm12, %v2056_v36, 0.0 }
 0x29f   : > { %2133 = vadd.xlane.f32.xlu1 %v2065_v14  ;;  %2130 = vadd.xlane.f32.xlu0 %v2063_v35  ;;  %v2087_v14 = vsel %vm5292_vm14, %v2052_v21, 0.0  ;;  %v5293_v35 = vld [vmem:[#allocation19_spill] sm:$0xff]  ;;  %v5301_v21 = vld [vmem:[#allocation36_spill] sm:$0xff] }
 0x2a0   : > { %vm5294_vm9 = vcmp.eq.s32.totalorder %v5293_v35, %v3674_v49  ;;  %vm5302_vm15 = vcmp.eq.s32.totalorder %v5301_v21, %v3674_v49 }
 0x2a1   : > { %v2094_v50 = vsel %vm5294_vm9, %v2056_v36, 0.0  ;;  %v2102_v0 = vsel %vm5302_vm15, %v2056_v36, 0.0 }
 0x2a3   : > { %2139 = vadd.xlane.f32.xlu1 %v2069_v8  ;;  %2136 = vadd.xlane.f32.xlu0 %v2067_v58  ;;  %v5295_v8 = vld [vmem:[#allocation17_spill] sm:$0xff]  ;;  %v2098_v58 = vsel %vm5298_vm11, %v2056_v36, 0.0  ;;  %vm1914_vm11 = vcmp.ne.f32.partialorder %v4850_v48, 0.0 }
 0x2a4   : > { %vm5296_vm7 = vcmp.eq.s32.totalorder %v5295_v8, %v3674_v49  ;;  %v2649_v63 = vsel %vm1914_vm11, 1.0, %v3129_v28 }
 0x2a5   : > { %v2092_v4 = vsel %vm5296_vm7, %v2056_v36, 0.0  ;;  %vm1911_vm7 = vcmp.ne.f32.partialorder %v4839_v15, 0.0 }
 0x2a6   : > { %v2646_v55 = vsel %vm1911_vm7, 1.0, %v3129_v28 }
 0x2a7   : > { %2145 = vadd.xlane.f32.xlu1 %v2073_v22  ;;  %2142 = vadd.xlane.f32.xlu0 %v2071_v27  ;;  %v5303_v22 = vld [vmem:[#allocation31_spill] sm:$0xff]  ;;  %v2106_v27 = vsel %vm5305_vm0, %v2056_v36, 0.0 }
 0x2a8   : > { %vm5304_vm4 = vcmp.eq.s32.totalorder %v5303_v22, %v3674_v49 }
 0x2a9   : > { %v2100_v16 = vsel %vm5304_vm4, %v2056_v36, 0.0 }
 0x2ab   : > { %2151 = vadd.xlane.f32.xlu1 %v2077_v47  ;;  %2148 = vadd.xlane.f32.xlu0 %v2075_v31  ;;  %v2104_v47 = vsel %vm5307_vm13, %v2056_v36, 0.0  ;;  %v2108_v31 = vsel %vm5309_vm1, %v2056_v36, 0.0  ;;  %vm1917_vm13 = vcmp.ne.f32.partialorder %v4873_v6, 0.0 }
 0x2af   : > { %2157 = vadd.xlane.f32.xlu1 %v2081_v51  ;;  %2154 = vadd.xlane.f32.xlu0 %v2079_v57  ;;  %v4836_v51 = vld [vmem:[%s3506_s30 + $0xc8] sm:$0xff] }
 0x2b0   : > { %5314 = vst [vmem:[#allocation46_spill] sm:$0xff] %v4836_v51  ;;  %v5318_v57 = vld [vmem:[#allocation42_spill] sm:$0xff]  ;;  %vm1912_vm9 = vcmp.ne.f32.partialorder %v4836_v51, 0.0 }
 0x2b1   : > { %vm5319_vm14 = vcmp.eq.s32.totalorder %v5318_v57, %v3674_v49  ;;  %v4860_v49 = vld [vmem:[%s3506_s30 + $0xe8] sm:$0xff] }
 0x2b2   : > { %v2120_v60 = vsel %vm5319_vm14, %v2056_v36, 0.0  ;;  %5322 = vst [vmem:[#allocation50_spill] sm:$0xff] %v4860_v49  ;;  %vm1916_vm15 = vcmp.ne.f32.partialorder %v4860_v49, 0.0 }
 0x2b3   : > { %2163 = vadd.xlane.f32.xlu1 %v2085_v23  ;;  %2160 = vadd.xlane.f32.xlu0 %v2083_v24  ;;  %v2647_v23 = vsel %vm1912_vm9, 1.0, %v3129_v28  ;;  %v4863_v24 = vld [vmem:[%s3506_s30 + $0xe0] sm:$0xff] }
 0x2b4   : > { %5323 = vst [vmem:[#allocation51_spill] sm:$0xff] %v4863_v24  ;;  %vm1915_vm4 = vcmp.ne.f32.partialorder %v4863_v24, 0.0 }
 0x2b5   : > { %v2650_v36 = vsel %vm1915_vm4, 1.0, %v3129_v28 }
 0x2b7   : > { %2169 = vadd.xlane.f32.xlu1 %v2089_v56  ;;  %2166 = vadd.xlane.f32.xlu0 %v2087_v14  ;;  %v4870_v56 = vld [vmem:[%s3506_s30 + $0xf8] sm:$0xff]  ;;  %v2651_v14 = vsel %vm1916_vm15, 1.0, %v3129_v28 }
 0x2b8   : > { %5324 = vst [vmem:[#allocation52_spill] sm:$0xff] %v4870_v56  ;;  %vm1918_vm0 = vcmp.ne.f32.partialorder %v4870_v56, 0.0 }
 0x2b9   : > { %v2653_v35 = vsel %vm1918_vm0, 1.0, %v3129_v28 }
 0x2bb   : > { %2175 = vadd.xlane.f32.xlu1 %v2094_v50  ;;  %2172 = vadd.xlane.f32.xlu0 %v2092_v4  ;;  %v2652_v50 = vsel %vm1917_vm13, 1.0, %v3129_v28 }
 0x2bf   : > { %2181 = vadd.xlane.f32.xlu1 %v2098_v58  ;;  %2178 = vadd.xlane.f32.xlu0 %v2096_v17 }
 0x2c3   : > { %2187 = vadd.xlane.f32.xlu1 %v2102_v0  ;;  %2184 = vadd.xlane.f32.xlu0 %v2100_v16 }
 0x2c7   : > { %2193 = vadd.xlane.f32.xlu1 %v2106_v27  ;;  %2190 = vadd.xlane.f32.xlu0 %v2104_v47 }
 0x2cb   : > { %2199 = vadd.xlane.f32.xlu1 %v2110_v30  ;;  %2196 = vadd.xlane.f32.xlu0 %v2108_v31 }
 0x2cf   : > { %2205 = vadd.xlane.f32.xlu1 %v2114_v33  ;;  %2202 = vadd.xlane.f32.xlu0 %v2112_v46 }
 0x2d3   : > { %2211 = vadd.xlane.f32.xlu1 %v2118_v54  ;;  %2208 = vadd.xlane.f32.xlu0 %v2116_v53 }
 0x2d7   : > { %2217 = vadd.xlane.f32.xlu1 %v2122_v44  ;;  %2214 = vadd.xlane.f32.xlu0 %v2120_v60 }
 0x2db   : > { %2033 = vadd.xlane.f32.xlu1 %v2647_v23  ;;  %2031 = vadd.xlane.f32.xlu0 %v2646_v55 }
 0x2df   : > { %2037 = vadd.xlane.f32.xlu1 %v2649_v63  ;;  %2035 = vadd.xlane.f32.xlu0 %v2648_v9 }
 0x2e3   : > { %2041 = vadd.xlane.f32.xlu1 %v2651_v14  ;;  %2039 = vadd.xlane.f32.xlu0 %v2650_v36 }
 0x2e7   : > { %2045 = vadd.xlane.f32.xlu1 %v2653_v35  ;;  %2043 = vadd.xlane.f32.xlu0 %v2652_v50  ;;  %v2220_v35 = vld [vmem:[#allocation2 + $0x8] sm:$0xff]  ;;  %v2219_v50 = vld [vmem:[#allocation2] sm:$0xff] }
 0x2f8   : > { %v1988_v8 = vpop.xlane.xlu1 %1987  ;;  %v1984_v4 = vpop.xlane.xlu0 %1983 }
 0x2fc   : > { %v1990_v38 = vpop.xlane.xlu1 %1989  ;;  %v1986_v58 = vpop.xlane.xlu0 %1985 }
 0x300   : > { %v1994_v52 = vpop.xlane.xlu1 %1993  ;;  %v1992_v17 = vpop.xlane.xlu0 %1991 }
 0x304   : > { %v1998_v21 = vpop.xlane.xlu1 %1997  ;;  %v1996_v0 = vpop.xlane.xlu0 %1995 }
 0x308   : > { %v4881_v22 = vpop.xlane.xlu1 %2001  ;;  %v4883_v16 = vpop.xlane.xlu0 %1999 }
 0x30c   : > { %v4885_v27 = vpop.xlane.xlu1 %2005  ;;  %v4887_v5 = vpop.xlane.xlu0 %2003 }
 0x310   : > { %v4889_v47 = vpop.xlane.xlu1 %2009  ;;  %v4891_v28 = vpop.xlane.xlu0 %2007 }
 0x314   : > { %v4893_v30 = vpop.xlane.xlu1 %2013  ;;  %v4895_v31 = vpop.xlane.xlu0 %2011 }
 0x318   : > { %v4897_v33 = vpop.xlane.xlu1 %2017  ;;  %v4899_v46 = vpop.xlane.xlu0 %2015 }
 0x31c   : > { %v4901_v54 = vpop.xlane.xlu1 %2021  ;;  %v4903_v53 = vpop.xlane.xlu0 %2019 }
 0x320   : > { %v4905_v45 = vpop.xlane.xlu1 %2025  ;;  %v4907_v44 = vpop.xlane.xlu0 %2023 }
 0x324   : > { %v4909_v57 = vpop.xlane.xlu1 %2029  ;;  %v4911_v60 = vpop.xlane.xlu0 %2027 }
 0x328   : > { %v2128_v23 = vpop.xlane.xlu1 %2127  ;;  %v2125_v55 = vpop.xlane.xlu0 %2124 }
 0x329   : > { %v2252_v63 = vmul.f32 2.0, %v2128_v23  ;;  %v2251_v9 = vmul.f32 2.0, %v2125_v55  ;;  %v2222_v23 = vld [vmem:[#allocation2 + $0x18] sm:$0xff]  ;;  %v2221_v55 = vld [vmem:[#allocation2 + $0x10] sm:$0xff] }
 0x32b   : > { %v2284_v14 = vadd.f32 %v2252_v63, %v1986_v58  ;;  %v2283_v36 = vadd.f32 %v2251_v9, %v1984_v4 }
 0x32c   : > { %v2134_v6 = vpop.xlane.xlu1 %2133  ;;  %v2131_v56 = vpop.xlane.xlu0 %2130 }
 0x32d   : > { %v2316_v24 = vmul.f32 %v2284_v14, %v4636_v18  ;;  %v2315_v49 = vmul.f32 %v2283_v36, %v4627_v3  ;;  %v2254_v26 = vmul.f32 2.0, %v2134_v6  ;;  %v2253_v48 = vmul.f32 2.0, %v2131_v56 }
 0x32f   : > { %v2348_v15 = vadd.f32 %v2316_v24, %v2220_v35  ;;  %v2347_v51 = vadd.f32 %v2315_v49, %v2219_v50  ;;  %v2286_v11 = vadd.f32 %v2254_v26, %v1990_v38  ;;  %v2285_v10 = vadd.f32 %v2253_v48, %v1988_v8  ;;  %v2224_v26 = vld [vmem:[#allocation2 + $0x28] sm:$0xff]  ;;  %v2223_v48 = vld [vmem:[#allocation2 + $0x20] sm:$0xff] }
 0x330   : > { %v2140_v58 = vpop.xlane.xlu1 %2139  ;;  %v2137_v4 = vpop.xlane.xlu0 %2136 }
 0x331   : > { %2380 = vst [vmem:[%s3511_s6 + $0x8] sm:$0xff] %v2348_v15  ;;  %2379 = vst [vmem:[%s3511_s6] sm:$0xff] %v2347_v51  ;;  %v2318_v63 = vmul.f32 %v2286_v11, %v4630_v32  ;;  %v2317_v18 = vmul.f32 %v2285_v10, %v4624_v7  ;;  %v2256_v9 = vmul.f32 2.0, %v2140_v58  ;;  %v2255_v3 = vmul.f32 2.0, %v2137_v4 }
 0x333   : > { %v2350_v6 = vadd.f32 %v2318_v63, %v2222_v23  ;;  %v2349_v56 = vadd.f32 %v2317_v18, %v2221_v55  ;;  %v2288_v24 = vadd.f32 %v2256_v9, %v1994_v52  ;;  %v2287_v49 = vadd.f32 %v2255_v3, %v1992_v17  ;;  %v2226_v52 = vld [vmem:[#allocation2 + $0x38] sm:$0xff]  ;;  %v2225_v17 = vld [vmem:[#allocation2 + $0x30] sm:$0xff]  ;;  %v2227_v18 = vld [vmem:[#allocation2 + $0x40] sm:$0xff] }
 0x334   : > { %v2146_v8 = vpop.xlane.xlu1 %2145  ;;  %v2143_v38 = vpop.xlane.xlu0 %2142 }
 0x335   : > { %2382 = vst [vmem:[%s3511_s6 + $0x18] sm:$0xff] %v2350_v6  ;;  %2381 = vst [vmem:[%s3511_s6 + $0x10] sm:$0xff] %v2349_v56  ;;  %v2320_v51 = vmul.f32 %v2288_v24, %v4642_v12  ;;  %v2319_v32 = vmul.f32 %v2287_v49, %v4645_v43  ;;  %v2258_v11 = vmul.f32 2.0, %v2146_v8  ;;  %v2257_v7 = vmul.f32 2.0, %v2143_v38 }
 0x337   : > { %v2352_v10 = vadd.f32 %v2320_v51, %v2224_v26  ;;  %v2351_v15 = vadd.f32 %v2319_v32, %v2223_v48  ;;  %v2290_v14 = vadd.f32 %v2258_v11, %v1998_v21  ;;  %v2289_v36 = vadd.f32 %v2257_v7, %v1996_v0  ;;  %v2228_v0 = vld [vmem:[#allocation2 + $0x48] sm:$0xff]  ;;  %v2230_v26 = vld [vmem:[#allocation2 + $0x58] sm:$0xff]  ;;  %v2229_v48 = vld [vmem:[#allocation2 + $0x50] sm:$0xff] }
 0x338   : > { %v2152_v35 = vpop.xlane.xlu1 %2151  ;;  %v2149_v50 = vpop.xlane.xlu0 %2148 }
 0x339   : > { %2384 = vst [vmem:[%s3511_s6 + $0x28] sm:$0xff] %v2352_v10  ;;  %2383 = vst [vmem:[%s3511_s6 + $0x20] sm:$0xff] %v2351_v15  ;;  %v2322_v23 = vmul.f32 %v2290_v14, %v4652_v25  ;;  %v2321_v12 = vmul.f32 %v2289_v36, %v4655_v19  ;;  %v2260_v55 = vmul.f32 2.0, %v2152_v35  ;;  %v2259_v43 = vmul.f32 2.0, %v2149_v50  ;;  %v2232_v10 = vld [vmem:[#allocation2 + $0x68] sm:$0xff]  ;;  %v2231_v15 = vld [vmem:[#allocation2 + $0x60] sm:$0xff] }
 0x33b   : > { %v2354_v58 = vadd.f32 %v2322_v23, %v2226_v52  ;;  %v2353_v4 = vadd.f32 %v2321_v12, %v2225_v17  ;;  %v2292_v63 = vadd.f32 %v2260_v55, %v4881_v22  ;;  %v2291_v21 = vadd.f32 %v2259_v43, %v4883_v16  ;;  %v2234_v23 = vld [vmem:[#allocation2 + $0x78] sm:$0xff]  ;;  %v2233_v12 = vld [vmem:[#allocation2 + $0x70] sm:$0xff] }
 0x33c   : > { %v2158_v9 = vpop.xlane.xlu1 %2157  ;;  %v2155_v3 = vpop.xlane.xlu0 %2154 }
 0x33d   : > { %2386 = vst [vmem:[%s3511_s6 + $0x38] sm:$0xff] %v2354_v58  ;;  %2385 = vst [vmem:[%s3511_s6 + $0x30] sm:$0xff] %v2353_v4  ;;  %v2324_v25 = vmul.f32 %v2292_v63, %v4662_v13  ;;  %v2323_v19 = vmul.f32 %v2291_v21, %v4665_v1  ;;  %v2262_v6 = vmul.f32 2.0, %v2158_v9  ;;  %v2261_v56 = vmul.f32 2.0, %v2155_v3 }
 0x33f   : > { %v2356_v24 = vadd.f32 %v2324_v25, %v2228_v0  ;;  %v2355_v49 = vadd.f32 %v2323_v19, %v2227_v18  ;;  %v2294_v22 = vadd.f32 %v2262_v6, %v4885_v27  ;;  %v2293_v16 = vadd.f32 %v2261_v56, %v4887_v5  ;;  %v2236_v0 = vld [vmem:[#allocation2 + $0x88] sm:$0xff]  ;;  %v2235_v18 = vld [vmem:[#allocation2 + $0x80] sm:$0xff] }
 0x340   : > { %v2164_v8 = vpop.xlane.xlu1 %2163  ;;  %v2161_v38 = vpop.xlane.xlu0 %2160 }
 0x341   : > { %2388 = vst [vmem:[%s3511_s6 + $0x48] sm:$0xff] %v2356_v24  ;;  %2387 = vst [vmem:[%s3511_s6 + $0x40] sm:$0xff] %v2355_v49  ;;  %v2326_v13 = vmul.f32 %v2294_v22, %v4672_v62  ;;  %v2325_v1 = vmul.f32 %v2293_v16, %v4675_v42  ;;  %v2264_v51 = vmul.f32 2.0, %v2164_v8  ;;  %v2263_v32 = vmul.f32 2.0, %v2161_v38  ;;  %v2238_v24 = vld [vmem:[#allocation2 + $0x98] sm:$0xff]  ;;  %v2237_v49 = vld [vmem:[#allocation2 + $0x90] sm:$0xff] }
 0x343   : > { %v2358_v11 = vadd.f32 %v2326_v13, %v2230_v26  ;;  %v2357_v7 = vadd.f32 %v2325_v1, %v2229_v48  ;;  %v2296_v27 = vadd.f32 %v2264_v51, %v4889_v47  ;;  %v2295_v5 = vadd.f32 %v2263_v32, %v4891_v28  ;;  %v2240_v13 = vld [vmem:[#allocation2 + $0xa8] sm:$0xff]  ;;  %v2239_v1 = vld [vmem:[#allocation2 + $0xa0] sm:$0xff] }
 0x344   : > { %v2170_v14 = vpop.xlane.xlu1 %2169  ;;  %v2167_v36 = vpop.xlane.xlu0 %2166 }
 0x345   : > { %2390 = vst [vmem:[%s3511_s6 + $0x58] sm:$0xff] %v2358_v11  ;;  %2389 = vst [vmem:[%s3511_s6 + $0x50] sm:$0xff] %v2357_v7  ;;  %v2328_v62 = vmul.f32 %v2296_v27, %v4682_v39  ;;  %v2327_v42 = vmul.f32 %v2295_v5, %v4685_v29  ;;  %v2266_v52 = vmul.f32 2.0, %v2170_v14  ;;  %v2265_v17 = vmul.f32 2.0, %v2167_v36 }
 0x347   : > { %v2360_v35 = vadd.f32 %v2328_v62, %v2232_v10  ;;  %v2359_v50 = vadd.f32 %v2327_v42, %v2231_v15  ;;  %v2298_v47 = vadd.f32 %v2266_v52, %v4893_v30  ;;  %v2297_v28 = vadd.f32 %v2265_v17, %v4895_v31  ;;  %v2242_v10 = vld [vmem:[#allocation2 + $0xb8] sm:$0xff]  ;;  %v2241_v15 = vld [vmem:[#allocation2 + $0xb0] sm:$0xff] }
 0x348   : > { %v2176_v55 = vpop.xlane.xlu1 %2175  ;;  %v2173_v43 = vpop.xlane.xlu0 %2172  ;;  %v5326_v62 = vld [vmem:[#allocation44_spill] sm:$0xff]  ;;  %v5327_v42 = vld [vmem:[#allocation45_spill] sm:$0xff] }
 0x349   : > { %2392 = vst [vmem:[%s3511_s6 + $0x68] sm:$0xff] %v2360_v35  ;;  %2391 = vst [vmem:[%s3511_s6 + $0x60] sm:$0xff] %v2359_v50  ;;  %v2330_v39 = vmul.f32 %v2298_v47, %v4692_v41  ;;  %v2329_v29 = vmul.f32 %v2297_v28, %v4695_v2  ;;  %v2268_v58 = vmul.f32 2.0, %v2176_v55  ;;  %v2267_v4 = vmul.f32 2.0, %v2173_v43 }
 0x34b   : > { %v2362_v63 = vadd.f32 %v2330_v39, %v2234_v23  ;;  %v2361_v21 = vadd.f32 %v2329_v29, %v2233_v12  ;;  %v2300_v30 = vadd.f32 %v2268_v58, %v4897_v33  ;;  %v2299_v31 = vadd.f32 %v2267_v4, %v4899_v46  ;;  %v2244_v58 = vld [vmem:[#allocation2 + $0xc8] sm:$0xff]  ;;  %v2243_v4 = vld [vmem:[#allocation2 + $0xc0] sm:$0xff] }
 0x34c   : > { %v2182_v9 = vpop.xlane.xlu1 %2181  ;;  %v2179_v3 = vpop.xlane.xlu0 %2178 }
 0x34d   : > { %2394 = vst [vmem:[%s3511_s6 + $0x78] sm:$0xff] %v2362_v63  ;;  %2393 = vst [vmem:[%s3511_s6 + $0x70] sm:$0xff] %v2361_v21  ;;  %v2332_v41 = vmul.f32 %v2300_v30, %v4702_v40  ;;  %v2331_v2 = vmul.f32 %v2299_v31, %v4705_v37  ;;  %v2270_v25 = vmul.f32 2.0, %v2182_v9  ;;  %v2269_v19 = vmul.f32 2.0, %v2179_v3  ;;  %v5328_v30 = vld [vmem:[#allocation46_spill] sm:$0xff] }
 0x34f   : > { %v2364_v6 = vadd.f32 %v2332_v41, %v2236_v0  ;;  %v2363_v56 = vadd.f32 %v2331_v2, %v2235_v18  ;;  %v2302_v33 = vadd.f32 %v2270_v25, %v4901_v54  ;;  %v2301_v46 = vadd.f32 %v2269_v19, %v4903_v53  ;;  %v5329_v0 = vld [vmem:[#allocation47_spill] sm:$0xff] }
 0x350   : > { %v2188_v22 = vpop.xlane.xlu1 %2187  ;;  %v2185_v16 = vpop.xlane.xlu0 %2184 }
 0x351   : > { %2396 = vst [vmem:[%s3511_s6 + $0x88] sm:$0xff] %v2364_v6  ;;  %2395 = vst [vmem:[%s3511_s6 + $0x80] sm:$0xff] %v2363_v56  ;;  %v2334_v40 = vmul.f32 %v2302_v33, %v4712_v34  ;;  %v2333_v37 = vmul.f32 %v2301_v46, %v4715_v61  ;;  %v2272_v26 = vmul.f32 2.0, %v2188_v22  ;;  %v2271_v48 = vmul.f32 2.0, %v2185_v16  ;;  %v2246_v6 = vld [vmem:[#allocation2 + $0xd8] sm:$0xff]  ;;  %v2245_v56 = vld [vmem:[#allocation2 + $0xd0] sm:$0xff] }
 0x352   : > { %v5331_v22 = vld [vmem:[#allocation49_spill] sm:$0xff] }
 0x353   : > { %v2366_v8 = vadd.f32 %v2334_v40, %v2238_v24  ;;  %v2365_v38 = vadd.f32 %v2333_v37, %v2237_v49  ;;  %v2304_v54 = vadd.f32 %v2272_v26, %v4905_v45  ;;  %v2303_v53 = vadd.f32 %v2271_v48, %v4907_v44  ;;  %v5330_v24 = vld [vmem:[#allocation48_spill] sm:$0xff] }
 0x354   : > { %v2194_v51 = vpop.xlane.xlu1 %2193  ;;  %v2191_v32 = vpop.xlane.xlu0 %2190 }
 0x355   : > { %2398 = vst [vmem:[%s3511_s6 + $0x98] sm:$0xff] %v2366_v8  ;;  %2397 = vst [vmem:[%s3511_s6 + $0x90] sm:$0xff] %v2365_v38  ;;  %v2336_v34 = vmul.f32 %v2304_v54, %v4722_v59  ;;  %v2335_v61 = vmul.f32 %v2303_v53, %v4725_v20  ;;  %v2274_v11 = vmul.f32 2.0, %v2194_v51  ;;  %v2273_v7 = vmul.f32 2.0, %v2191_v32  ;;  %v2248_v54 = vld [vmem:[#allocation2 + $0xe8] sm:$0xff]  ;;  %v2247_v53 = vld [vmem:[#allocation2 + $0xe0] sm:$0xff] }
 0x356   : > { %v5332_v51 = vld [vmem:[#allocation50_spill] sm:$0xff] }
 0x357   : > { %v2368_v27 = vadd.f32 %v2336_v34, %v2240_v13  ;;  %v2367_v5 = vadd.f32 %v2335_v61, %v2239_v1  ;;  %v2306_v45 = vadd.f32 %v2274_v11, %v4909_v57  ;;  %v2305_v44 = vadd.f32 %v2273_v7, %v4911_v60  ;;  %v5333_v34 = vld [vmem:[#allocation51_spill] sm:$0xff] }
 0x358   : > { %v2200_v14 = vpop.xlane.xlu1 %2199  ;;  %v2197_v36 = vpop.xlane.xlu0 %2196 }
 0x359   : > { %2400 = vst [vmem:[%s3511_s6 + $0xa8] sm:$0xff] %v2368_v27  ;;  %2399 = vst [vmem:[%s3511_s6 + $0xa0] sm:$0xff] %v2367_v5  ;;  %v2338_v59 = vmul.f32 %v2306_v45, %v5326_v62  ;;  %v2337_v20 = vmul.f32 %v2305_v44, %v5327_v42  ;;  %v2276_v23 = vmul.f32 2.0, %v2200_v14  ;;  %v2275_v12 = vmul.f32 2.0, %v2197_v36  ;;  %v5334_v14 = vld [vmem:[#allocation52_spill] sm:$0xff]  ;;  %v5335_v62 = vld [vmem:[#allocation53_spill] sm:$0xff] }
 0x35b   : > { %v2370_v52 = vadd.f32 %v2338_v59, %v2242_v10  ;;  %v2369_v17 = vadd.f32 %v2337_v20, %v2241_v15  ;;  %v2250_v10 = vld [vmem:[#allocation2 + $0xf8] sm:$0xff]  ;;  %v2249_v15 = vld [vmem:[#allocation2 + $0xf0] sm:$0xff] }
 0x35c   : > { %v2206_v35 = vpop.xlane.xlu1 %2205  ;;  %v2203_v50 = vpop.xlane.xlu0 %2202 }
 0x35d   : > { %2402 = vst [vmem:[%s3511_s6 + $0xb8] sm:$0xff] %v2370_v52  ;;  %2401 = vst [vmem:[%s3511_s6 + $0xb0] sm:$0xff] %v2369_v17  ;;  %v2278_v63 = vmul.f32 2.0, %v2206_v35  ;;  %v2277_v21 = vmul.f32 2.0, %v2203_v50 }
 0x360   : > { %v2212_v47 = vpop.xlane.xlu1 %2211  ;;  %v2209_v57 = vpop.xlane.xlu0 %2208 }
 0x361   : > { %v2280_v33 = vmul.f32 2.0, %v2212_v47  ;;  %v2279_v46 = vmul.f32 2.0, %v2209_v57 }
 0x364   : > { %v2218_v28 = vpop.xlane.xlu1 %2217  ;;  %v2215_v60 = vpop.xlane.xlu0 %2214 }
 0x365   : > { %v2282_v13 = vmul.f32 2.0, %v2218_v28  ;;  %v2281_v1 = vmul.f32 2.0, %v2215_v60 }
 0x368   : > { %v2034_v55 = vpop.xlane.xlu1 %2033  ;;  %v2032_v43 = vpop.xlane.xlu0 %2031 }
 0x369   : > { %v2308_v39 = vadd.f32 %v2276_v23, %v2034_v55  ;;  %v2307_v29 = vadd.f32 %v2275_v12, %v2032_v43 }
 0x36b   : > { %v2340_v31 = vmul.f32 %v2308_v39, %v5328_v30  ;;  %v2339_v18 = vmul.f32 %v2307_v29, %v5329_v0 }
 0x36c   : > { %v2038_v9 = vpop.xlane.xlu1 %2037  ;;  %v2036_v3 = vpop.xlane.xlu0 %2035 }
 0x36d   : > { %v2372_v41 = vadd.f32 %v2340_v31, %v2244_v58  ;;  %v2371_v2 = vadd.f32 %v2339_v18, %v2243_v4  ;;  %v2310_v25 = vadd.f32 %v2278_v63, %v2038_v9  ;;  %v2309_v19 = vadd.f32 %v2277_v21, %v2036_v3 }
 0x36f   : > { %2404 = vst [vmem:[%s3511_s6 + $0xc8] sm:$0xff] %v2372_v41  ;;  %2403 = vst [vmem:[%s3511_s6 + $0xc0] sm:$0xff] %v2371_v2  ;;  %v2342_v49 = vmul.f32 %v2310_v25, %v5330_v24  ;;  %v2341_v16 = vmul.f32 %v2309_v19, %v5331_v22 }
 0x370   : > { %v2042_v40 = vpop.xlane.xlu1 %2041  ;;  %v2040_v37 = vpop.xlane.xlu0 %2039 }
 0x371   : > { %v2374_v26 = vadd.f32 %v2342_v49, %v2246_v6  ;;  %v2373_v48 = vadd.f32 %v2341_v16, %v2245_v56  ;;  %v2312_v8 = vadd.f32 %v2280_v33, %v2042_v40  ;;  %v2311_v38 = vadd.f32 %v2279_v46, %v2040_v37 }
 0x373   : > { %2406 = vst [vmem:[%s3511_s6 + $0xd8] sm:$0xff] %v2374_v26  ;;  %2405 = vst [vmem:[%s3511_s6 + $0xd0] sm:$0xff] %v2373_v48  ;;  %v2344_v32 = vmul.f32 %v2312_v8, %v5332_v51  ;;  %v2343_v61 = vmul.f32 %v2311_v38, %v5333_v34 }
 0x374   : > { %v2046_v11 = vpop.xlane.xlu1 %2045  ;;  %v2044_v7 = vpop.xlane.xlu0 %2043 }
 0x375   : > { %v2376_v27 = vadd.f32 %v2344_v32, %v2248_v54  ;;  %v2375_v5 = vadd.f32 %v2343_v61, %v2247_v53  ;;  %v2314_v45 = vadd.f32 %v2282_v13, %v2046_v11  ;;  %v2313_v44 = vadd.f32 %v2281_v1, %v2044_v7 }
 0x377   : > { %2408 = vst [vmem:[%s3511_s6 + $0xe8] sm:$0xff] %v2376_v27  ;;  %2407 = vst [vmem:[%s3511_s6 + $0xe0] sm:$0xff] %v2375_v5  ;;  %v2346_v36 = vmul.f32 %v2314_v45, %v5334_v14  ;;  %v2345_v59 = vmul.f32 %v2313_v44, %v5335_v62 }
 0x379   : > { %v2378_v42 = vadd.f32 %v2346_v36, %v2250_v10  ;;  %v2377_v20 = vadd.f32 %v2345_v59, %v2249_v15 }
 0x37b   : > { %2410 = vst [vmem:[%s3511_s6 + $0xf8] sm:$0xff] %v2378_v42  ;;  %2409 = vst [vmem:[%s3511_s6 + $0xf0] sm:$0xff] %v2377_v20 }
 0x37c PF: > { %s14_s21 = sadd.s32 1, %s3124_s21   ;;  %s5336_s15 = smov %s3104_s16 }
 0x37d   : > { %p11_p1 = scmp.ge.s32.totalorder %s14_s21, 6   ;;  %s5337_s16 = smov %s3210_s29 }
 0x37e   : > { %s5338_s17 = smov %s3116_s19  ;;  %s5339_s18 = smov %s3120_s20 }
 0x37f   : > { %s5340_s19 = smov %s5343_s22  ;;  %s5341_s20 = smov %s5347_s23 }
 0x380   :  { %13 = sbr.rel (!%p11_p1) target bundleno = 4 (0x4), region = 139 }

</bundles_post_ra>
